<compile_context>
chip_gen: v7x
topology: tpu7x:2x2x1
jax: 0.10.0
libtpu: 0.0.40
codegen_flags: <defaults>
</compile_context>

<pallas_src>
import math

import jax
import jax.numpy as jnp
from jax.experimental import pallas as pl
from jax.experimental.pallas import tpu as pltpu

# ----------------------- model dimensions (small, synthetic) -----------------
B = 2
C = 3
IMG = 16
PATCH = 4
NPATCH = (IMG // PATCH) ** 2        # 16 patches
PATCH_DIM = C * PATCH * PATCH       # 48
HIDDEN = 32
HEADS = 2
HEAD_DIM = HIDDEN // HEADS          # 16
FFN = 64
SEQ = 8
VOCAB = 64


# --------------------------- in-kernel helpers (values) ----------------------
def _layernorm(x, g, b):
    mu = jnp.mean(x, axis=-1, keepdims=True)
    var = jnp.mean(jnp.square(x - mu), axis=-1, keepdims=True)
    return (x - mu) * jax.lax.rsqrt(var + 1e-5) * g + b


def _mha(x_q, x_kv, wq_ref, bq_ref, wk_ref, bk_ref, wv_ref, bv_ref,
         wo_ref, bo_ref, mask):
    """Multi-head attention, fully VMEM-resident.

    x_q: [T, HIDDEN], x_kv: [S, HIDDEN].
    Per-head weights: wq/wk/wv [HEADS, HIDDEN, HEAD_DIM], wo [HEADS, HEAD_DIM, HIDDEN].
    mask: additive [T, S] or None.
    """
    scale = 1.0 / math.sqrt(HEAD_DIM)
    out = None
    for h in range(HEADS):  # static unroll (HEADS == 2)
        q = jnp.dot(x_q, wq_ref[h], preferred_element_type=jnp.float32) + bq_ref[h]
        k = jnp.dot(x_kv, wk_ref[h], preferred_element_type=jnp.float32) + bk_ref[h]
        v = jnp.dot(x_kv, wv_ref[h], preferred_element_type=jnp.float32) + bv_ref[h]
        # scores: contract last dims of q and k (no transpose needed)
        s = jax.lax.dot_general(q, k, (((1,), (1,)), ((), ())),
                                preferred_element_type=jnp.float32) * scale  # [T, S]
        if mask is not None:
            s = s + mask
        s = s - jnp.max(s, axis=-1, keepdims=True)
        p = jnp.exp(s)
        p = p * pl.reciprocal(jnp.sum(p, axis=-1, keepdims=True), approx=True)
        ctx = jnp.dot(p, v, preferred_element_type=jnp.float32)              # [T, D]
        contrib = jnp.dot(ctx, wo_ref[h], preferred_element_type=jnp.float32)
        out = contrib if out is None else out + contrib
    return out + bo_ref[...]


# ----------------------------- fused encoder kernel --------------------------
def _vision_encoder_kernel(
    x_ref,                                   # [1, NPATCH, PATCH_DIM]
    pw_ref, pb_ref, pos_ref,
    ln1g_ref, ln1b_ref,
    wq_ref, bq_ref, wk_ref, bk_ref, wv_ref, bv_ref, wo_ref, bo_ref,
    ln2g_ref, ln2b_ref,
    f1w_ref, f1b_ref, f2w_ref, f2b_ref,
    lnfg_ref, lnfb_ref,
    out_ref,                                 # [1, NPATCH, HIDDEN]
):
    x = x_ref[0]                                                     # [NPATCH, PATCH_DIM]
    h = jnp.dot(x, pw_ref[...], preferred_element_type=jnp.float32) + pb_ref[...]
    h = h + pos_ref[...]

    hn = _layernorm(h, ln1g_ref[...], ln1b_ref[...])
    h = h + _mha(hn, hn, wq_ref, bq_ref, wk_ref, bk_ref, wv_ref, bv_ref,
                 wo_ref, bo_ref, mask=None)

    hn = _layernorm(h, ln2g_ref[...], ln2b_ref[...])
    f = jax.nn.gelu(jnp.dot(hn, f1w_ref[...], preferred_element_type=jnp.float32)
                    + f1b_ref[...], approximate=True)
    f = jnp.dot(f, f2w_ref[...], preferred_element_type=jnp.float32) + f2b_ref[...]
    h = h + f

    out_ref[0] = _layernorm(h, lnfg_ref[...], lnfb_ref[...])


# ----------------------------- fused decoder kernel --------------------------
def _text_decoder_kernel(
    ids_ref, labels_ref, mem_ref,            # [1,SEQ,1] i32, [1,SEQ,1] i32, [1,NPATCH,H]
    emb_ref, pos_ref,
    ln1g_ref, ln1b_ref,
    s_wq, s_bq, s_wk, s_bk, s_wv, s_bv, s_wo, s_bo,
    ln2g_ref, ln2b_ref,
    c_wq, c_bq, c_wk, c_bk, c_wv, c_bv, c_wo, c_bo,
    ln3g_ref, ln3b_ref,
    f1w_ref, f1b_ref, f2w_ref, f2b_ref,
    lnfg_ref, lnfb_ref,
    lmw_ref, lmb_ref,
    logits_ref, loss_sum_ref, loss_cnt_ref,  # [1,SEQ,V], [1,1,1], [1,1,1]
):
    ids = ids_ref[0]                                                  # [SEQ, 1] int32
    vocab_ids = jax.lax.broadcasted_iota(jnp.int32, (SEQ, VOCAB), 1)  # [SEQ, VOCAB]

    # token embedding as one-hot matmul (MXU-friendly, stays in VMEM)
    onehot = (vocab_ids == ids).astype(jnp.float32)                   # [SEQ, VOCAB]
    h = jnp.dot(onehot, emb_ref[...], preferred_element_type=jnp.float32) + pos_ref[...]
    mem = mem_ref[0]                                                  # [NPATCH, HIDDEN]

    # causal mask generated in-kernel (no HBM mask array)
    rows = jax.lax.broadcasted_iota(jnp.int32, (SEQ, SEQ), 0)
    cols = jax.lax.broadcasted_iota(jnp.int32, (SEQ, SEQ), 1)
    causal = jnp.where(rows >= cols, 0.0, -1e9).astype(jnp.float32)

    hn = _layernorm(h, ln1g_ref[...], ln1b_ref[...])
    h = h + _mha(hn, hn, s_wq, s_bq, s_wk, s_bk, s_wv, s_bv, s_wo, s_bo, causal)

    hn = _layernorm(h, ln2g_ref[...], ln2b_ref[...])
    h = h + _mha(hn, mem, c_wq, c_bq, c_wk, c_bk, c_wv, c_bv, c_wo, c_bo, None)

    hn = _layernorm(h, ln3g_ref[...], ln3b_ref[...])
    f = jax.nn.gelu(jnp.dot(hn, f1w_ref[...], preferred_element_type=jnp.float32)
                    + f1b_ref[...], approximate=True)
    f = jnp.dot(f, f2w_ref[...], preferred_element_type=jnp.float32) + f2b_ref[...]
    h = h + f

    h = _layernorm(h, lnfg_ref[...], lnfb_ref[...])
    logits = jnp.dot(h, lmw_ref[...], preferred_element_type=jnp.float32) + lmb_ref[...]
    logits_ref[0] = logits

    # cross-entropy partials (ignore_index = -100); global mean finished in wrapper
    labels = labels_ref[0]                                            # [SEQ, 1] int32
    m = jnp.max(logits, axis=-1, keepdims=True)
    lse = jnp.log(jnp.sum(jnp.exp(logits - m), axis=-1, keepdims=True)) + m
    picked = jnp.max(jnp.where(vocab_ids == labels, logits, -1e30),
                     axis=-1, keepdims=True)
    valid = (labels != -100).astype(jnp.float32)
    per_tok = (lse - picked) * valid                                  # [SEQ, 1]
    loss_sum_ref[0] = jnp.sum(per_tok, axis=0, keepdims=True)         # [1, 1]
    loss_cnt_ref[0] = jnp.sum(valid, axis=0, keepdims=True)           # [1, 1]


# ------------------------------ BlockSpec helpers -----------------------------
def _rep_spec(shape):
    """Full-array block, same block for every grid step (weights)."""
    nd = len(shape)

    def idx(b):
        return (0,) * nd

    return pl.BlockSpec(tuple(shape), idx)


def _batch_spec(shape):
    """Per-batch block: leading dim blocked at 1, rest full."""
    nd = len(shape)

    def idx(b):
        return (b,) + (0,) * (nd - 1)

    return pl.BlockSpec((1,) + tuple(shape[1:]), idx)


def _attn_weight_list(a):
    return [a["wq"], a["bq"], a["wk"], a["bk"], a["wv"], a["bv"], a["wo"], a["bo"]]


# --------------------------------- wrappers -----------------------------------
def vision_encoder(p, pixel_values):
    """NCHW pixels -> last_hidden_state [B, NPATCH, HIDDEN] (one pallas_call)."""
    Bv = pixel_values.shape[0]
    x = pixel_values.reshape(Bv, C, IMG // PATCH, PATCH, IMG // PATCH, PATCH)
    x = x.transpose(0, 2, 4, 1, 3, 5).reshape(Bv, NPATCH, PATCH_DIM)

    weights = [
        p["patch_w"], p["patch_b"], p["vis_pos"],
        p["vis_ln1_g"], p["vis_ln1_b"],
        *_attn_weight_list(p["vis_attn"]),
        p["vis_ln2_g"], p["vis_ln2_b"],
        p["vis_ffn1_w"], p["vis_ffn1_b"], p["vis_ffn2_w"], p["vis_ffn2_b"],
        p["vis_lnf_g"], p["vis_lnf_b"],
    ]
    return pl.pallas_call(
        _vision_encoder_kernel,
        grid=(Bv,),
        in_specs=[_batch_spec(x.shape)] + [_rep_spec(w.shape) for w in weights],
        out_specs=_batch_spec((Bv, NPATCH, HIDDEN)),
        out_shape=jax.ShapeDtypeStruct((Bv, NPATCH, HIDDEN), jnp.float32),
        compiler_params=pltpu.CompilerParams(dimension_semantics=("parallel",)),
    )(x, *weights)


def text_decoder(p, tgt, memory, labels=None):
    """Fused decoder: logits [B, SEQ, VOCAB] + per-batch loss partials (one pallas_call)."""
    Bd, T = tgt.shape
    ids3 = tgt.reshape(Bd, T, 1).astype(jnp.int32)
    if labels is None:
        labels3 = jnp.full((Bd, T, 1), -100, jnp.int32)   # all ignored -> loss unused
    else:
        labels3 = labels.reshape(Bd, T, 1).astype(jnp.int32)

    weights = [
        p["dec_emb"], p["dec_pos"],
        p["dec_ln1_g"], p["dec_ln1_b"],
        *_attn_weight_list(p["dec_self_attn"]),
        p["dec_ln2_g"], p["dec_ln2_b"],
        *_attn_weight_list(p["dec_cross_attn"]),
        p["dec_ln3_g"], p["dec_ln3_b"],
        p["dec_ffn1_w"], p["dec_ffn1_b"], p["dec_ffn2_w"], p["dec_ffn2_b"],
        p["dec_lnf_g"], p["dec_lnf_b"],
        p["lm_head_w"], p["lm_head_b"],
    ]
    logits, loss_sum, loss_cnt = pl.pallas_call(
        _text_decoder_kernel,
        grid=(Bd,),
        in_specs=([_batch_spec(ids3.shape), _batch_spec(labels3.shape),
                   _batch_spec(memory.shape)]
                  + [_rep_spec(w.shape) for w in weights]),
        out_specs=(
            _batch_spec((Bd, T, VOCAB)),
            _batch_spec((Bd, 1, 1)),
            _batch_spec((Bd, 1, 1)),
        ),
        out_shape=(
            jax.ShapeDtypeStruct((Bd, T, VOCAB), jnp.float32),
            jax.ShapeDtypeStruct((Bd, 1, 1), jnp.float32),
            jax.ShapeDtypeStruct((Bd, 1, 1), jnp.float32),
        ),
        compiler_params=pltpu.CompilerParams(dimension_semantics=("parallel",)),
    )(ids3, labels3, memory, *weights)
    return logits, loss_sum, loss_cnt


# --------------------------- parameter initialization ------------------------
def _dense(key, fan_in, fan_out):
    w = jax.random.normal(key, (fan_in, fan_out), jnp.float32) * 0.02
    b = jnp.zeros((1, fan_out), jnp.float32)
    return w, b


def _attn_params(key):
    ks = jax.random.split(key, 4)
    return {
        "wq": jax.random.normal(ks[0], (HEADS, HIDDEN, HEAD_DIM), jnp.float32) * 0.02,
        "bq": jnp.zeros((HEADS, 1, HEAD_DIM), jnp.float32),
        "wk": jax.random.normal(ks[1], (HEADS, HIDDEN, HEAD_DIM), jnp.float32) * 0.02,
        "bk": jnp.zeros((HEADS, 1, HEAD_DIM), jnp.float32),
        "wv": jax.random.normal(ks[2], (HEADS, HIDDEN, HEAD_DIM), jnp.float32) * 0.02,
        "bv": jnp.zeros((HEADS, 1, HEAD_DIM), jnp.float32),
        "wo": jax.random.normal(ks[3], (HEADS, HEAD_DIM, HIDDEN), jnp.float32) * 0.02,
        "bo": jnp.zeros((1, HIDDEN), jnp.float32),
    }


def init_params(key):
    ks = jax.random.split(key, 12)
    p = {}
    # vision encoder (ViT-style: patch embed + 1 pre-LN transformer layer)
    p["patch_w"], p["patch_b"] = _dense(ks[0], PATCH_DIM, HIDDEN)
    p["vis_pos"] = jax.random.normal(ks[1], (NPATCH, HIDDEN), jnp.float32) * 0.02
    p["vis_ln1_g"] = jnp.ones((1, HIDDEN), jnp.float32)
    p["vis_ln1_b"] = jnp.zeros((1, HIDDEN), jnp.float32)
    p["vis_attn"] = _attn_params(ks[2])
    p["vis_ln2_g"] = jnp.ones((1, HIDDEN), jnp.float32)
    p["vis_ln2_b"] = jnp.zeros((1, HIDDEN), jnp.float32)
    p["vis_ffn1_w"], p["vis_ffn1_b"] = _dense(ks[3], HIDDEN, FFN)
    p["vis_ffn2_w"], p["vis_ffn2_b"] = _dense(ks[4], FFN, HIDDEN)
    p["vis_lnf_g"] = jnp.ones((1, HIDDEN), jnp.float32)
    p["vis_lnf_b"] = jnp.zeros((1, HIDDEN), jnp.float32)
    # NOTE: the reference's text_encoder output is never consumed downstream
    # (dead code), so no text-encoder params are kept.
    # text decoder (causal self-attn + cross-attn to vision memory + FFN + LM head)
    p["dec_emb"] = jax.random.normal(ks[5], (VOCAB, HIDDEN), jnp.float32) * 0.02
    p["dec_pos"] = jax.random.normal(ks[6], (SEQ, HIDDEN), jnp.float32) * 0.02
    p["dec_ln1_g"] = jnp.ones((1, HIDDEN), jnp.float32)
    p["dec_ln1_b"] = jnp.zeros((1, HIDDEN), jnp.float32)
    p["dec_self_attn"] = _attn_params(ks[7])
    p["dec_ln2_g"] = jnp.ones((1, HIDDEN), jnp.float32)
    p["dec_ln2_b"] = jnp.zeros((1, HIDDEN), jnp.float32)
    p["dec_cross_attn"] = _attn_params(ks[8])
    p["dec_ln3_g"] = jnp.ones((1, HIDDEN), jnp.float32)
    p["dec_ln3_b"] = jnp.zeros((1, HIDDEN), jnp.float32)
    p["dec_ffn1_w"], p["dec_ffn1_b"] = _dense(ks[9], HIDDEN, FFN)
    p["dec_ffn2_w"], p["dec_ffn2_b"] = _dense(ks[10], FFN, HIDDEN)
    p["dec_lnf_g"] = jnp.ones((1, HIDDEN), jnp.float32)
    p["dec_lnf_b"] = jnp.zeros((1, HIDDEN), jnp.float32)
    p["lm_head_w"], p["lm_head_b"] = _dense(ks[11], HIDDEN, VOCAB)
    return p


# --------------------------------- forward ------------------------------------
def forward(params, pixel_values, input_ids=None, attention_mask=None, labels=None):
    del attention_mask  # only consumed by the dead text-encoder branch (removed)
    vision_features = vision_encoder(params, pixel_values)     # .last_hidden_state

    if input_ids is None and labels is not None:
        input_ids = labels
    # The reference also calls text_encoder(input_ids, attention_mask) here, but
    # its output is never used downstream; it is dead code and removed (XLA
    # would DCE it under jit anyway).

    tgt = input_ids if input_ids is not None else labels
    logits, loss_sum, loss_cnt = text_decoder(params, tgt, vision_features, labels)

    if labels is not None:
        # CrossEntropyLoss(ignore_index=-100, reduction='mean') over all valid tokens.
        loss = jnp.sum(loss_sum) / jnp.maximum(jnp.sum(loss_cnt), 1.0)
        return {"loss": loss, "logits": logits}
    return logits


# ----------------------------------- main --------------------------------------
if __name__ == "__main__":
    key = jax.random.PRNGKey(0)
    kp, kx, kl = jax.random.split(key, 3)
    params = init_params(kp)
    pixel_values = jax.random.normal(kx, (B, C, IMG, IMG), jnp.float32)   # NCHW
    labels = jax.random.randint(kl, (B, SEQ), 0, VOCAB, dtype=jnp.int32)

    fwd = jax.jit(forward)
    out = fwd(params, pixel_values, labels=labels)
    jax.block_until_ready(out["logits"])
    jax.block_until_ready(out["loss"])
    assert out["logits"].shape == (B, SEQ, VOCAB)
    assert out["loss"].shape == ()
    print("KERNEL_OK")
</pallas_src>

<mosaic_0001>
module attributes {stable_mosaic.version = 11 : i64} {
  func.func @_text_decoder_kernel(%arg0: i32, %arg1: memref<1x8x1xi32, #tpu.memory_space<vmem>>, %arg2: memref<1x8x1xi32, #tpu.memory_space<vmem>>, %arg3: memref<1x16x32xf32, #tpu.memory_space<vmem>>, %arg4: memref<64x32xf32, #tpu.memory_space<vmem>>, %arg5: memref<8x32xf32, #tpu.memory_space<vmem>>, %arg6: memref<1x32xf32, #tpu.memory_space<vmem>>, %arg7: memref<1x32xf32, #tpu.memory_space<vmem>>, %arg8: memref<2x32x16xf32, #tpu.memory_space<vmem>>, %arg9: memref<2x1x16xf32, #tpu.memory_space<vmem>>, %arg10: memref<2x32x16xf32, #tpu.memory_space<vmem>>, %arg11: memref<2x1x16xf32, #tpu.memory_space<vmem>>, %arg12: memref<2x32x16xf32, #tpu.memory_space<vmem>>, %arg13: memref<2x1x16xf32, #tpu.memory_space<vmem>>, %arg14: memref<2x16x32xf32, #tpu.memory_space<vmem>>, %arg15: memref<1x32xf32, #tpu.memory_space<vmem>>, %arg16: memref<1x32xf32, #tpu.memory_space<vmem>>, %arg17: memref<1x32xf32, #tpu.memory_space<vmem>>, %arg18: memref<2x32x16xf32, #tpu.memory_space<vmem>>, %arg19: memref<2x1x16xf32, #tpu.memory_space<vmem>>, %arg20: memref<2x32x16xf32, #tpu.memory_space<vmem>>, %arg21: memref<2x1x16xf32, #tpu.memory_space<vmem>>, %arg22: memref<2x32x16xf32, #tpu.memory_space<vmem>>, %arg23: memref<2x1x16xf32, #tpu.memory_space<vmem>>, %arg24: memref<2x16x32xf32, #tpu.memory_space<vmem>>, %arg25: memref<1x32xf32, #tpu.memory_space<vmem>>, %arg26: memref<1x32xf32, #tpu.memory_space<vmem>>, %arg27: memref<1x32xf32, #tpu.memory_space<vmem>>, %arg28: memref<32x64xf32, #tpu.memory_space<vmem>>, %arg29: memref<1x64xf32, #tpu.memory_space<vmem>>, %arg30: memref<64x32xf32, #tpu.memory_space<vmem>>, %arg31: memref<1x32xf32, #tpu.memory_space<vmem>>, %arg32: memref<1x32xf32, #tpu.memory_space<vmem>>, %arg33: memref<1x32xf32, #tpu.memory_space<vmem>>, %arg34: memref<32x64xf32, #tpu.memory_space<vmem>>, %arg35: memref<1x64xf32, #tpu.memory_space<vmem>>, %arg36: memref<1x8x64xf32, #tpu.memory_space<vmem>>, %arg37: memref<1x1x1xf32, #tpu.memory_space<vmem>>, %arg38: memref<1x1x1xf32, #tpu.memory_space<vmem>>) attributes {dimension_semantics = [#tpu.dimension_semantics<parallel>], iteration_bounds = array<i64: 2>, scalar_prefetch = 0 : i64, scratch_operands = 0 : i64, tpu.core_type = #tpu.core_type<tc>, window_params = [{transform_indices = @transform_0, window_bounds = array<i64: 1, 8, 1>}, {transform_indices = @transform_1, window_bounds = array<i64: 1, 8, 1>}, {transform_indices = @transform_2, window_bounds = array<i64: 1, 16, 32>}, {pipeline_mode = #tpu.pipeline_mode<synchronous>, transform_indices = @transform_3, window_bounds = array<i64: 64, 32>}, {pipeline_mode = #tpu.pipeline_mode<synchronous>, transform_indices = @transform_4, window_bounds = array<i64: 8, 32>}, {pipeline_mode = #tpu.pipeline_mode<synchronous>, transform_indices = @transform_5, window_bounds = array<i64: 1, 32>}, {pipeline_mode = #tpu.pipeline_mode<synchronous>, transform_indices = @transform_6, window_bounds = array<i64: 1, 32>}, {pipeline_mode = #tpu.pipeline_mode<synchronous>, transform_indices = @transform_7, window_bounds = array<i64: 2, 32, 16>}, {pipeline_mode = #tpu.pipeline_mode<synchronous>, transform_indices = @transform_8, window_bounds = array<i64: 2, 1, 16>}, {pipeline_mode = #tpu.pipeline_mode<synchronous>, transform_indices = @transform_9, window_bounds = array<i64: 2, 32, 16>}, {pipeline_mode = #tpu.pipeline_mode<synchronous>, transform_indices = @transform_10, window_bounds = array<i64: 2, 1, 16>}, {pipeline_mode = #tpu.pipeline_mode<synchronous>, transform_indices = @transform_11, window_bounds = array<i64: 2, 32, 16>}, {pipeline_mode = #tpu.pipeline_mode<synchronous>, transform_indices = @transform_12, window_bounds = array<i64: 2, 1, 16>}, {pipeline_mode = #tpu.pipeline_mode<synchronous>, transform_indices = @transform_13, window_bounds = array<i64: 2, 16, 32>}, {pipeline_mode = #tpu.pipeline_mode<synchronous>, transform_indices = @transform_14, window_bounds = array<i64: 1, 32>}, {pipeline_mode = #tpu.pipeline_mode<synchronous>, transform_indices = @transform_15, window_bounds = array<i64: 1, 32>}, {pipeline_mode = #tpu.pipeline_mode<synchronous>, transform_indices = @transform_16, window_bounds = array<i64: 1, 32>}, {pipeline_mode = #tpu.pipeline_mode<synchronous>, transform_indices = @transform_17, window_bounds = array<i64: 2, 32, 16>}, {pipeline_mode = #tpu.pipeline_mode<synchronous>, transform_indices = @transform_18, window_bounds = array<i64: 2, 1, 16>}, {pipeline_mode = #tpu.pipeline_mode<synchronous>, transform_indices = @transform_19, window_bounds = array<i64: 2, 32, 16>}, {pipeline_mode = #tpu.pipeline_mode<synchronous>, transform_indices = @transform_20, window_bounds = array<i64: 2, 1, 16>}, {pipeline_mode = #tpu.pipeline_mode<synchronous>, transform_indices = @transform_21, window_bounds = array<i64: 2, 32, 16>}, {pipeline_mode = #tpu.pipeline_mode<synchronous>, transform_indices = @transform_22, window_bounds = array<i64: 2, 1, 16>}, {pipeline_mode = #tpu.pipeline_mode<synchronous>, transform_indices = @transform_23, window_bounds = array<i64: 2, 16, 32>}, {pipeline_mode = #tpu.pipeline_mode<synchronous>, transform_indices = @transform_24, window_bounds = array<i64: 1, 32>}, {pipeline_mode = #tpu.pipeline_mode<synchronous>, transform_indices = @transform_25, window_bounds = array<i64: 1, 32>}, {pipeline_mode = #tpu.pipeline_mode<synchronous>, transform_indices = @transform_26, window_bounds = array<i64: 1, 32>}, {pipeline_mode = #tpu.pipeline_mode<synchronous>, transform_indices = @transform_27, window_bounds = array<i64: 32, 64>}, {pipeline_mode = #tpu.pipeline_mode<synchronous>, transform_indices = @transform_28, window_bounds = array<i64: 1, 64>}, {pipeline_mode = #tpu.pipeline_mode<synchronous>, transform_indices = @transform_29, window_bounds = array<i64: 64, 32>}, {pipeline_mode = #tpu.pipeline_mode<synchronous>, transform_indices = @transform_30, window_bounds = array<i64: 1, 32>}, {pipeline_mode = #tpu.pipeline_mode<synchronous>, transform_indices = @transform_31, window_bounds = array<i64: 1, 32>}, {pipeline_mode = #tpu.pipeline_mode<synchronous>, transform_indices = @transform_32, window_bounds = array<i64: 1, 32>}, {pipeline_mode = #tpu.pipeline_mode<synchronous>, transform_indices = @transform_33, window_bounds = array<i64: 32, 64>}, {pipeline_mode = #tpu.pipeline_mode<synchronous>, transform_indices = @transform_34, window_bounds = array<i64: 1, 64>}, {transform_indices = @transform_35, window_bounds = array<i64: 1, 8, 64>}, {transform_indices = @transform_36, window_bounds = array<i64: 1, 1, 1>}, {transform_indices = @transform_37, window_bounds = array<i64: 1, 1, 1>}]} {
    %c0 = arith.constant 0 : index
    %c0_0 = arith.constant 0 : index
    %c0_1 = arith.constant 0 : index
    %0 = vector.load %arg1[%c0, %c0_0, %c0_1] : memref<1x8x1xi32, #tpu.memory_space<vmem>>, vector<1x8x1xi32>
    %1 = vector.shape_cast %0 : vector<1x8x1xi32> to vector<8x1xi32>
    %2 = tpu.iota {dimensions = array<i32: 1>} : vector<8x64xi32>
    %3 = vector.broadcast %1 : vector<8x1xi32> to vector<8x64xi32>
    %4 = arith.cmpi eq, %2, %3 : vector<8x64xi32>
    %5 = arith.extui %4 : vector<8x64xi1> to vector<8x64xi32>
    %6 = arith.sitofp %5 : vector<8x64xi32> to vector<8x64xf32>
    %c0_2 = arith.constant 0 : index
    %c0_3 = arith.constant 0 : index
    %7 = vector.load %arg4[%c0_2, %c0_3] : memref<64x32xf32, #tpu.memory_space<vmem>>, vector<64x32xf32>
    %cst = arith.constant dense<0.000000e+00> : vector<8x32xf32>
    %8 = tpu.matmul %6, %7, %cst {dimension_numbers = #tpu.dot_dimension_numbers<[1], [0], [0], [1], [0, 0, 1, 1], [], []>} : vector<8x64xf32>, vector<64x32xf32>, vector<8x32xf32> -> vector<8x32xf32>
    %c0_4 = arith.constant 0 : index
    %c0_5 = arith.constant 0 : index
    %9 = vector.load %arg5[%c0_4, %c0_5] : memref<8x32xf32, #tpu.memory_space<vmem>>, vector<8x32xf32>
    %10 = arith.addf %8, %9 : vector<8x32xf32>
    %c0_6 = arith.constant 0 : index
    %c0_7 = arith.constant 0 : index
    %c0_8 = arith.constant 0 : index
    %11 = vector.load %arg3[%c0_6, %c0_7, %c0_8] : memref<1x16x32xf32, #tpu.memory_space<vmem>>, vector<1x16x32xf32>
    %12 = vector.shape_cast %11 : vector<1x16x32xf32> to vector<16x32xf32>
    %13 = tpu.iota {dimensions = array<i32: 0>} : vector<8x8xi32>
    %14 = tpu.iota {dimensions = array<i32: 1>} : vector<8x8xi32>
    %15 = arith.cmpi sge, %13, %14 : vector<8x8xi32>
    %cst_9 = arith.constant 0.000000e+00 : f32
    %cst_10 = arith.constant -1.000000e+09 : f32
    %16 = vector.broadcast %cst_9 : f32 to vector<8x8xf32>
    %17 = vector.broadcast %cst_10 : f32 to vector<8x8xf32>
    %18 = arith.select %15, %16, %17 : vector<8x8xi1>, vector<8x8xf32>
    %c0_11 = arith.constant 0 : index
    %c0_12 = arith.constant 0 : index
    %19 = vector.load %arg6[%c0_11, %c0_12] : memref<1x32xf32, #tpu.memory_space<vmem>>, vector<1x32xf32>
    %c0_13 = arith.constant 0 : index
    %c0_14 = arith.constant 0 : index
    %20 = vector.load %arg7[%c0_13, %c0_14] : memref<1x32xf32, #tpu.memory_space<vmem>>, vector<1x32xf32>
    %cst_15 = arith.constant dense<0.000000e+00> : vector<8xf32>
    %21 = vector.multi_reduction <add>, %10, %cst_15 [1] : vector<8x32xf32> to vector<8xf32>
    %22 = vector.shape_cast %21 : vector<8xf32> to vector<8x1xf32>
    %cst_16 = arith.constant 3.200000e+01 : f32
    %23 = vector.broadcast %cst_16 : f32 to vector<8x1xf32>
    %24 = arith.divf %22, %23 : vector<8x1xf32>
    %25 = vector.broadcast %24 : vector<8x1xf32> to vector<8x32xf32>
    %26 = arith.subf %10, %25 : vector<8x32xf32>
    %27 = arith.mulf %26, %26 : vector<8x32xf32>
    %cst_17 = arith.constant dense<0.000000e+00> : vector<8xf32>
    %28 = vector.multi_reduction <add>, %27, %cst_17 [1] : vector<8x32xf32> to vector<8xf32>
    %29 = vector.shape_cast %28 : vector<8xf32> to vector<8x1xf32>
    %cst_18 = arith.constant 3.200000e+01 : f32
    %30 = vector.broadcast %cst_18 : f32 to vector<8x1xf32>
    %31 = arith.divf %29, %30 : vector<8x1xf32>
    %32 = vector.broadcast %24 : vector<8x1xf32> to vector<8x32xf32>
    %33 = arith.subf %10, %32 : vector<8x32xf32>
    %cst_19 = arith.constant 9.99999974E-6 : f32
    %34 = vector.broadcast %cst_19 : f32 to vector<8x1xf32>
    %35 = arith.addf %31, %34 : vector<8x1xf32>
    %36 = math.rsqrt %35 : vector<8x1xf32>
    %37 = vector.broadcast %36 : vector<8x1xf32> to vector<8x32xf32>
    %38 = arith.mulf %33, %37 : vector<8x32xf32>
    %39 = vector.broadcast %19 : vector<1x32xf32> to vector<8x32xf32>
    %40 = arith.mulf %38, %39 : vector<8x32xf32>
    %41 = vector.broadcast %20 : vector<1x32xf32> to vector<8x32xf32>
    %42 = arith.addf %40, %41 : vector<8x32xf32>
    %c0_20 = arith.constant 0 : index
    %c0_21 = arith.constant 0 : index
    %c0_22 = arith.constant 0 : index
    %43 = vector.load %arg8[%c0_20, %c0_21, %c0_22] : memref<2x32x16xf32, #tpu.memory_space<vmem>>, vector<1x32x16xf32>
    %44 = vector.shape_cast %43 : vector<1x32x16xf32> to vector<32x16xf32>
    %cst_23 = arith.constant dense<0.000000e+00> : vector<8x16xf32>
    %45 = tpu.matmul %42, %44, %cst_23 {dimension_numbers = #tpu.dot_dimension_numbers<[1], [0], [0], [1], [0, 0, 1, 1], [], []>} : vector<8x32xf32>, vector<32x16xf32>, vector<8x16xf32> -> vector<8x16xf32>
    %c0_24 = arith.constant 0 : index
    %c0_25 = arith.constant 0 : index
    %c0_26 = arith.constant 0 : index
    %46 = vector.load %arg9[%c0_24, %c0_25, %c0_26] : memref<2x1x16xf32, #tpu.memory_space<vmem>>, vector<1x1x16xf32>
    %47 = vector.shape_cast %46 : vector<1x1x16xf32> to vector<1x16xf32>
    %48 = vector.broadcast %47 : vector<1x16xf32> to vector<8x16xf32>
    %49 = arith.addf %45, %48 : vector<8x16xf32>
    %c0_27 = arith.constant 0 : index
    %c0_28 = arith.constant 0 : index
    %c0_29 = arith.constant 0 : index
    %50 = vector.load %arg10[%c0_27, %c0_28, %c0_29] : memref<2x32x16xf32, #tpu.memory_space<vmem>>, vector<1x32x16xf32>
    %51 = vector.shape_cast %50 : vector<1x32x16xf32> to vector<32x16xf32>
    %cst_30 = arith.constant dense<0.000000e+00> : vector<8x16xf32>
    %52 = tpu.matmul %42, %51, %cst_30 {dimension_numbers = #tpu.dot_dimension_numbers<[1], [0], [0], [1], [0, 0, 1, 1], [], []>} : vector<8x32xf32>, vector<32x16xf32>, vector<8x16xf32> -> vector<8x16xf32>
    %c0_31 = arith.constant 0 : index
    %c0_32 = arith.constant 0 : index
    %c0_33 = arith.constant 0 : index
    %53 = vector.load %arg11[%c0_31, %c0_32, %c0_33] : memref<2x1x16xf32, #tpu.memory_space<vmem>>, vector<1x1x16xf32>
    %54 = vector.shape_cast %53 : vector<1x1x16xf32> to vector<1x16xf32>
    %55 = vector.broadcast %54 : vector<1x16xf32> to vector<8x16xf32>
    %56 = arith.addf %52, %55 : vector<8x16xf32>
    %c0_34 = arith.constant 0 : index
    %c0_35 = arith.constant 0 : index
    %c0_36 = arith.constant 0 : index
    %57 = vector.load %arg12[%c0_34, %c0_35, %c0_36] : memref<2x32x16xf32, #tpu.memory_space<vmem>>, vector<1x32x16xf32>
    %58 = vector.shape_cast %57 : vector<1x32x16xf32> to vector<32x16xf32>
    %cst_37 = arith.constant dense<0.000000e+00> : vector<8x16xf32>
    %59 = tpu.matmul %42, %58, %cst_37 {dimension_numbers = #tpu.dot_dimension_numbers<[1], [0], [0], [1], [0, 0, 1, 1], [], []>} : vector<8x32xf32>, vector<32x16xf32>, vector<8x16xf32> -> vector<8x16xf32>
    %c0_38 = arith.constant 0 : index
    %c0_39 = arith.constant 0 : index
    %c0_40 = arith.constant 0 : index
    %60 = vector.load %arg13[%c0_38, %c0_39, %c0_40] : memref<2x1x16xf32, #tpu.memory_space<vmem>>, vector<1x1x16xf32>
    %61 = vector.shape_cast %60 : vector<1x1x16xf32> to vector<1x16xf32>
    %62 = vector.broadcast %61 : vector<1x16xf32> to vector<8x16xf32>
    %63 = arith.addf %59, %62 : vector<8x16xf32>
    %cst_41 = arith.constant dense<0.000000e+00> : vector<8x8xf32>
    %64 = tpu.matmul %49, %56, %cst_41 {dimension_numbers = #tpu.dot_dimension_numbers<[1], [1], [0], [0], [0, 0, 1, 0], [], []>} : vector<8x16xf32>, vector<8x16xf32>, vector<8x8xf32> -> vector<8x8xf32>
    %cst_42 = arith.constant 2.500000e-01 : f32
    %65 = vector.broadcast %cst_42 : f32 to vector<8x8xf32>
    %66 = arith.mulf %64, %65 : vector<8x8xf32>
    %67 = arith.addf %66, %18 : vector<8x8xf32>
    %cst_43 = arith.constant dense<0xFF800000> : vector<8xf32>
    %68 = vector.multi_reduction <maximumf>, %67, %cst_43 [1] : vector<8x8xf32> to vector<8xf32>
    %69 = vector.shape_cast %68 : vector<8xf32> to vector<8x1xf32>
    %70 = vector.broadcast %69 : vector<8x1xf32> to vector<8x8xf32>
    %71 = arith.subf %67, %70 : vector<8x8xf32>
    %72 = math.exp %71 : vector<8x8xf32>
    %cst_44 = arith.constant dense<0.000000e+00> : vector<8xf32>
    %73 = vector.multi_reduction <add>, %72, %cst_44 [1] : vector<8x8xf32> to vector<8xf32>
    %74 = vector.shape_cast %73 : vector<8xf32> to vector<8x1xf32>
    %75 = tpu.reciprocal %74 {approx = true} : vector<8x1xf32> -> vector<8x1xf32>
    %76 = vector.broadcast %75 : vector<8x1xf32> to vector<8x8xf32>
    %77 = arith.mulf %72, %76 : vector<8x8xf32>
    %cst_45 = arith.constant dense<0.000000e+00> : vector<8x16xf32>
    %78 = tpu.matmul %77, %63, %cst_45 {dimension_numbers = #tpu.dot_dimension_numbers<[1], [0], [0], [1], [0, 0, 1, 1], [], []>} : vector<8x8xf32>, vector<8x16xf32>, vector<8x16xf32> -> vector<8x16xf32>
    %c0_46 = arith.constant 0 : index
    %c0_47 = arith.constant 0 : index
    %c0_48 = arith.constant 0 : index
    %79 = vector.load %arg14[%c0_46, %c0_47, %c0_48] : memref<2x16x32xf32, #tpu.memory_space<vmem>>, vector<1x16x32xf32>
    %80 = vector.shape_cast %79 : vector<1x16x32xf32> to vector<16x32xf32>
    %cst_49 = arith.constant dense<0.000000e+00> : vector<8x32xf32>
    %81 = tpu.matmul %78, %80, %cst_49 {dimension_numbers = #tpu.dot_dimension_numbers<[1], [0], [0], [1], [0, 0, 1, 1], [], []>} : vector<8x16xf32>, vector<16x32xf32>, vector<8x32xf32> -> vector<8x32xf32>
    %c1 = arith.constant 1 : index
    %c0_50 = arith.constant 0 : index
    %c0_51 = arith.constant 0 : index
    %82 = vector.load %arg8[%c1, %c0_50, %c0_51] : memref<2x32x16xf32, #tpu.memory_space<vmem>>, vector<1x32x16xf32>
    %83 = vector.shape_cast %82 : vector<1x32x16xf32> to vector<32x16xf32>
    %cst_52 = arith.constant dense<0.000000e+00> : vector<8x16xf32>
    %84 = tpu.matmul %42, %83, %cst_52 {dimension_numbers = #tpu.dot_dimension_numbers<[1], [0], [0], [1], [0, 0, 1, 1], [], []>} : vector<8x32xf32>, vector<32x16xf32>, vector<8x16xf32> -> vector<8x16xf32>
    %c1_53 = arith.constant 1 : index
    %c0_54 = arith.constant 0 : index
    %c0_55 = arith.constant 0 : index
    %85 = vector.load %arg9[%c1_53, %c0_54, %c0_55] : memref<2x1x16xf32, #tpu.memory_space<vmem>>, vector<1x1x16xf32>
    %86 = vector.shape_cast %85 : vector<1x1x16xf32> to vector<1x16xf32>
    %87 = vector.broadcast %86 : vector<1x16xf32> to vector<8x16xf32>
    %88 = arith.addf %84, %87 : vector<8x16xf32>
    %c1_56 = arith.constant 1 : index
    %c0_57 = arith.constant 0 : index
    %c0_58 = arith.constant 0 : index
    %89 = vector.load %arg10[%c1_56, %c0_57, %c0_58] : memref<2x32x16xf32, #tpu.memory_space<vmem>>, vector<1x32x16xf32>
    %90 = vector.shape_cast %89 : vector<1x32x16xf32> to vector<32x16xf32>
    %cst_59 = arith.constant dense<0.000000e+00> : vector<8x16xf32>
    %91 = tpu.matmul %42, %90, %cst_59 {dimension_numbers = #tpu.dot_dimension_numbers<[1], [0], [0], [1], [0, 0, 1, 1], [], []>} : vector<8x32xf32>, vector<32x16xf32>, vector<8x16xf32> -> vector<8x16xf32>
    %c1_60 = arith.constant 1 : index
    %c0_61 = arith.constant 0 : index
    %c0_62 = arith.constant 0 : index
    %92 = vector.load %arg11[%c1_60, %c0_61, %c0_62] : memref<2x1x16xf32, #tpu.memory_space<vmem>>, vector<1x1x16xf32>
    %93 = vector.shape_cast %92 : vector<1x1x16xf32> to vector<1x16xf32>
    %94 = vector.broadcast %93 : vector<1x16xf32> to vector<8x16xf32>
    %95 = arith.addf %91, %94 : vector<8x16xf32>
    %c1_63 = arith.constant 1 : index
    %c0_64 = arith.constant 0 : index
    %c0_65 = arith.constant 0 : index
    %96 = vector.load %arg12[%c1_63, %c0_64, %c0_65] : memref<2x32x16xf32, #tpu.memory_space<vmem>>, vector<1x32x16xf32>
    %97 = vector.shape_cast %96 : vector<1x32x16xf32> to vector<32x16xf32>
    %cst_66 = arith.constant dense<0.000000e+00> : vector<8x16xf32>
    %98 = tpu.matmul %42, %97, %cst_66 {dimension_numbers = #tpu.dot_dimension_numbers<[1], [0], [0], [1], [0, 0, 1, 1], [], []>} : vector<8x32xf32>, vector<32x16xf32>, vector<8x16xf32> -> vector<8x16xf32>
    %c1_67 = arith.constant 1 : index
    %c0_68 = arith.constant 0 : index
    %c0_69 = arith.constant 0 : index
    %99 = vector.load %arg13[%c1_67, %c0_68, %c0_69] : memref<2x1x16xf32, #tpu.memory_space<vmem>>, vector<1x1x16xf32>
    %100 = vector.shape_cast %99 : vector<1x1x16xf32> to vector<1x16xf32>
    %101 = vector.broadcast %100 : vector<1x16xf32> to vector<8x16xf32>
    %102 = arith.addf %98, %101 : vector<8x16xf32>
    %cst_70 = arith.constant dense<0.000000e+00> : vector<8x8xf32>
    %103 = tpu.matmul %88, %95, %cst_70 {dimension_numbers = #tpu.dot_dimension_numbers<[1], [1], [0], [0], [0, 0, 1, 0], [], []>} : vector<8x16xf32>, vector<8x16xf32>, vector<8x8xf32> -> vector<8x8xf32>
    %cst_71 = arith.constant 2.500000e-01 : f32
    %104 = vector.broadcast %cst_71 : f32 to vector<8x8xf32>
    %105 = arith.mulf %103, %104 : vector<8x8xf32>
    %106 = arith.addf %105, %18 : vector<8x8xf32>
    %cst_72 = arith.constant dense<0xFF800000> : vector<8xf32>
    %107 = vector.multi_reduction <maximumf>, %106, %cst_72 [1] : vector<8x8xf32> to vector<8xf32>
    %108 = vector.shape_cast %107 : vector<8xf32> to vector<8x1xf32>
    %109 = vector.broadcast %108 : vector<8x1xf32> to vector<8x8xf32>
    %110 = arith.subf %106, %109 : vector<8x8xf32>
    %111 = math.exp %110 : vector<8x8xf32>
    %cst_73 = arith.constant dense<0.000000e+00> : vector<8xf32>
    %112 = vector.multi_reduction <add>, %111, %cst_73 [1] : vector<8x8xf32> to vector<8xf32>
    %113 = vector.shape_cast %112 : vector<8xf32> to vector<8x1xf32>
    %114 = tpu.reciprocal %113 {approx = true} : vector<8x1xf32> -> vector<8x1xf32>
    %115 = vector.broadcast %114 : vector<8x1xf32> to vector<8x8xf32>
    %116 = arith.mulf %111, %115 : vector<8x8xf32>
    %cst_74 = arith.constant dense<0.000000e+00> : vector<8x16xf32>
    %117 = tpu.matmul %116, %102, %cst_74 {dimension_numbers = #tpu.dot_dimension_numbers<[1], [0], [0], [1], [0, 0, 1, 1], [], []>} : vector<8x8xf32>, vector<8x16xf32>, vector<8x16xf32> -> vector<8x16xf32>
    %c1_75 = arith.constant 1 : index
    %c0_76 = arith.constant 0 : index
    %c0_77 = arith.constant 0 : index
    %118 = vector.load %arg14[%c1_75, %c0_76, %c0_77] : memref<2x16x32xf32, #tpu.memory_space<vmem>>, vector<1x16x32xf32>
    %119 = vector.shape_cast %118 : vector<1x16x32xf32> to vector<16x32xf32>
    %cst_78 = arith.constant dense<0.000000e+00> : vector<8x32xf32>
    %120 = tpu.matmul %117, %119, %cst_78 {dimension_numbers = #tpu.dot_dimension_numbers<[1], [0], [0], [1], [0, 0, 1, 1], [], []>} : vector<8x16xf32>, vector<16x32xf32>, vector<8x32xf32> -> vector<8x32xf32>
    %121 = arith.addf %81, %120 : vector<8x32xf32>
    %c0_79 = arith.constant 0 : index
    %c0_80 = arith.constant 0 : index
    %122 = vector.load %arg15[%c0_79, %c0_80] : memref<1x32xf32, #tpu.memory_space<vmem>>, vector<1x32xf32>
    %123 = vector.broadcast %122 : vector<1x32xf32> to vector<8x32xf32>
    %124 = arith.addf %121, %123 : vector<8x32xf32>
    %125 = arith.addf %10, %124 : vector<8x32xf32>
    %c0_81 = arith.constant 0 : index
    %c0_82 = arith.constant 0 : index
    %126 = vector.load %arg16[%c0_81, %c0_82] : memref<1x32xf32, #tpu.memory_space<vmem>>, vector<1x32xf32>
    %c0_83 = arith.constant 0 : index
    %c0_84 = arith.constant 0 : index
    %127 = vector.load %arg17[%c0_83, %c0_84] : memref<1x32xf32, #tpu.memory_space<vmem>>, vector<1x32xf32>
    %cst_85 = arith.constant dense<0.000000e+00> : vector<8xf32>
    %128 = vector.multi_reduction <add>, %125, %cst_85 [1] : vector<8x32xf32> to vector<8xf32>
    %129 = vector.shape_cast %128 : vector<8xf32> to vector<8x1xf32>
    %cst_86 = arith.constant 3.200000e+01 : f32
    %130 = vector.broadcast %cst_86 : f32 to vector<8x1xf32>
    %131 = arith.divf %129, %130 : vector<8x1xf32>
    %132 = vector.broadcast %131 : vector<8x1xf32> to vector<8x32xf32>
    %133 = arith.subf %125, %132 : vector<8x32xf32>
    %134 = arith.mulf %133, %133 : vector<8x32xf32>
    %cst_87 = arith.constant dense<0.000000e+00> : vector<8xf32>
    %135 = vector.multi_reduction <add>, %134, %cst_87 [1] : vector<8x32xf32> to vector<8xf32>
    %136 = vector.shape_cast %135 : vector<8xf32> to vector<8x1xf32>
    %cst_88 = arith.constant 3.200000e+01 : f32
    %137 = vector.broadcast %cst_88 : f32 to vector<8x1xf32>
    %138 = arith.divf %136, %137 : vector<8x1xf32>
    %139 = vector.broadcast %131 : vector<8x1xf32> to vector<8x32xf32>
    %140 = arith.subf %125, %139 : vector<8x32xf32>
    %cst_89 = arith.constant 9.99999974E-6 : f32
    %141 = vector.broadcast %cst_89 : f32 to vector<8x1xf32>
    %142 = arith.addf %138, %141 : vector<8x1xf32>
    %143 = math.rsqrt %142 : vector<8x1xf32>
    %144 = vector.broadcast %143 : vector<8x1xf32> to vector<8x32xf32>
    %145 = arith.mulf %140, %144 : vector<8x32xf32>
    %146 = vector.broadcast %126 : vector<1x32xf32> to vector<8x32xf32>
    %147 = arith.mulf %145, %146 : vector<8x32xf32>
    %148 = vector.broadcast %127 : vector<1x32xf32> to vector<8x32xf32>
    %149 = arith.addf %147, %148 : vector<8x32xf32>
    %c0_90 = arith.constant 0 : index
    %c0_91 = arith.constant 0 : index
    %c0_92 = arith.constant 0 : index
    %150 = vector.load %arg18[%c0_90, %c0_91, %c0_92] : memref<2x32x16xf32, #tpu.memory_space<vmem>>, vector<1x32x16xf32>
    %151 = vector.shape_cast %150 : vector<1x32x16xf32> to vector<32x16xf32>
    %cst_93 = arith.constant dense<0.000000e+00> : vector<8x16xf32>
    %152 = tpu.matmul %149, %151, %cst_93 {dimension_numbers = #tpu.dot_dimension_numbers<[1], [0], [0], [1], [0, 0, 1, 1], [], []>} : vector<8x32xf32>, vector<32x16xf32>, vector<8x16xf32> -> vector<8x16xf32>
    %c0_94 = arith.constant 0 : index
    %c0_95 = arith.constant 0 : index
    %c0_96 = arith.constant 0 : index
    %153 = vector.load %arg19[%c0_94, %c0_95, %c0_96] : memref<2x1x16xf32, #tpu.memory_space<vmem>>, vector<1x1x16xf32>
    %154 = vector.shape_cast %153 : vector<1x1x16xf32> to vector<1x16xf32>
    %155 = vector.broadcast %154 : vector<1x16xf32> to vector<8x16xf32>
    %156 = arith.addf %152, %155 : vector<8x16xf32>
    %c0_97 = arith.constant 0 : index
    %c0_98 = arith.constant 0 : index
    %c0_99 = arith.constant 0 : index
    %157 = vector.load %arg20[%c0_97, %c0_98, %c0_99] : memref<2x32x16xf32, #tpu.memory_space<vmem>>, vector<1x32x16xf32>
    %158 = vector.shape_cast %157 : vector<1x32x16xf32> to vector<32x16xf32>
    %cst_100 = arith.constant dense<0.000000e+00> : vector<16x16xf32>
    %159 = tpu.matmul %12, %158, %cst_100 {dimension_numbers = #tpu.dot_dimension_numbers<[1], [0], [0], [1], [0, 0, 1, 1], [], []>} : vector<16x32xf32>, vector<32x16xf32>, vector<16x16xf32> -> vector<16x16xf32>
    %c0_101 = arith.constant 0 : index
    %c0_102 = arith.constant 0 : index
    %c0_103 = arith.constant 0 : index
    %160 = vector.load %arg21[%c0_101, %c0_102, %c0_103] : memref<2x1x16xf32, #tpu.memory_space<vmem>>, vector<1x1x16xf32>
    %161 = vector.shape_cast %160 : vector<1x1x16xf32> to vector<1x16xf32>
    %162 = vector.broadcast %161 : vector<1x16xf32> to vector<16x16xf32>
    %163 = arith.addf %159, %162 : vector<16x16xf32>
    %c0_104 = arith.constant 0 : index
    %c0_105 = arith.constant 0 : index
    %c0_106 = arith.constant 0 : index
    %164 = vector.load %arg22[%c0_104, %c0_105, %c0_106] : memref<2x32x16xf32, #tpu.memory_space<vmem>>, vector<1x32x16xf32>
    %165 = vector.shape_cast %164 : vector<1x32x16xf32> to vector<32x16xf32>
    %cst_107 = arith.constant dense<0.000000e+00> : vector<16x16xf32>
    %166 = tpu.matmul %12, %165, %cst_107 {dimension_numbers = #tpu.dot_dimension_numbers<[1], [0], [0], [1], [0, 0, 1, 1], [], []>} : vector<16x32xf32>, vector<32x16xf32>, vector<16x16xf32> -> vector<16x16xf32>
    %c0_108 = arith.constant 0 : index
    %c0_109 = arith.constant 0 : index
    %c0_110 = arith.constant 0 : index
    %167 = vector.load %arg23[%c0_108, %c0_109, %c0_110] : memref<2x1x16xf32, #tpu.memory_space<vmem>>, vector<1x1x16xf32>
    %168 = vector.shape_cast %167 : vector<1x1x16xf32> to vector<1x16xf32>
    %169 = vector.broadcast %168 : vector<1x16xf32> to vector<16x16xf32>
    %170 = arith.addf %166, %169 : vector<16x16xf32>
    %cst_111 = arith.constant dense<0.000000e+00> : vector<8x16xf32>
    %171 = tpu.matmul %156, %163, %cst_111 {dimension_numbers = #tpu.dot_dimension_numbers<[1], [1], [0], [0], [0, 0, 1, 0], [], []>} : vector<8x16xf32>, vector<16x16xf32>, vector<8x16xf32> -> vector<8x16xf32>
    %cst_112 = arith.constant 2.500000e-01 : f32
    %172 = vector.broadcast %cst_112 : f32 to vector<8x16xf32>
    %173 = arith.mulf %171, %172 : vector<8x16xf32>
    %cst_113 = arith.constant dense<0xFF800000> : vector<8xf32>
    %174 = vector.multi_reduction <maximumf>, %173, %cst_113 [1] : vector<8x16xf32> to vector<8xf32>
    %175 = vector.shape_cast %174 : vector<8xf32> to vector<8x1xf32>
    %176 = vector.broadcast %175 : vector<8x1xf32> to vector<8x16xf32>
    %177 = arith.subf %173, %176 : vector<8x16xf32>
    %178 = math.exp %177 : vector<8x16xf32>
    %cst_114 = arith.constant dense<0.000000e+00> : vector<8xf32>
    %179 = vector.multi_reduction <add>, %178, %cst_114 [1] : vector<8x16xf32> to vector<8xf32>
    %180 = vector.shape_cast %179 : vector<8xf32> to vector<8x1xf32>
    %181 = tpu.reciprocal %180 {approx = true} : vector<8x1xf32> -> vector<8x1xf32>
    %182 = vector.broadcast %181 : vector<8x1xf32> to vector<8x16xf32>
    %183 = arith.mulf %178, %182 : vector<8x16xf32>
    %cst_115 = arith.constant dense<0.000000e+00> : vector<8x16xf32>
    %184 = tpu.matmul %183, %170, %cst_115 {dimension_numbers = #tpu.dot_dimension_numbers<[1], [0], [0], [1], [0, 0, 1, 1], [], []>} : vector<8x16xf32>, vector<16x16xf32>, vector<8x16xf32> -> vector<8x16xf32>
    %c0_116 = arith.constant 0 : index
    %c0_117 = arith.constant 0 : index
    %c0_118 = arith.constant 0 : index
    %185 = vector.load %arg24[%c0_116, %c0_117, %c0_118] : memref<2x16x32xf32, #tpu.memory_space<vmem>>, vector<1x16x32xf32>
    %186 = vector.shape_cast %185 : vector<1x16x32xf32> to vector<16x32xf32>
    %cst_119 = arith.constant dense<0.000000e+00> : vector<8x32xf32>
    %187 = tpu.matmul %184, %186, %cst_119 {dimension_numbers = #tpu.dot_dimension_numbers<[1], [0], [0], [1], [0, 0, 1, 1], [], []>} : vector<8x16xf32>, vector<16x32xf32>, vector<8x32xf32> -> vector<8x32xf32>
    %c1_120 = arith.constant 1 : index
    %c0_121 = arith.constant 0 : index
    %c0_122 = arith.constant 0 : index
    %188 = vector.load %arg18[%c1_120, %c0_121, %c0_122] : memref<2x32x16xf32, #tpu.memory_space<vmem>>, vector<1x32x16xf32>
    %189 = vector.shape_cast %188 : vector<1x32x16xf32> to vector<32x16xf32>
    %cst_123 = arith.constant dense<0.000000e+00> : vector<8x16xf32>
    %190 = tpu.matmul %149, %189, %cst_123 {dimension_numbers = #tpu.dot_dimension_numbers<[1], [0], [0], [1], [0, 0, 1, 1], [], []>} : vector<8x32xf32>, vector<32x16xf32>, vector<8x16xf32> -> vector<8x16xf32>
    %c1_124 = arith.constant 1 : index
    %c0_125 = arith.constant 0 : index
    %c0_126 = arith.constant 0 : index
    %191 = vector.load %arg19[%c1_124, %c0_125, %c0_126] : memref<2x1x16xf32, #tpu.memory_space<vmem>>, vector<1x1x16xf32>
    %192 = vector.shape_cast %191 : vector<1x1x16xf32> to vector<1x16xf32>
    %193 = vector.broadcast %192 : vector<1x16xf32> to vector<8x16xf32>
    %194 = arith.addf %190, %193 : vector<8x16xf32>
    %c1_127 = arith.constant 1 : index
    %c0_128 = arith.constant 0 : index
    %c0_129 = arith.constant 0 : index
    %195 = vector.load %arg20[%c1_127, %c0_128, %c0_129] : memref<2x32x16xf32, #tpu.memory_space<vmem>>, vector<1x32x16xf32>
    %196 = vector.shape_cast %195 : vector<1x32x16xf32> to vector<32x16xf32>
    %cst_130 = arith.constant dense<0.000000e+00> : vector<16x16xf32>
    %197 = tpu.matmul %12, %196, %cst_130 {dimension_numbers = #tpu.dot_dimension_numbers<[1], [0], [0], [1], [0, 0, 1, 1], [], []>} : vector<16x32xf32>, vector<32x16xf32>, vector<16x16xf32> -> vector<16x16xf32>
    %c1_131 = arith.constant 1 : index
    %c0_132 = arith.constant 0 : index
    %c0_133 = arith.constant 0 : index
    %198 = vector.load %arg21[%c1_131, %c0_132, %c0_133] : memref<2x1x16xf32, #tpu.memory_space<vmem>>, vector<1x1x16xf32>
    %199 = vector.shape_cast %198 : vector<1x1x16xf32> to vector<1x16xf32>
    %200 = vector.broadcast %199 : vector<1x16xf32> to vector<16x16xf32>
    %201 = arith.addf %197, %200 : vector<16x16xf32>
    %c1_134 = arith.constant 1 : index
    %c0_135 = arith.constant 0 : index
    %c0_136 = arith.constant 0 : index
    %202 = vector.load %arg22[%c1_134, %c0_135, %c0_136] : memref<2x32x16xf32, #tpu.memory_space<vmem>>, vector<1x32x16xf32>
    %203 = vector.shape_cast %202 : vector<1x32x16xf32> to vector<32x16xf32>
    %cst_137 = arith.constant dense<0.000000e+00> : vector<16x16xf32>
    %204 = tpu.matmul %12, %203, %cst_137 {dimension_numbers = #tpu.dot_dimension_numbers<[1], [0], [0], [1], [0, 0, 1, 1], [], []>} : vector<16x32xf32>, vector<32x16xf32>, vector<16x16xf32> -> vector<16x16xf32>
    %c1_138 = arith.constant 1 : index
    %c0_139 = arith.constant 0 : index
    %c0_140 = arith.constant 0 : index
    %205 = vector.load %arg23[%c1_138, %c0_139, %c0_140] : memref<2x1x16xf32, #tpu.memory_space<vmem>>, vector<1x1x16xf32>
    %206 = vector.shape_cast %205 : vector<1x1x16xf32> to vector<1x16xf32>
    %207 = vector.broadcast %206 : vector<1x16xf32> to vector<16x16xf32>
    %208 = arith.addf %204, %207 : vector<16x16xf32>
    %cst_141 = arith.constant dense<0.000000e+00> : vector<8x16xf32>
    %209 = tpu.matmul %194, %201, %cst_141 {dimension_numbers = #tpu.dot_dimension_numbers<[1], [1], [0], [0], [0, 0, 1, 0], [], []>} : vector<8x16xf32>, vector<16x16xf32>, vector<8x16xf32> -> vector<8x16xf32>
    %cst_142 = arith.constant 2.500000e-01 : f32
    %210 = vector.broadcast %cst_142 : f32 to vector<8x16xf32>
    %211 = arith.mulf %209, %210 : vector<8x16xf32>
    %cst_143 = arith.constant dense<0xFF800000> : vector<8xf32>
    %212 = vector.multi_reduction <maximumf>, %211, %cst_143 [1] : vector<8x16xf32> to vector<8xf32>
    %213 = vector.shape_cast %212 : vector<8xf32> to vector<8x1xf32>
    %214 = vector.broadcast %213 : vector<8x1xf32> to vector<8x16xf32>
    %215 = arith.subf %211, %214 : vector<8x16xf32>
    %216 = math.exp %215 : vector<8x16xf32>
    %cst_144 = arith.constant dense<0.000000e+00> : vector<8xf32>
    %217 = vector.multi_reduction <add>, %216, %cst_144 [1] : vector<8x16xf32> to vector<8xf32>
    %218 = vector.shape_cast %217 : vector<8xf32> to vector<8x1xf32>
    %219 = tpu.reciprocal %218 {approx = true} : vector<8x1xf32> -> vector<8x1xf32>
    %220 = vector.broadcast %219 : vector<8x1xf32> to vector<8x16xf32>
    %221 = arith.mulf %216, %220 : vector<8x16xf32>
    %cst_145 = arith.constant dense<0.000000e+00> : vector<8x16xf32>
    %222 = tpu.matmul %221, %208, %cst_145 {dimension_numbers = #tpu.dot_dimension_numbers<[1], [0], [0], [1], [0, 0, 1, 1], [], []>} : vector<8x16xf32>, vector<16x16xf32>, vector<8x16xf32> -> vector<8x16xf32>
    %c1_146 = arith.constant 1 : index
    %c0_147 = arith.constant 0 : index
    %c0_148 = arith.constant 0 : index
    %223 = vector.load %arg24[%c1_146, %c0_147, %c0_148] : memref<2x16x32xf32, #tpu.memory_space<vmem>>, vector<1x16x32xf32>
    %224 = vector.shape_cast %223 : vector<1x16x32xf32> to vector<16x32xf32>
    %cst_149 = arith.constant dense<0.000000e+00> : vector<8x32xf32>
    %225 = tpu.matmul %222, %224, %cst_149 {dimension_numbers = #tpu.dot_dimension_numbers<[1], [0], [0], [1], [0, 0, 1, 1], [], []>} : vector<8x16xf32>, vector<16x32xf32>, vector<8x32xf32> -> vector<8x32xf32>
    %226 = arith.addf %187, %225 : vector<8x32xf32>
    %c0_150 = arith.constant 0 : index
    %c0_151 = arith.constant 0 : index
    %227 = vector.load %arg25[%c0_150, %c0_151] : memref<1x32xf32, #tpu.memory_space<vmem>>, vector<1x32xf32>
    %228 = vector.broadcast %227 : vector<1x32xf32> to vector<8x32xf32>
    %229 = arith.addf %226, %228 : vector<8x32xf32>
    %230 = arith.addf %125, %229 : vector<8x32xf32>
    %c0_152 = arith.constant 0 : index
    %c0_153 = arith.constant 0 : index
    %231 = vector.load %arg26[%c0_152, %c0_153] : memref<1x32xf32, #tpu.memory_space<vmem>>, vector<1x32xf32>
    %c0_154 = arith.constant 0 : index
    %c0_155 = arith.constant 0 : index
    %232 = vector.load %arg27[%c0_154, %c0_155] : memref<1x32xf32, #tpu.memory_space<vmem>>, vector<1x32xf32>
    %cst_156 = arith.constant dense<0.000000e+00> : vector<8xf32>
    %233 = vector.multi_reduction <add>, %230, %cst_156 [1] : vector<8x32xf32> to vector<8xf32>
    %234 = vector.shape_cast %233 : vector<8xf32> to vector<8x1xf32>
    %cst_157 = arith.constant 3.200000e+01 : f32
    %235 = vector.broadcast %cst_157 : f32 to vector<8x1xf32>
    %236 = arith.divf %234, %235 : vector<8x1xf32>
    %237 = vector.broadcast %236 : vector<8x1xf32> to vector<8x32xf32>
    %238 = arith.subf %230, %237 : vector<8x32xf32>
    %239 = arith.mulf %238, %238 : vector<8x32xf32>
    %cst_158 = arith.constant dense<0.000000e+00> : vector<8xf32>
    %240 = vector.multi_reduction <add>, %239, %cst_158 [1] : vector<8x32xf32> to vector<8xf32>
    %241 = vector.shape_cast %240 : vector<8xf32> to vector<8x1xf32>
    %cst_159 = arith.constant 3.200000e+01 : f32
    %242 = vector.broadcast %cst_159 : f32 to vector<8x1xf32>
    %243 = arith.divf %241, %242 : vector<8x1xf32>
    %244 = vector.broadcast %236 : vector<8x1xf32> to vector<8x32xf32>
    %245 = arith.subf %230, %244 : vector<8x32xf32>
    %cst_160 = arith.constant 9.99999974E-6 : f32
    %246 = vector.broadcast %cst_160 : f32 to vector<8x1xf32>
    %247 = arith.addf %243, %246 : vector<8x1xf32>
    %248 = math.rsqrt %247 : vector<8x1xf32>
    %249 = vector.broadcast %248 : vector<8x1xf32> to vector<8x32xf32>
    %250 = arith.mulf %245, %249 : vector<8x32xf32>
    %251 = vector.broadcast %231 : vector<1x32xf32> to vector<8x32xf32>
    %252 = arith.mulf %250, %251 : vector<8x32xf32>
    %253 = vector.broadcast %232 : vector<1x32xf32> to vector<8x32xf32>
    %254 = arith.addf %252, %253 : vector<8x32xf32>
    %c0_161 = arith.constant 0 : index
    %c0_162 = arith.constant 0 : index
    %255 = vector.load %arg28[%c0_161, %c0_162] : memref<32x64xf32, #tpu.memory_space<vmem>>, vector<32x64xf32>
    %cst_163 = arith.constant dense<0.000000e+00> : vector<8x64xf32>
    %256 = tpu.matmul %254, %255, %cst_163 {dimension_numbers = #tpu.dot_dimension_numbers<[1], [0], [0], [1], [0, 0, 1, 1], [], []>} : vector<8x32xf32>, vector<32x64xf32>, vector<8x64xf32> -> vector<8x64xf32>
    %c0_164 = arith.constant 0 : index
    %c0_165 = arith.constant 0 : index
    %257 = vector.load %arg29[%c0_164, %c0_165] : memref<1x64xf32, #tpu.memory_space<vmem>>, vector<1x64xf32>
    %258 = vector.broadcast %257 : vector<1x64xf32> to vector<8x64xf32>
    %259 = arith.addf %256, %258 : vector<8x64xf32>
    %260 = arith.mulf %259, %259 : vector<8x64xf32>
    %261 = arith.mulf %259, %260 : vector<8x64xf32>
    %cst_166 = arith.constant 4.471500e-02 : f32
    %262 = vector.broadcast %cst_166 : f32 to vector<8x64xf32>
    %263 = arith.mulf %262, %261 : vector<8x64xf32>
    %264 = arith.addf %259, %263 : vector<8x64xf32>
    %cst_167 = arith.constant 0.797884583 : f32
    %265 = vector.broadcast %cst_167 : f32 to vector<8x64xf32>
    %266 = arith.mulf %265, %264 : vector<8x64xf32>
    %267 = math.tanh %266 : vector<8x64xf32>
    %cst_168 = arith.constant 1.000000e+00 : f32
    %268 = vector.broadcast %cst_168 : f32 to vector<8x64xf32>
    %269 = arith.addf %268, %267 : vector<8x64xf32>
    %cst_169 = arith.constant 5.000000e-01 : f32
    %270 = vector.broadcast %cst_169 : f32 to vector<8x64xf32>
    %271 = arith.mulf %270, %269 : vector<8x64xf32>
    %272 = arith.mulf %259, %271 : vector<8x64xf32>
    %c0_170 = arith.constant 0 : index
    %c0_171 = arith.constant 0 : index
    %273 = vector.load %arg30[%c0_170, %c0_171] : memref<64x32xf32, #tpu.memory_space<vmem>>, vector<64x32xf32>
    %cst_172 = arith.constant dense<0.000000e+00> : vector<8x32xf32>
    %274 = tpu.matmul %272, %273, %cst_172 {dimension_numbers = #tpu.dot_dimension_numbers<[1], [0], [0], [1], [0, 0, 1, 1], [], []>} : vector<8x64xf32>, vector<64x32xf32>, vector<8x32xf32> -> vector<8x32xf32>
    %c0_173 = arith.constant 0 : index
    %c0_174 = arith.constant 0 : index
    %275 = vector.load %arg31[%c0_173, %c0_174] : memref<1x32xf32, #tpu.memory_space<vmem>>, vector<1x32xf32>
    %276 = vector.broadcast %275 : vector<1x32xf32> to vector<8x32xf32>
    %277 = arith.addf %274, %276 : vector<8x32xf32>
    %278 = arith.addf %230, %277 : vector<8x32xf32>
    %c0_175 = arith.constant 0 : index
    %c0_176 = arith.constant 0 : index
    %279 = vector.load %arg32[%c0_175, %c0_176] : memref<1x32xf32, #tpu.memory_space<vmem>>, vector<1x32xf32>
    %c0_177 = arith.constant 0 : index
    %c0_178 = arith.constant 0 : index
    %280 = vector.load %arg33[%c0_177, %c0_178] : memref<1x32xf32, #tpu.memory_space<vmem>>, vector<1x32xf32>
    %cst_179 = arith.constant dense<0.000000e+00> : vector<8xf32>
    %281 = vector.multi_reduction <add>, %278, %cst_179 [1] : vector<8x32xf32> to vector<8xf32>
    %282 = vector.shape_cast %281 : vector<8xf32> to vector<8x1xf32>
    %cst_180 = arith.constant 3.200000e+01 : f32
    %283 = vector.broadcast %cst_180 : f32 to vector<8x1xf32>
    %284 = arith.divf %282, %283 : vector<8x1xf32>
    %285 = vector.broadcast %284 : vector<8x1xf32> to vector<8x32xf32>
    %286 = arith.subf %278, %285 : vector<8x32xf32>
    %287 = arith.mulf %286, %286 : vector<8x32xf32>
    %cst_181 = arith.constant dense<0.000000e+00> : vector<8xf32>
    %288 = vector.multi_reduction <add>, %287, %cst_181 [1] : vector<8x32xf32> to vector<8xf32>
    %289 = vector.shape_cast %288 : vector<8xf32> to vector<8x1xf32>
    %cst_182 = arith.constant 3.200000e+01 : f32
    %290 = vector.broadcast %cst_182 : f32 to vector<8x1xf32>
    %291 = arith.divf %289, %290 : vector<8x1xf32>
    %292 = vector.broadcast %284 : vector<8x1xf32> to vector<8x32xf32>
    %293 = arith.subf %278, %292 : vector<8x32xf32>
    %cst_183 = arith.constant 9.99999974E-6 : f32
    %294 = vector.broadcast %cst_183 : f32 to vector<8x1xf32>
    %295 = arith.addf %291, %294 : vector<8x1xf32>
    %296 = math.rsqrt %295 : vector<8x1xf32>
    %297 = vector.broadcast %296 : vector<8x1xf32> to vector<8x32xf32>
    %298 = arith.mulf %293, %297 : vector<8x32xf32>
    %299 = vector.broadcast %279 : vector<1x32xf32> to vector<8x32xf32>
    %300 = arith.mulf %298, %299 : vector<8x32xf32>
    %301 = vector.broadcast %280 : vector<1x32xf32> to vector<8x32xf32>
    %302 = arith.addf %300, %301 : vector<8x32xf32>
    %c0_184 = arith.constant 0 : index
    %c0_185 = arith.constant 0 : index
    %303 = vector.load %arg34[%c0_184, %c0_185] : memref<32x64xf32, #tpu.memory_space<vmem>>, vector<32x64xf32>
    %cst_186 = arith.constant dense<0.000000e+00> : vector<8x64xf32>
    %304 = tpu.matmul %302, %303, %cst_186 {dimension_numbers = #tpu.dot_dimension_numbers<[1], [0], [0], [1], [0, 0, 1, 1], [], []>} : vector<8x32xf32>, vector<32x64xf32>, vector<8x64xf32> -> vector<8x64xf32>
    %c0_187 = arith.constant 0 : index
    %c0_188 = arith.constant 0 : index
    %305 = vector.load %arg35[%c0_187, %c0_188] : memref<1x64xf32, #tpu.memory_space<vmem>>, vector<1x64xf32>
    %306 = vector.broadcast %305 : vector<1x64xf32> to vector<8x64xf32>
    %307 = arith.addf %304, %306 : vector<8x64xf32>
    %c0_189 = arith.constant 0 : index
    %c0_190 = arith.constant 0 : index
    %c0_191 = arith.constant 0 : index
    %308 = vector.load %arg36[%c0_189, %c0_190, %c0_191] : memref<1x8x64xf32, #tpu.memory_space<vmem>>, vector<1x8x64xf32>
    %309 = vector.shape_cast %308 : vector<1x8x64xf32> to vector<8x64xf32>
    %310 = vector.shape_cast %307 : vector<8x64xf32> to vector<1x8x64xf32>
    tpu.vector_store %arg36[%c0_189, %c0_190, %c0_191], %310 {strides = array<i32>} : memref<1x8x64xf32, #tpu.memory_space<vmem>>, vector<1x8x64xf32>,
    %c0_192 = arith.constant 0 : index
    %c0_193 = arith.constant 0 : index
    %c0_194 = arith.constant 0 : index
    %311 = vector.load %arg2[%c0_192, %c0_193, %c0_194] : memref<1x8x1xi32, #tpu.memory_space<vmem>>, vector<1x8x1xi32>
    %312 = vector.shape_cast %311 : vector<1x8x1xi32> to vector<8x1xi32>
    %cst_195 = arith.constant dense<0xFF800000> : vector<8xf32>
    %313 = vector.multi_reduction <maximumf>, %307, %cst_195 [1] : vector<8x64xf32> to vector<8xf32>
    %314 = vector.shape_cast %313 : vector<8xf32> to vector<8x1xf32>
    %315 = vector.broadcast %314 : vector<8x1xf32> to vector<8x64xf32>
    %316 = arith.subf %307, %315 : vector<8x64xf32>
    %317 = math.exp %316 : vector<8x64xf32>
    %cst_196 = arith.constant dense<0.000000e+00> : vector<8xf32>
    %318 = vector.multi_reduction <add>, %317, %cst_196 [1] : vector<8x64xf32> to vector<8xf32>
    %319 = vector.shape_cast %318 : vector<8xf32> to vector<8x1xf32>
    %320 = math.log %319 : vector<8x1xf32>
    %321 = arith.addf %320, %314 : vector<8x1xf32>
    %322 = vector.broadcast %312 : vector<8x1xi32> to vector<8x64xi32>
    %323 = arith.cmpi eq, %2, %322 : vector<8x64xi32>
    %cst_197 = arith.constant -1.000000e+30 : f32
    %324 = vector.broadcast %cst_197 : f32 to vector<8x64xf32>
    %325 = arith.select %323, %307, %324 : vector<8x64xi1>, vector<8x64xf32>
    %cst_198 = arith.constant dense<0xFF800000> : vector<8xf32>
    %326 = vector.multi_reduction <maximumf>, %325, %cst_198 [1] : vector<8x64xf32> to vector<8xf32>
    %327 = vector.shape_cast %326 : vector<8xf32> to vector<8x1xf32>
    %c-100_i32 = arith.constant -100 : i32
    %328 = vector.broadcast %c-100_i32 : i32 to vector<8x1xi32>
    %329 = arith.cmpi ne, %312, %328 : vector<8x1xi32>
    %330 = arith.extui %329 : vector<8x1xi1> to vector<8x1xi32>
    %331 = arith.sitofp %330 : vector<8x1xi32> to vector<8x1xf32>
    %332 = arith.subf %321, %327 : vector<8x1xf32>
    %333 = arith.mulf %332, %331 : vector<8x1xf32>
    %cst_199 = arith.constant dense<0.000000e+00> : vector<1xf32>
    %334 = vector.multi_reduction <add>, %333, %cst_199 [0] : vector<8x1xf32> to vector<1xf32>
    %335 = vector.shape_cast %334 : vector<1xf32> to vector<1x1xf32>
    %c0_200 = arith.constant 0 : index
    %c0_201 = arith.constant 0 : index
    %c0_202 = arith.constant 0 : index
    %336 = vector.load %arg37[%c0_200, %c0_201, %c0_202] : memref<1x1x1xf32, #tpu.memory_space<vmem>>, vector<1x1x1xf32>
    %337 = vector.shape_cast %336 : vector<1x1x1xf32> to vector<1x1xf32>
    %338 = vector.shape_cast %335 : vector<1x1xf32> to vector<1x1x1xf32>
    tpu.vector_store %arg37[%c0_200, %c0_201, %c0_202], %338 {strides = array<i32>} : memref<1x1x1xf32, #tpu.memory_space<vmem>>, vector<1x1x1xf32>,
    %cst_203 = arith.constant dense<0.000000e+00> : vector<1xf32>
    %339 = vector.multi_reduction <add>, %331, %cst_203 [0] : vector<8x1xf32> to vector<1xf32>
    %340 = vector.shape_cast %339 : vector<1xf32> to vector<1x1xf32>
    %c0_204 = arith.constant 0 : index
    %c0_205 = arith.constant 0 : index
    %c0_206 = arith.constant 0 : index
    %341 = vector.load %arg38[%c0_204, %c0_205, %c0_206] : memref<1x1x1xf32, #tpu.memory_space<vmem>>, vector<1x1x1xf32>
    %342 = vector.shape_cast %341 : vector<1x1x1xf32> to vector<1x1xf32>
    %343 = vector.shape_cast %340 : vector<1x1xf32> to vector<1x1x1xf32>
    tpu.vector_store %arg38[%c0_204, %c0_205, %c0_206], %343 {strides = array<i32>} : memref<1x1x1xf32, #tpu.memory_space<vmem>>, vector<1x1x1xf32>,
    return
  }
  func.func @transform_0(%arg0: i32) -> (i32, i32, i32) {
    %c0_i32 = arith.constant 0 : i32
    %c0_i32_0 = arith.constant 0 : i32
    %c0_i32_1 = arith.constant 0 : i32
    return %arg0, %c0_i32, %c0_i32_0 : i32, i32, i32
  }
  func.func @transform_1(%arg0: i32) -> (i32, i32, i32) {
    %c0_i32 = arith.constant 0 : i32
    %c0_i32_0 = arith.constant 0 : i32
    %c0_i32_1 = arith.constant 0 : i32
    return %arg0, %c0_i32, %c0_i32_0 : i32, i32, i32
  }
  func.func @transform_2(%arg0: i32) -> (i32, i32, i32) {
    %c0_i32 = arith.constant 0 : i32
    %c0_i32_0 = arith.constant 0 : i32
    %c0_i32_1 = arith.constant 0 : i32
    return %arg0, %c0_i32, %c0_i32_0 : i32, i32, i32
  }
  func.func @transform_3(%arg0: i32) -> (i32, i32) {
    %c0_i32 = arith.constant 0 : i32
    %c0_i32_0 = arith.constant 0 : i32
    %c0_i32_1 = arith.constant 0 : i32
    return %c0_i32, %c0_i32_0 : i32, i32
  }
  func.func @transform_4(%arg0: i32) -> (i32, i32) {
    %c0_i32 = arith.constant 0 : i32
    %c0_i32_0 = arith.constant 0 : i32
    %c0_i32_1 = arith.constant 0 : i32
    return %c0_i32, %c0_i32_0 : i32, i32
  }
  func.func @transform_5(%arg0: i32) -> (i32, i32) {
    %c0_i32 = arith.constant 0 : i32
    %c0_i32_0 = arith.constant 0 : i32
    %c0_i32_1 = arith.constant 0 : i32
    return %c0_i32, %c0_i32_0 : i32, i32
  }
  func.func @transform_6(%arg0: i32) -> (i32, i32) {
    %c0_i32 = arith.constant 0 : i32
    %c0_i32_0 = arith.constant 0 : i32
    %c0_i32_1 = arith.constant 0 : i32
    return %c0_i32, %c0_i32_0 : i32, i32
  }
  func.func @transform_7(%arg0: i32) -> (i32, i32, i32) {
    %c0_i32 = arith.constant 0 : i32
    %c0_i32_0 = arith.constant 0 : i32
    %c0_i32_1 = arith.constant 0 : i32
    %c0_i32_2 = arith.constant 0 : i32
    return %c0_i32, %c0_i32_0, %c0_i32_1 : i32, i32, i32
  }
  func.func @transform_8(%arg0: i32) -> (i32, i32, i32) {
    %c0_i32 = arith.constant 0 : i32
    %c0_i32_0 = arith.constant 0 : i32
    %c0_i32_1 = arith.constant 0 : i32
    %c0_i32_2 = arith.constant 0 : i32
    return %c0_i32, %c0_i32_0, %c0_i32_1 : i32, i32, i32
  }
  func.func @transform_9(%arg0: i32) -> (i32, i32, i32) {
    %c0_i32 = arith.constant 0 : i32
    %c0_i32_0 = arith.constant 0 : i32
    %c0_i32_1 = arith.constant 0 : i32
    %c0_i32_2 = arith.constant 0 : i32
    return %c0_i32, %c0_i32_0, %c0_i32_1 : i32, i32, i32
  }
  func.func @transform_10(%arg0: i32) -> (i32, i32, i32) {
    %c0_i32 = arith.constant 0 : i32
    %c0_i32_0 = arith.constant 0 : i32
    %c0_i32_1 = arith.constant 0 : i32
    %c0_i32_2 = arith.constant 0 : i32
    return %c0_i32, %c0_i32_0, %c0_i32_1 : i32, i32, i32
  }
  func.func @transform_11(%arg0: i32) -> (i32, i32, i32) {
    %c0_i32 = arith.constant 0 : i32
    %c0_i32_0 = arith.constant 0 : i32
    %c0_i32_1 = arith.constant 0 : i32
    %c0_i32_2 = arith.constant 0 : i32
    return %c0_i32, %c0_i32_0, %c0_i32_1 : i32, i32, i32
  }
  func.func @transform_12(%arg0: i32) -> (i32, i32, i32) {
    %c0_i32 = arith.constant 0 : i32
    %c0_i32_0 = arith.constant 0 : i32
    %c0_i32_1 = arith.constant 0 : i32
    %c0_i32_2 = arith.constant 0 : i32
    return %c0_i32, %c0_i32_0, %c0_i32_1 : i32, i32, i32
  }
  func.func @transform_13(%arg0: i32) -> (i32, i32, i32) {
    %c0_i32 = arith.constant 0 : i32
    %c0_i32_0 = arith.constant 0 : i32
    %c0_i32_1 = arith.constant 0 : i32
    %c0_i32_2 = arith.constant 0 : i32
    return %c0_i32, %c0_i32_0, %c0_i32_1 : i32, i32, i32
  }
  func.func @transform_14(%arg0: i32) -> (i32, i32) {
    %c0_i32 = arith.constant 0 : i32
    %c0_i32_0 = arith.constant 0 : i32
    %c0_i32_1 = arith.constant 0 : i32
    return %c0_i32, %c0_i32_0 : i32, i32
  }
  func.func @transform_15(%arg0: i32) -> (i32, i32) {
    %c0_i32 = arith.constant 0 : i32
    %c0_i32_0 = arith.constant 0 : i32
    %c0_i32_1 = arith.constant 0 : i32
    return %c0_i32, %c0_i32_0 : i32, i32
  }
  func.func @transform_16(%arg0: i32) -> (i32, i32) {
    %c0_i32 = arith.constant 0 : i32
    %c0_i32_0 = arith.constant 0 : i32
    %c0_i32_1 = arith.constant 0 : i32
    return %c0_i32, %c0_i32_0 : i32, i32
  }
  func.func @transform_17(%arg0: i32) -> (i32, i32, i32) {
    %c0_i32 = arith.constant 0 : i32
    %c0_i32_0 = arith.constant 0 : i32
    %c0_i32_1 = arith.constant 0 : i32
    %c0_i32_2 = arith.constant 0 : i32
    return %c0_i32, %c0_i32_0, %c0_i32_1 : i32, i32, i32
  }
  func.func @transform_18(%arg0: i32) -> (i32, i32, i32) {
    %c0_i32 = arith.constant 0 : i32
    %c0_i32_0 = arith.constant 0 : i32
    %c0_i32_1 = arith.constant 0 : i32
    %c0_i32_2 = arith.constant 0 : i32
    return %c0_i32, %c0_i32_0, %c0_i32_1 : i32, i32, i32
  }
  func.func @transform_19(%arg0: i32) -> (i32, i32, i32) {
    %c0_i32 = arith.constant 0 : i32
    %c0_i32_0 = arith.constant 0 : i32
    %c0_i32_1 = arith.constant 0 : i32
    %c0_i32_2 = arith.constant 0 : i32
    return %c0_i32, %c0_i32_0, %c0_i32_1 : i32, i32, i32
  }
  func.func @transform_20(%arg0: i32) -> (i32, i32, i32) {
    %c0_i32 = arith.constant 0 : i32
    %c0_i32_0 = arith.constant 0 : i32
    %c0_i32_1 = arith.constant 0 : i32
    %c0_i32_2 = arith.constant 0 : i32
    return %c0_i32, %c0_i32_0, %c0_i32_1 : i32, i32, i32
  }
  func.func @transform_21(%arg0: i32) -> (i32, i32, i32) {
    %c0_i32 = arith.constant 0 : i32
    %c0_i32_0 = arith.constant 0 : i32
    %c0_i32_1 = arith.constant 0 : i32
    %c0_i32_2 = arith.constant 0 : i32
    return %c0_i32, %c0_i32_0, %c0_i32_1 : i32, i32, i32
  }
  func.func @transform_22(%arg0: i32) -> (i32, i32, i32) {
    %c0_i32 = arith.constant 0 : i32
    %c0_i32_0 = arith.constant 0 : i32
    %c0_i32_1 = arith.constant 0 : i32
    %c0_i32_2 = arith.constant 0 : i32
    return %c0_i32, %c0_i32_0, %c0_i32_1 : i32, i32, i32
  }
  func.func @transform_23(%arg0: i32) -> (i32, i32, i32) {
    %c0_i32 = arith.constant 0 : i32
    %c0_i32_0 = arith.constant 0 : i32
    %c0_i32_1 = arith.constant 0 : i32
    %c0_i32_2 = arith.constant 0 : i32
    return %c0_i32, %c0_i32_0, %c0_i32_1 : i32, i32, i32
  }
  func.func @transform_24(%arg0: i32) -> (i32, i32) {
    %c0_i32 = arith.constant 0 : i32
    %c0_i32_0 = arith.constant 0 : i32
    %c0_i32_1 = arith.constant 0 : i32
    return %c0_i32, %c0_i32_0 : i32, i32
  }
  func.func @transform_25(%arg0: i32) -> (i32, i32) {
    %c0_i32 = arith.constant 0 : i32
    %c0_i32_0 = arith.constant 0 : i32
    %c0_i32_1 = arith.constant 0 : i32
    return %c0_i32, %c0_i32_0 : i32, i32
  }
  func.func @transform_26(%arg0: i32) -> (i32, i32) {
    %c0_i32 = arith.constant 0 : i32
    %c0_i32_0 = arith.constant 0 : i32
    %c0_i32_1 = arith.constant 0 : i32
    return %c0_i32, %c0_i32_0 : i32, i32
  }
  func.func @transform_27(%arg0: i32) -> (i32, i32) {
    %c0_i32 = arith.constant 0 : i32
    %c0_i32_0 = arith.constant 0 : i32
    %c0_i32_1 = arith.constant 0 : i32
    return %c0_i32, %c0_i32_0 : i32, i32
  }
  func.func @transform_28(%arg0: i32) -> (i32, i32) {
    %c0_i32 = arith.constant 0 : i32
    %c0_i32_0 = arith.constant 0 : i32
    %c0_i32_1 = arith.constant 0 : i32
    return %c0_i32, %c0_i32_0 : i32, i32
  }
  func.func @transform_29(%arg0: i32) -> (i32, i32) {
    %c0_i32 = arith.constant 0 : i32
    %c0_i32_0 = arith.constant 0 : i32
    %c0_i32_1 = arith.constant 0 : i32
    return %c0_i32, %c0_i32_0 : i32, i32
  }
  func.func @transform_30(%arg0: i32) -> (i32, i32) {
    %c0_i32 = arith.constant 0 : i32
    %c0_i32_0 = arith.constant 0 : i32
    %c0_i32_1 = arith.constant 0 : i32
    return %c0_i32, %c0_i32_0 : i32, i32
  }
  func.func @transform_31(%arg0: i32) -> (i32, i32) {
    %c0_i32 = arith.constant 0 : i32
    %c0_i32_0 = arith.constant 0 : i32
    %c0_i32_1 = arith.constant 0 : i32
    return %c0_i32, %c0_i32_0 : i32, i32
  }
  func.func @transform_32(%arg0: i32) -> (i32, i32) {
    %c0_i32 = arith.constant 0 : i32
    %c0_i32_0 = arith.constant 0 : i32
    %c0_i32_1 = arith.constant 0 : i32
    return %c0_i32, %c0_i32_0 : i32, i32
  }
  func.func @transform_33(%arg0: i32) -> (i32, i32) {
    %c0_i32 = arith.constant 0 : i32
    %c0_i32_0 = arith.constant 0 : i32
    %c0_i32_1 = arith.constant 0 : i32
    return %c0_i32, %c0_i32_0 : i32, i32
  }
  func.func @transform_34(%arg0: i32) -> (i32, i32) {
    %c0_i32 = arith.constant 0 : i32
    %c0_i32_0 = arith.constant 0 : i32
    %c0_i32_1 = arith.constant 0 : i32
    return %c0_i32, %c0_i32_0 : i32, i32
  }
  func.func @transform_35(%arg0: i32) -> (i32, i32, i32) {
    %c0_i32 = arith.constant 0 : i32
    %c0_i32_0 = arith.constant 0 : i32
    %c0_i32_1 = arith.constant 0 : i32
    return %arg0, %c0_i32, %c0_i32_0 : i32, i32, i32
  }
  func.func @transform_36(%arg0: i32) -> (i32, i32, i32) {
    %c0_i32 = arith.constant 0 : i32
    %c0_i32_0 = arith.constant 0 : i32
    %c0_i32_1 = arith.constant 0 : i32
    return %arg0, %c0_i32, %c0_i32_0 : i32, i32, i32
  }
  func.func @transform_37(%arg0: i32) -> (i32, i32, i32) {
    %c0_i32 = arith.constant 0 : i32
    %c0_i32_0 = arith.constant 0 : i32
    %c0_i32_1 = arith.constant 0 : i32
    return %arg0, %c0_i32, %c0_i32_0 : i32, i32, i32
  }
}

module attributes {stable_mosaic.version = 11 : i64} {
  func.func @_vision_encoder_kernel(%arg0: i32, %arg1: memref<1x16x48xf32, #tpu.memory_space<vmem>>, %arg2: memref<48x32xf32, #tpu.memory_space<vmem>>, %arg3: memref<1x32xf32, #tpu.memory_space<vmem>>, %arg4: memref<16x32xf32, #tpu.memory_space<vmem>>, %arg5: memref<1x32xf32, #tpu.memory_space<vmem>>, %arg6: memref<1x32xf32, #tpu.memory_space<vmem>>, %arg7: memref<2x32x16xf32, #tpu.memory_space<vmem>>, %arg8: memref<2x1x16xf32, #tpu.memory_space<vmem>>, %arg9: memref<2x32x16xf32, #tpu.memory_space<vmem>>, %arg10: memref<2x1x16xf32, #tpu.memory_space<vmem>>, %arg11: memref<2x32x16xf32, #tpu.memory_space<vmem>>, %arg12: memref<2x1x16xf32, #tpu.memory_space<vmem>>, %arg13: memref<2x16x32xf32, #tpu.memory_space<vmem>>, %arg14: memref<1x32xf32, #tpu.memory_space<vmem>>, %arg15: memref<1x32xf32, #tpu.memory_space<vmem>>, %arg16: memref<1x32xf32, #tpu.memory_space<vmem>>, %arg17: memref<32x64xf32, #tpu.memory_space<vmem>>, %arg18: memref<1x64xf32, #tpu.memory_space<vmem>>, %arg19: memref<64x32xf32, #tpu.memory_space<vmem>>, %arg20: memref<1x32xf32, #tpu.memory_space<vmem>>, %arg21: memref<1x32xf32, #tpu.memory_space<vmem>>, %arg22: memref<1x32xf32, #tpu.memory_space<vmem>>, %arg23: memref<1x16x32xf32, #tpu.memory_space<vmem>>) attributes {dimension_semantics = [#tpu.dimension_semantics<parallel>], iteration_bounds = array<i64: 2>, scalar_prefetch = 0 : i64, scratch_operands = 0 : i64, tpu.core_type = #tpu.core_type<tc>, window_params = [{transform_indices = @transform_0, window_bounds = array<i64: 1, 16, 48>}, {pipeline_mode = #tpu.pipeline_mode<synchronous>, transform_indices = @transform_1, window_bounds = array<i64: 48, 32>}, {pipeline_mode = #tpu.pipeline_mode<synchronous>, transform_indices = @transform_2, window_bounds = array<i64: 1, 32>}, {pipeline_mode = #tpu.pipeline_mode<synchronous>, transform_indices = @transform_3, window_bounds = array<i64: 16, 32>}, {pipeline_mode = #tpu.pipeline_mode<synchronous>, transform_indices = @transform_4, window_bounds = array<i64: 1, 32>}, {pipeline_mode = #tpu.pipeline_mode<synchronous>, transform_indices = @transform_5, window_bounds = array<i64: 1, 32>}, {pipeline_mode = #tpu.pipeline_mode<synchronous>, transform_indices = @transform_6, window_bounds = array<i64: 2, 32, 16>}, {pipeline_mode = #tpu.pipeline_mode<synchronous>, transform_indices = @transform_7, window_bounds = array<i64: 2, 1, 16>}, {pipeline_mode = #tpu.pipeline_mode<synchronous>, transform_indices = @transform_8, window_bounds = array<i64: 2, 32, 16>}, {pipeline_mode = #tpu.pipeline_mode<synchronous>, transform_indices = @transform_9, window_bounds = array<i64: 2, 1, 16>}, {pipeline_mode = #tpu.pipeline_mode<synchronous>, transform_indices = @transform_10, window_bounds = array<i64: 2, 32, 16>}, {pipeline_mode = #tpu.pipeline_mode<synchronous>, transform_indices = @transform_11, window_bounds = array<i64: 2, 1, 16>}, {pipeline_mode = #tpu.pipeline_mode<synchronous>, transform_indices = @transform_12, window_bounds = array<i64: 2, 16, 32>}, {pipeline_mode = #tpu.pipeline_mode<synchronous>, transform_indices = @transform_13, window_bounds = array<i64: 1, 32>}, {pipeline_mode = #tpu.pipeline_mode<synchronous>, transform_indices = @transform_14, window_bounds = array<i64: 1, 32>}, {pipeline_mode = #tpu.pipeline_mode<synchronous>, transform_indices = @transform_15, window_bounds = array<i64: 1, 32>}, {pipeline_mode = #tpu.pipeline_mode<synchronous>, transform_indices = @transform_16, window_bounds = array<i64: 32, 64>}, {pipeline_mode = #tpu.pipeline_mode<synchronous>, transform_indices = @transform_17, window_bounds = array<i64: 1, 64>}, {pipeline_mode = #tpu.pipeline_mode<synchronous>, transform_indices = @transform_18, window_bounds = array<i64: 64, 32>}, {pipeline_mode = #tpu.pipeline_mode<synchronous>, transform_indices = @transform_19, window_bounds = array<i64: 1, 32>}, {pipeline_mode = #tpu.pipeline_mode<synchronous>, transform_indices = @transform_20, window_bounds = array<i64: 1, 32>}, {pipeline_mode = #tpu.pipeline_mode<synchronous>, transform_indices = @transform_21, window_bounds = array<i64: 1, 32>}, {transform_indices = @transform_22, window_bounds = array<i64: 1, 16, 32>}]} {
    %c0 = arith.constant 0 : index
    %c0_0 = arith.constant 0 : index
    %c0_1 = arith.constant 0 : index
    %0 = vector.load %arg1[%c0, %c0_0, %c0_1] : memref<1x16x48xf32, #tpu.memory_space<vmem>>, vector<1x16x48xf32>
    %1 = vector.shape_cast %0 : vector<1x16x48xf32> to vector<16x48xf32>
    %c0_2 = arith.constant 0 : index
    %c0_3 = arith.constant 0 : index
    %2 = vector.load %arg2[%c0_2, %c0_3] : memref<48x32xf32, #tpu.memory_space<vmem>>, vector<48x32xf32>
    %cst = arith.constant dense<0.000000e+00> : vector<16x32xf32>
    %3 = tpu.matmul %1, %2, %cst {dimension_numbers = #tpu.dot_dimension_numbers<[1], [0], [0], [1], [0, 0, 1, 1], [], []>} : vector<16x48xf32>, vector<48x32xf32>, vector<16x32xf32> -> vector<16x32xf32>
    %c0_4 = arith.constant 0 : index
    %c0_5 = arith.constant 0 : index
    %4 = vector.load %arg3[%c0_4, %c0_5] : memref<1x32xf32, #tpu.memory_space<vmem>>, vector<1x32xf32>
    %5 = vector.broadcast %4 : vector<1x32xf32> to vector<16x32xf32>
    %6 = arith.addf %3, %5 : vector<16x32xf32>
    %c0_6 = arith.constant 0 : index
    %c0_7 = arith.constant 0 : index
    %7 = vector.load %arg4[%c0_6, %c0_7] : memref<16x32xf32, #tpu.memory_space<vmem>>, vector<16x32xf32>
    %8 = arith.addf %6, %7 : vector<16x32xf32>
    %c0_8 = arith.constant 0 : index
    %c0_9 = arith.constant 0 : index
    %9 = vector.load %arg5[%c0_8, %c0_9] : memref<1x32xf32, #tpu.memory_space<vmem>>, vector<1x32xf32>
    %c0_10 = arith.constant 0 : index
    %c0_11 = arith.constant 0 : index
    %10 = vector.load %arg6[%c0_10, %c0_11] : memref<1x32xf32, #tpu.memory_space<vmem>>, vector<1x32xf32>
    %cst_12 = arith.constant dense<0.000000e+00> : vector<16xf32>
    %11 = vector.multi_reduction <add>, %8, %cst_12 [1] : vector<16x32xf32> to vector<16xf32>
    %12 = vector.shape_cast %11 : vector<16xf32> to vector<16x1xf32>
    %cst_13 = arith.constant 3.200000e+01 : f32
    %13 = vector.broadcast %cst_13 : f32 to vector<16x1xf32>
    %14 = arith.divf %12, %13 : vector<16x1xf32>
    %15 = vector.broadcast %14 : vector<16x1xf32> to vector<16x32xf32>
    %16 = arith.subf %8, %15 : vector<16x32xf32>
    %17 = arith.mulf %16, %16 : vector<16x32xf32>
    %cst_14 = arith.constant dense<0.000000e+00> : vector<16xf32>
    %18 = vector.multi_reduction <add>, %17, %cst_14 [1] : vector<16x32xf32> to vector<16xf32>
    %19 = vector.shape_cast %18 : vector<16xf32> to vector<16x1xf32>
    %cst_15 = arith.constant 3.200000e+01 : f32
    %20 = vector.broadcast %cst_15 : f32 to vector<16x1xf32>
    %21 = arith.divf %19, %20 : vector<16x1xf32>
    %22 = vector.broadcast %14 : vector<16x1xf32> to vector<16x32xf32>
    %23 = arith.subf %8, %22 : vector<16x32xf32>
    %cst_16 = arith.constant 9.99999974E-6 : f32
    %24 = vector.broadcast %cst_16 : f32 to vector<16x1xf32>
    %25 = arith.addf %21, %24 : vector<16x1xf32>
    %26 = math.rsqrt %25 : vector<16x1xf32>
    %27 = vector.broadcast %26 : vector<16x1xf32> to vector<16x32xf32>
    %28 = arith.mulf %23, %27 : vector<16x32xf32>
    %29 = vector.broadcast %9 : vector<1x32xf32> to vector<16x32xf32>
    %30 = arith.mulf %28, %29 : vector<16x32xf32>
    %31 = vector.broadcast %10 : vector<1x32xf32> to vector<16x32xf32>
    %32 = arith.addf %30, %31 : vector<16x32xf32>
    %c0_17 = arith.constant 0 : index
    %c0_18 = arith.constant 0 : index
    %c0_19 = arith.constant 0 : index
    %33 = vector.load %arg7[%c0_17, %c0_18, %c0_19] : memref<2x32x16xf32, #tpu.memory_space<vmem>>, vector<1x32x16xf32>
    %34 = vector.shape_cast %33 : vector<1x32x16xf32> to vector<32x16xf32>
    %cst_20 = arith.constant dense<0.000000e+00> : vector<16x16xf32>
    %35 = tpu.matmul %32, %34, %cst_20 {dimension_numbers = #tpu.dot_dimension_numbers<[1], [0], [0], [1], [0, 0, 1, 1], [], []>} : vector<16x32xf32>, vector<32x16xf32>, vector<16x16xf32> -> vector<16x16xf32>
    %c0_21 = arith.constant 0 : index
    %c0_22 = arith.constant 0 : index
    %c0_23 = arith.constant 0 : index
    %36 = vector.load %arg8[%c0_21, %c0_22, %c0_23] : memref<2x1x16xf32, #tpu.memory_space<vmem>>, vector<1x1x16xf32>
    %37 = vector.shape_cast %36 : vector<1x1x16xf32> to vector<1x16xf32>
    %38 = vector.broadcast %37 : vector<1x16xf32> to vector<16x16xf32>
    %39 = arith.addf %35, %38 : vector<16x16xf32>
    %c0_24 = arith.constant 0 : index
    %c0_25 = arith.constant 0 : index
    %c0_26 = arith.constant 0 : index
    %40 = vector.load %arg9[%c0_24, %c0_25, %c0_26] : memref<2x32x16xf32, #tpu.memory_space<vmem>>, vector<1x32x16xf32>
    %41 = vector.shape_cast %40 : vector<1x32x16xf32> to vector<32x16xf32>
    %cst_27 = arith.constant dense<0.000000e+00> : vector<16x16xf32>
    %42 = tpu.matmul %32, %41, %cst_27 {dimension_numbers = #tpu.dot_dimension_numbers<[1], [0], [0], [1], [0, 0, 1, 1], [], []>} : vector<16x32xf32>, vector<32x16xf32>, vector<16x16xf32> -> vector<16x16xf32>
    %c0_28 = arith.constant 0 : index
    %c0_29 = arith.constant 0 : index
    %c0_30 = arith.constant 0 : index
    %43 = vector.load %arg10[%c0_28, %c0_29, %c0_30] : memref<2x1x16xf32, #tpu.memory_space<vmem>>, vector<1x1x16xf32>
    %44 = vector.shape_cast %43 : vector<1x1x16xf32> to vector<1x16xf32>
    %45 = vector.broadcast %44 : vector<1x16xf32> to vector<16x16xf32>
    %46 = arith.addf %42, %45 : vector<16x16xf32>
    %c0_31 = arith.constant 0 : index
    %c0_32 = arith.constant 0 : index
    %c0_33 = arith.constant 0 : index
    %47 = vector.load %arg11[%c0_31, %c0_32, %c0_33] : memref<2x32x16xf32, #tpu.memory_space<vmem>>, vector<1x32x16xf32>
    %48 = vector.shape_cast %47 : vector<1x32x16xf32> to vector<32x16xf32>
    %cst_34 = arith.constant dense<0.000000e+00> : vector<16x16xf32>
    %49 = tpu.matmul %32, %48, %cst_34 {dimension_numbers = #tpu.dot_dimension_numbers<[1], [0], [0], [1], [0, 0, 1, 1], [], []>} : vector<16x32xf32>, vector<32x16xf32>, vector<16x16xf32> -> vector<16x16xf32>
    %c0_35 = arith.constant 0 : index
    %c0_36 = arith.constant 0 : index
    %c0_37 = arith.constant 0 : index
    %50 = vector.load %arg12[%c0_35, %c0_36, %c0_37] : memref<2x1x16xf32, #tpu.memory_space<vmem>>, vector<1x1x16xf32>
    %51 = vector.shape_cast %50 : vector<1x1x16xf32> to vector<1x16xf32>
    %52 = vector.broadcast %51 : vector<1x16xf32> to vector<16x16xf32>
    %53 = arith.addf %49, %52 : vector<16x16xf32>
    %cst_38 = arith.constant dense<0.000000e+00> : vector<16x16xf32>
    %54 = tpu.matmul %39, %46, %cst_38 {dimension_numbers = #tpu.dot_dimension_numbers<[1], [1], [0], [0], [0, 0, 1, 0], [], []>} : vector<16x16xf32>, vector<16x16xf32>, vector<16x16xf32> -> vector<16x16xf32>
    %cst_39 = arith.constant 2.500000e-01 : f32
    %55 = vector.broadcast %cst_39 : f32 to vector<16x16xf32>
    %56 = arith.mulf %54, %55 : vector<16x16xf32>
    %cst_40 = arith.constant dense<0xFF800000> : vector<16xf32>
    %57 = vector.multi_reduction <maximumf>, %56, %cst_40 [1] : vector<16x16xf32> to vector<16xf32>
    %58 = vector.shape_cast %57 : vector<16xf32> to vector<16x1xf32>
    %59 = vector.broadcast %58 : vector<16x1xf32> to vector<16x16xf32>
    %60 = arith.subf %56, %59 : vector<16x16xf32>
    %61 = math.exp %60 : vector<16x16xf32>
    %cst_41 = arith.constant dense<0.000000e+00> : vector<16xf32>
    %62 = vector.multi_reduction <add>, %61, %cst_41 [1] : vector<16x16xf32> to vector<16xf32>
    %63 = vector.shape_cast %62 : vector<16xf32> to vector<16x1xf32>
    %64 = tpu.reciprocal %63 {approx = true} : vector<16x1xf32> -> vector<16x1xf32>
    %65 = vector.broadcast %64 : vector<16x1xf32> to vector<16x16xf32>
    %66 = arith.mulf %61, %65 : vector<16x16xf32>
    %cst_42 = arith.constant dense<0.000000e+00> : vector<16x16xf32>
    %67 = tpu.matmul %66, %53, %cst_42 {dimension_numbers = #tpu.dot_dimension_numbers<[1], [0], [0], [1], [0, 0, 1, 1], [], []>} : vector<16x16xf32>, vector<16x16xf32>, vector<16x16xf32> -> vector<16x16xf32>
    %c0_43 = arith.constant 0 : index
    %c0_44 = arith.constant 0 : index
    %c0_45 = arith.constant 0 : index
    %68 = vector.load %arg13[%c0_43, %c0_44, %c0_45] : memref<2x16x32xf32, #tpu.memory_space<vmem>>, vector<1x16x32xf32>
    %69 = vector.shape_cast %68 : vector<1x16x32xf32> to vector<16x32xf32>
    %cst_46 = arith.constant dense<0.000000e+00> : vector<16x32xf32>
    %70 = tpu.matmul %67, %69, %cst_46 {dimension_numbers = #tpu.dot_dimension_numbers<[1], [0], [0], [1], [0, 0, 1, 1], [], []>} : vector<16x16xf32>, vector<16x32xf32>, vector<16x32xf32> -> vector<16x32xf32>
    %c1 = arith.constant 1 : index
    %c0_47 = arith.constant 0 : index
    %c0_48 = arith.constant 0 : index
    %71 = vector.load %arg7[%c1, %c0_47, %c0_48] : memref<2x32x16xf32, #tpu.memory_space<vmem>>, vector<1x32x16xf32>
    %72 = vector.shape_cast %71 : vector<1x32x16xf32> to vector<32x16xf32>
    %cst_49 = arith.constant dense<0.000000e+00> : vector<16x16xf32>
    %73 = tpu.matmul %32, %72, %cst_49 {dimension_numbers = #tpu.dot_dimension_numbers<[1], [0], [0], [1], [0, 0, 1, 1], [], []>} : vector<16x32xf32>, vector<32x16xf32>, vector<16x16xf32> -> vector<16x16xf32>
    %c1_50 = arith.constant 1 : index
    %c0_51 = arith.constant 0 : index
    %c0_52 = arith.constant 0 : index
    %74 = vector.load %arg8[%c1_50, %c0_51, %c0_52] : memref<2x1x16xf32, #tpu.memory_space<vmem>>, vector<1x1x16xf32>
    %75 = vector.shape_cast %74 : vector<1x1x16xf32> to vector<1x16xf32>
    %76 = vector.broadcast %75 : vector<1x16xf32> to vector<16x16xf32>
    %77 = arith.addf %73, %76 : vector<16x16xf32>
    %c1_53 = arith.constant 1 : index
    %c0_54 = arith.constant 0 : index
    %c0_55 = arith.constant 0 : index
    %78 = vector.load %arg9[%c1_53, %c0_54, %c0_55] : memref<2x32x16xf32, #tpu.memory_space<vmem>>, vector<1x32x16xf32>
    %79 = vector.shape_cast %78 : vector<1x32x16xf32> to vector<32x16xf32>
    %cst_56 = arith.constant dense<0.000000e+00> : vector<16x16xf32>
    %80 = tpu.matmul %32, %79, %cst_56 {dimension_numbers = #tpu.dot_dimension_numbers<[1], [0], [0], [1], [0, 0, 1, 1], [], []>} : vector<16x32xf32>, vector<32x16xf32>, vector<16x16xf32> -> vector<16x16xf32>
    %c1_57 = arith.constant 1 : index
    %c0_58 = arith.constant 0 : index
    %c0_59 = arith.constant 0 : index
    %81 = vector.load %arg10[%c1_57, %c0_58, %c0_59] : memref<2x1x16xf32, #tpu.memory_space<vmem>>, vector<1x1x16xf32>
    %82 = vector.shape_cast %81 : vector<1x1x16xf32> to vector<1x16xf32>
    %83 = vector.broadcast %82 : vector<1x16xf32> to vector<16x16xf32>
    %84 = arith.addf %80, %83 : vector<16x16xf32>
    %c1_60 = arith.constant 1 : index
    %c0_61 = arith.constant 0 : index
    %c0_62 = arith.constant 0 : index
    %85 = vector.load %arg11[%c1_60, %c0_61, %c0_62] : memref<2x32x16xf32, #tpu.memory_space<vmem>>, vector<1x32x16xf32>
    %86 = vector.shape_cast %85 : vector<1x32x16xf32> to vector<32x16xf32>
    %cst_63 = arith.constant dense<0.000000e+00> : vector<16x16xf32>
    %87 = tpu.matmul %32, %86, %cst_63 {dimension_numbers = #tpu.dot_dimension_numbers<[1], [0], [0], [1], [0, 0, 1, 1], [], []>} : vector<16x32xf32>, vector<32x16xf32>, vector<16x16xf32> -> vector<16x16xf32>
    %c1_64 = arith.constant 1 : index
    %c0_65 = arith.constant 0 : index
    %c0_66 = arith.constant 0 : index
    %88 = vector.load %arg12[%c1_64, %c0_65, %c0_66] : memref<2x1x16xf32, #tpu.memory_space<vmem>>, vector<1x1x16xf32>
    %89 = vector.shape_cast %88 : vector<1x1x16xf32> to vector<1x16xf32>
    %90 = vector.broadcast %89 : vector<1x16xf32> to vector<16x16xf32>
    %91 = arith.addf %87, %90 : vector<16x16xf32>
    %cst_67 = arith.constant dense<0.000000e+00> : vector<16x16xf32>
    %92 = tpu.matmul %77, %84, %cst_67 {dimension_numbers = #tpu.dot_dimension_numbers<[1], [1], [0], [0], [0, 0, 1, 0], [], []>} : vector<16x16xf32>, vector<16x16xf32>, vector<16x16xf32> -> vector<16x16xf32>
    %cst_68 = arith.constant 2.500000e-01 : f32
    %93 = vector.broadcast %cst_68 : f32 to vector<16x16xf32>
    %94 = arith.mulf %92, %93 : vector<16x16xf32>
    %cst_69 = arith.constant dense<0xFF800000> : vector<16xf32>
    %95 = vector.multi_reduction <maximumf>, %94, %cst_69 [1] : vector<16x16xf32> to vector<16xf32>
    %96 = vector.shape_cast %95 : vector<16xf32> to vector<16x1xf32>
    %97 = vector.broadcast %96 : vector<16x1xf32> to vector<16x16xf32>
    %98 = arith.subf %94, %97 : vector<16x16xf32>
    %99 = math.exp %98 : vector<16x16xf32>
    %cst_70 = arith.constant dense<0.000000e+00> : vector<16xf32>
    %100 = vector.multi_reduction <add>, %99, %cst_70 [1] : vector<16x16xf32> to vector<16xf32>
    %101 = vector.shape_cast %100 : vector<16xf32> to vector<16x1xf32>
    %102 = tpu.reciprocal %101 {approx = true} : vector<16x1xf32> -> vector<16x1xf32>
    %103 = vector.broadcast %102 : vector<16x1xf32> to vector<16x16xf32>
    %104 = arith.mulf %99, %103 : vector<16x16xf32>
    %cst_71 = arith.constant dense<0.000000e+00> : vector<16x16xf32>
    %105 = tpu.matmul %104, %91, %cst_71 {dimension_numbers = #tpu.dot_dimension_numbers<[1], [0], [0], [1], [0, 0, 1, 1], [], []>} : vector<16x16xf32>, vector<16x16xf32>, vector<16x16xf32> -> vector<16x16xf32>
    %c1_72 = arith.constant 1 : index
    %c0_73 = arith.constant 0 : index
    %c0_74 = arith.constant 0 : index
    %106 = vector.load %arg13[%c1_72, %c0_73, %c0_74] : memref<2x16x32xf32, #tpu.memory_space<vmem>>, vector<1x16x32xf32>
    %107 = vector.shape_cast %106 : vector<1x16x32xf32> to vector<16x32xf32>
    %cst_75 = arith.constant dense<0.000000e+00> : vector<16x32xf32>
    %108 = tpu.matmul %105, %107, %cst_75 {dimension_numbers = #tpu.dot_dimension_numbers<[1], [0], [0], [1], [0, 0, 1, 1], [], []>} : vector<16x16xf32>, vector<16x32xf32>, vector<16x32xf32> -> vector<16x32xf32>
    %109 = arith.addf %70, %108 : vector<16x32xf32>
    %c0_76 = arith.constant 0 : index
    %c0_77 = arith.constant 0 : index
    %110 = vector.load %arg14[%c0_76, %c0_77] : memref<1x32xf32, #tpu.memory_space<vmem>>, vector<1x32xf32>
    %111 = vector.broadcast %110 : vector<1x32xf32> to vector<16x32xf32>
    %112 = arith.addf %109, %111 : vector<16x32xf32>
    %113 = arith.addf %8, %112 : vector<16x32xf32>
    %c0_78 = arith.constant 0 : index
    %c0_79 = arith.constant 0 : index
    %114 = vector.load %arg15[%c0_78, %c0_79] : memref<1x32xf32, #tpu.memory_space<vmem>>, vector<1x32xf32>
    %c0_80 = arith.constant 0 : index
    %c0_81 = arith.constant 0 : index
    %115 = vector.load %arg16[%c0_80, %c0_81] : memref<1x32xf32, #tpu.memory_space<vmem>>, vector<1x32xf32>
    %cst_82 = arith.constant dense<0.000000e+00> : vector<16xf32>
    %116 = vector.multi_reduction <add>, %113, %cst_82 [1] : vector<16x32xf32> to vector<16xf32>
    %117 = vector.shape_cast %116 : vector<16xf32> to vector<16x1xf32>
    %cst_83 = arith.constant 3.200000e+01 : f32
    %118 = vector.broadcast %cst_83 : f32 to vector<16x1xf32>
    %119 = arith.divf %117, %118 : vector<16x1xf32>
    %120 = vector.broadcast %119 : vector<16x1xf32> to vector<16x32xf32>
    %121 = arith.subf %113, %120 : vector<16x32xf32>
    %122 = arith.mulf %121, %121 : vector<16x32xf32>
    %cst_84 = arith.constant dense<0.000000e+00> : vector<16xf32>
    %123 = vector.multi_reduction <add>, %122, %cst_84 [1] : vector<16x32xf32> to vector<16xf32>
    %124 = vector.shape_cast %123 : vector<16xf32> to vector<16x1xf32>
    %cst_85 = arith.constant 3.200000e+01 : f32
    %125 = vector.broadcast %cst_85 : f32 to vector<16x1xf32>
    %126 = arith.divf %124, %125 : vector<16x1xf32>
    %127 = vector.broadcast %119 : vector<16x1xf32> to vector<16x32xf32>
    %128 = arith.subf %113, %127 : vector<16x32xf32>
    %cst_86 = arith.constant 9.99999974E-6 : f32
    %129 = vector.broadcast %cst_86 : f32 to vector<16x1xf32>
    %130 = arith.addf %126, %129 : vector<16x1xf32>
    %131 = math.rsqrt %130 : vector<16x1xf32>
    %132 = vector.broadcast %131 : vector<16x1xf32> to vector<16x32xf32>
    %133 = arith.mulf %128, %132 : vector<16x32xf32>
    %134 = vector.broadcast %114 : vector<1x32xf32> to vector<16x32xf32>
    %135 = arith.mulf %133, %134 : vector<16x32xf32>
    %136 = vector.broadcast %115 : vector<1x32xf32> to vector<16x32xf32>
    %137 = arith.addf %135, %136 : vector<16x32xf32>
    %c0_87 = arith.constant 0 : index
    %c0_88 = arith.constant 0 : index
    %138 = vector.load %arg17[%c0_87, %c0_88] : memref<32x64xf32, #tpu.memory_space<vmem>>, vector<32x64xf32>
    %cst_89 = arith.constant dense<0.000000e+00> : vector<16x64xf32>
    %139 = tpu.matmul %137, %138, %cst_89 {dimension_numbers = #tpu.dot_dimension_numbers<[1], [0], [0], [1], [0, 0, 1, 1], [], []>} : vector<16x32xf32>, vector<32x64xf32>, vector<16x64xf32> -> vector<16x64xf32>
    %c0_90 = arith.constant 0 : index
    %c0_91 = arith.constant 0 : index
    %140 = vector.load %arg18[%c0_90, %c0_91] : memref<1x64xf32, #tpu.memory_space<vmem>>, vector<1x64xf32>
    %141 = vector.broadcast %140 : vector<1x64xf32> to vector<16x64xf32>
    %142 = arith.addf %139, %141 : vector<16x64xf32>
    %143 = arith.mulf %142, %142 : vector<16x64xf32>
    %144 = arith.mulf %142, %143 : vector<16x64xf32>
    %cst_92 = arith.constant 4.471500e-02 : f32
    %145 = vector.broadcast %cst_92 : f32 to vector<16x64xf32>
    %146 = arith.mulf %145, %144 : vector<16x64xf32>
    %147 = arith.addf %142, %146 : vector<16x64xf32>
    %cst_93 = arith.constant 0.797884583 : f32
    %148 = vector.broadcast %cst_93 : f32 to vector<16x64xf32>
    %149 = arith.mulf %148, %147 : vector<16x64xf32>
    %150 = math.tanh %149 : vector<16x64xf32>
    %cst_94 = arith.constant 1.000000e+00 : f32
    %151 = vector.broadcast %cst_94 : f32 to vector<16x64xf32>
    %152 = arith.addf %151, %150 : vector<16x64xf32>
    %cst_95 = arith.constant 5.000000e-01 : f32
    %153 = vector.broadcast %cst_95 : f32 to vector<16x64xf32>
    %154 = arith.mulf %153, %152 : vector<16x64xf32>
    %155 = arith.mulf %142, %154 : vector<16x64xf32>
    %c0_96 = arith.constant 0 : index
    %c0_97 = arith.constant 0 : index
    %156 = vector.load %arg19[%c0_96, %c0_97] : memref<64x32xf32, #tpu.memory_space<vmem>>, vector<64x32xf32>
    %cst_98 = arith.constant dense<0.000000e+00> : vector<16x32xf32>
    %157 = tpu.matmul %155, %156, %cst_98 {dimension_numbers = #tpu.dot_dimension_numbers<[1], [0], [0], [1], [0, 0, 1, 1], [], []>} : vector<16x64xf32>, vector<64x32xf32>, vector<16x32xf32> -> vector<16x32xf32>
    %c0_99 = arith.constant 0 : index
    %c0_100 = arith.constant 0 : index
    %158 = vector.load %arg20[%c0_99, %c0_100] : memref<1x32xf32, #tpu.memory_space<vmem>>, vector<1x32xf32>
    %159 = vector.broadcast %158 : vector<1x32xf32> to vector<16x32xf32>
    %160 = arith.addf %157, %159 : vector<16x32xf32>
    %161 = arith.addf %113, %160 : vector<16x32xf32>
    %c0_101 = arith.constant 0 : index
    %c0_102 = arith.constant 0 : index
    %162 = vector.load %arg21[%c0_101, %c0_102] : memref<1x32xf32, #tpu.memory_space<vmem>>, vector<1x32xf32>
    %c0_103 = arith.constant 0 : index
    %c0_104 = arith.constant 0 : index
    %163 = vector.load %arg22[%c0_103, %c0_104] : memref<1x32xf32, #tpu.memory_space<vmem>>, vector<1x32xf32>
    %cst_105 = arith.constant dense<0.000000e+00> : vector<16xf32>
    %164 = vector.multi_reduction <add>, %161, %cst_105 [1] : vector<16x32xf32> to vector<16xf32>
    %165 = vector.shape_cast %164 : vector<16xf32> to vector<16x1xf32>
    %cst_106 = arith.constant 3.200000e+01 : f32
    %166 = vector.broadcast %cst_106 : f32 to vector<16x1xf32>
    %167 = arith.divf %165, %166 : vector<16x1xf32>
    %168 = vector.broadcast %167 : vector<16x1xf32> to vector<16x32xf32>
    %169 = arith.subf %161, %168 : vector<16x32xf32>
    %170 = arith.mulf %169, %169 : vector<16x32xf32>
    %cst_107 = arith.constant dense<0.000000e+00> : vector<16xf32>
    %171 = vector.multi_reduction <add>, %170, %cst_107 [1] : vector<16x32xf32> to vector<16xf32>
    %172 = vector.shape_cast %171 : vector<16xf32> to vector<16x1xf32>
    %cst_108 = arith.constant 3.200000e+01 : f32
    %173 = vector.broadcast %cst_108 : f32 to vector<16x1xf32>
    %174 = arith.divf %172, %173 : vector<16x1xf32>
    %175 = vector.broadcast %167 : vector<16x1xf32> to vector<16x32xf32>
    %176 = arith.subf %161, %175 : vector<16x32xf32>
    %cst_109 = arith.constant 9.99999974E-6 : f32
    %177 = vector.broadcast %cst_109 : f32 to vector<16x1xf32>
    %178 = arith.addf %174, %177 : vector<16x1xf32>
    %179 = math.rsqrt %178 : vector<16x1xf32>
    %180 = vector.broadcast %179 : vector<16x1xf32> to vector<16x32xf32>
    %181 = arith.mulf %176, %180 : vector<16x32xf32>
    %182 = vector.broadcast %162 : vector<1x32xf32> to vector<16x32xf32>
    %183 = arith.mulf %181, %182 : vector<16x32xf32>
    %184 = vector.broadcast %163 : vector<1x32xf32> to vector<16x32xf32>
    %185 = arith.addf %183, %184 : vector<16x32xf32>
    %c0_110 = arith.constant 0 : index
    %c0_111 = arith.constant 0 : index
    %c0_112 = arith.constant 0 : index
    %186 = vector.load %arg23[%c0_110, %c0_111, %c0_112] : memref<1x16x32xf32, #tpu.memory_space<vmem>>, vector<1x16x32xf32>
    %187 = vector.shape_cast %186 : vector<1x16x32xf32> to vector<16x32xf32>
    %188 = vector.shape_cast %185 : vector<16x32xf32> to vector<1x16x32xf32>
    tpu.vector_store %arg23[%c0_110, %c0_111, %c0_112], %188 {strides = array<i32>} : memref<1x16x32xf32, #tpu.memory_space<vmem>>, vector<1x16x32xf32>,
    return
  }
  func.func @transform_0(%arg0: i32) -> (i32, i32, i32) {
    %c0_i32 = arith.constant 0 : i32
    %c0_i32_0 = arith.constant 0 : i32
    %c0_i32_1 = arith.constant 0 : i32
    return %arg0, %c0_i32, %c0_i32_0 : i32, i32, i32
  }
  func.func @transform_1(%arg0: i32) -> (i32, i32) {
    %c0_i32 = arith.constant 0 : i32
    %c0_i32_0 = arith.constant 0 : i32
    %c0_i32_1 = arith.constant 0 : i32
    return %c0_i32, %c0_i32_0 : i32, i32
  }
  func.func @transform_2(%arg0: i32) -> (i32, i32) {
    %c0_i32 = arith.constant 0 : i32
    %c0_i32_0 = arith.constant 0 : i32
    %c0_i32_1 = arith.constant 0 : i32
    return %c0_i32, %c0_i32_0 : i32, i32
  }
  func.func @transform_3(%arg0: i32) -> (i32, i32) {
    %c0_i32 = arith.constant 0 : i32
    %c0_i32_0 = arith.constant 0 : i32
    %c0_i32_1 = arith.constant 0 : i32
    return %c0_i32, %c0_i32_0 : i32, i32
  }
  func.func @transform_4(%arg0: i32) -> (i32, i32) {
    %c0_i32 = arith.constant 0 : i32
    %c0_i32_0 = arith.constant 0 : i32
    %c0_i32_1 = arith.constant 0 : i32
    return %c0_i32, %c0_i32_0 : i32, i32
  }
  func.func @transform_5(%arg0: i32) -> (i32, i32) {
    %c0_i32 = arith.constant 0 : i32
    %c0_i32_0 = arith.constant 0 : i32
    %c0_i32_1 = arith.constant 0 : i32
    return %c0_i32, %c0_i32_0 : i32, i32
  }
  func.func @transform_6(%arg0: i32) -> (i32, i32, i32) {
    %c0_i32 = arith.constant 0 : i32
    %c0_i32_0 = arith.constant 0 : i32
    %c0_i32_1 = arith.constant 0 : i32
    %c0_i32_2 = arith.constant 0 : i32
    return %c0_i32, %c0_i32_0, %c0_i32_1 : i32, i32, i32
  }
  func.func @transform_7(%arg0: i32) -> (i32, i32, i32) {
    %c0_i32 = arith.constant 0 : i32
    %c0_i32_0 = arith.constant 0 : i32
    %c0_i32_1 = arith.constant 0 : i32
    %c0_i32_2 = arith.constant 0 : i32
    return %c0_i32, %c0_i32_0, %c0_i32_1 : i32, i32, i32
  }
  func.func @transform_8(%arg0: i32) -> (i32, i32, i32) {
    %c0_i32 = arith.constant 0 : i32
    %c0_i32_0 = arith.constant 0 : i32
    %c0_i32_1 = arith.constant 0 : i32
    %c0_i32_2 = arith.constant 0 : i32
    return %c0_i32, %c0_i32_0, %c0_i32_1 : i32, i32, i32
  }
  func.func @transform_9(%arg0: i32) -> (i32, i32, i32) {
    %c0_i32 = arith.constant 0 : i32
    %c0_i32_0 = arith.constant 0 : i32
    %c0_i32_1 = arith.constant 0 : i32
    %c0_i32_2 = arith.constant 0 : i32
    return %c0_i32, %c0_i32_0, %c0_i32_1 : i32, i32, i32
  }
  func.func @transform_10(%arg0: i32) -> (i32, i32, i32) {
    %c0_i32 = arith.constant 0 : i32
    %c0_i32_0 = arith.constant 0 : i32
    %c0_i32_1 = arith.constant 0 : i32
    %c0_i32_2 = arith.constant 0 : i32
    return %c0_i32, %c0_i32_0, %c0_i32_1 : i32, i32, i32
  }
  func.func @transform_11(%arg0: i32) -> (i32, i32, i32) {
    %c0_i32 = arith.constant 0 : i32
    %c0_i32_0 = arith.constant 0 : i32
    %c0_i32_1 = arith.constant 0 : i32
    %c0_i32_2 = arith.constant 0 : i32
    return %c0_i32, %c0_i32_0, %c0_i32_1 : i32, i32, i32
  }
  func.func @transform_12(%arg0: i32) -> (i32, i32, i32) {
    %c0_i32 = arith.constant 0 : i32
    %c0_i32_0 = arith.constant 0 : i32
    %c0_i32_1 = arith.constant 0 : i32
    %c0_i32_2 = arith.constant 0 : i32
    return %c0_i32, %c0_i32_0, %c0_i32_1 : i32, i32, i32
  }
  func.func @transform_13(%arg0: i32) -> (i32, i32) {
    %c0_i32 = arith.constant 0 : i32
    %c0_i32_0 = arith.constant 0 : i32
    %c0_i32_1 = arith.constant 0 : i32
    return %c0_i32, %c0_i32_0 : i32, i32
  }
  func.func @transform_14(%arg0: i32) -> (i32, i32) {
    %c0_i32 = arith.constant 0 : i32
    %c0_i32_0 = arith.constant 0 : i32
    %c0_i32_1 = arith.constant 0 : i32
    return %c0_i32, %c0_i32_0 : i32, i32
  }
  func.func @transform_15(%arg0: i32) -> (i32, i32) {
    %c0_i32 = arith.constant 0 : i32
    %c0_i32_0 = arith.constant 0 : i32
    %c0_i32_1 = arith.constant 0 : i32
    return %c0_i32, %c0_i32_0 : i32, i32
  }
  func.func @transform_16(%arg0: i32) -> (i32, i32) {
    %c0_i32 = arith.constant 0 : i32
    %c0_i32_0 = arith.constant 0 : i32
    %c0_i32_1 = arith.constant 0 : i32
    return %c0_i32, %c0_i32_0 : i32, i32
  }
  func.func @transform_17(%arg0: i32) -> (i32, i32) {
    %c0_i32 = arith.constant 0 : i32
    %c0_i32_0 = arith.constant 0 : i32
    %c0_i32_1 = arith.constant 0 : i32
    return %c0_i32, %c0_i32_0 : i32, i32
  }
  func.func @transform_18(%arg0: i32) -> (i32, i32) {
    %c0_i32 = arith.constant 0 : i32
    %c0_i32_0 = arith.constant 0 : i32
    %c0_i32_1 = arith.constant 0 : i32
    return %c0_i32, %c0_i32_0 : i32, i32
  }
  func.func @transform_19(%arg0: i32) -> (i32, i32) {
    %c0_i32 = arith.constant 0 : i32
    %c0_i32_0 = arith.constant 0 : i32
    %c0_i32_1 = arith.constant 0 : i32
    return %c0_i32, %c0_i32_0 : i32, i32
  }
  func.func @transform_20(%arg0: i32) -> (i32, i32) {
    %c0_i32 = arith.constant 0 : i32
    %c0_i32_0 = arith.constant 0 : i32
    %c0_i32_1 = arith.constant 0 : i32
    return %c0_i32, %c0_i32_0 : i32, i32
  }
  func.func @transform_21(%arg0: i32) -> (i32, i32) {
    %c0_i32 = arith.constant 0 : i32
    %c0_i32_0 = arith.constant 0 : i32
    %c0_i32_1 = arith.constant 0 : i32
    return %c0_i32, %c0_i32_0 : i32, i32
  }
  func.func @transform_22(%arg0: i32) -> (i32, i32, i32) {
    %c0_i32 = arith.constant 0 : i32
    %c0_i32_0 = arith.constant 0 : i32
    %c0_i32_1 = arith.constant 0 : i32
    return %arg0, %c0_i32, %c0_i32_0 : i32, i32, i32
  }
}

</mosaic_0001>

<bundles_post_ra>
// kernel: forward.2
= control target key start
LH: loop header
LB: loop body
LE: loop exit
PB: predicated region body
PF: predicated region fallthrough
CT: control target
= control target key end

     0   :  { %s3187_s0 = inlined_call_operand.vmem [shape: f32[2,16,48], index: 0, kind: input, shape index: {}]   ;;  %s3188_s1 = inlined_call_operand.vmem [shape: f32[48,32], index: 1, kind: input, shape index: {}]   ;;  %s3189_s2 = inlined_call_operand.vmem [shape: f32[1,32], index: 2, kind: input, shape index: {}]   ;;  %s3190_s3 = inlined_call_operand.vmem [shape: f32[16,32], index: 3, kind: input, shape index: {}]   ;;  %s3191_s4 = inlined_call_operand.vmem [shape: f32[1,32], index: 4, kind: input, shape index: {}]   ;;  %s3192_s5 = inlined_call_operand.vmem [shape: f32[1,32], index: 5, kind: input, shape index: {}]   ;;  %s3193_s6 = inlined_call_operand.vmem [shape: f32[2,32,16], index: 6, kind: input, shape index: {}]   ;;  %s3194_s7 = inlined_call_operand.vmem [shape: f32[2,1,16], index: 7, kind: input, shape index: {}]   ;;  %s3195_s8 = inlined_call_operand.vmem [shape: f32[2,32,16], index: 8, kind: input, shape index: {}]   ;;  %s3196_s9 = inlined_call_operand.vmem [shape: f32[2,1,16], index: 9, kind: input, shape index: {}]   ;;  %s3197_s10 = inlined_call_operand.vmem [shape: f32[2,32,16], index: 10, kind: input, shape index: {}]   ;;  %s3198_s11 = inlined_call_operand.vmem [shape: f32[2,1,16], index: 11, kind: input, shape index: {}]   ;;  %s3199_s12 = inlined_call_operand.vmem [shape: f32[2,16,32], index: 12, kind: input, shape index: {}]   ;;  %s3200_s13 = inlined_call_operand.vmem [shape: f32[1,32], index: 13, kind: input, shape index: {}]   ;;  %s3201_s14 = inlined_call_operand.vmem [shape: f32[1,32], index: 14, kind: input, shape index: {}]   ;;  %s3202_s15 = inlined_call_operand.vmem [shape: f32[1,32], index: 15, kind: input, shape index: {}]   ;;  %s3203_s16 = inlined_call_operand.vmem [shape: f32[32,64], index: 16, kind: input, shape index: {}]   ;;  %s3204_s17 = inlined_call_operand.vmem [shape: f32[1,64], index: 17, kind: input, shape index: {}]   ;;  %s3205_s18 = inlined_call_operand.vmem [shape: f32[64,32], index: 18, kind: input, shape index: {}]   ;;  %s3206_s19 = inlined_call_operand.vmem [shape: f32[1,32], index: 19, kind: input, shape index: {}]   ;;  %s3207_s20 = inlined_call_operand.vmem [shape: f32[1,32], index: 20, kind: input, shape index: {}]   ;;  %s3208_s21 = inlined_call_operand.vmem [shape: f32[1,32], index: 21, kind: input, shape index: {}]   ;;  %s3209_s22 = inlined_call_operand.vmem [shape: f32[2,16,32], index: 22, kind: output, shape index: {}]  }
   0x1   :  { %3214 = sst [smem:[#allocation2_spill]] %s3187_s0 }
   0x2   :  { %3215 = sst [smem:[#allocation3_spill]] %s3188_s1 }
   0x3   :  { %3216 = sst [smem:[#allocation4_spill]] %s3189_s2 }
   0x4   :  { %3217 = sst [smem:[#allocation5_spill]] %s3190_s3  ;;  %s2870_s3 = smov 0  }
   0x5   :  { %3218 = sst [smem:[#allocation6_spill]] %s3191_s4 }
   0x6   :  { %3219 = sst [smem:[#allocation7_spill]] %s3192_s5 }
   0x7   :  { %3220 = sst [smem:[#allocation8_spill]] %s3193_s6 }
   0x8 LB: > { %s2276_s28 = sadd.s32 4294967295, %s2753_s3   ;;  %p2280_p0 = scmp.ge.s32.totalorder %s2753_s3, 1  ;;  %s2753_s3 = sphi %s2870_s3, %s32_s3  }
   0x9   : > { %p612_p1 = scmp.lt.s32.totalorder %s2753_s3, 3 }
   0xb   : > { %p613_p2 = pnand %p2280_p0, %p612_p1 }
   0xc   : > { %s3221_s4 = sld [smem:[#allocation3_spill]] (!%p613_p2)  ;;  %p674_p3 = scmp.lt.s32.totalorder (!%p613_p2), %s2276_s28, 1  ;;  %vm699_vm0 = vcmask (!%p613_p2), 392192   ;;  %vm787_vm1 = vcmask (!%p613_p2), 261120   ;;  %v923_v35 = vld [vmem:[%s3195_s8] sm:$0xff] (!%p613_p2)  ;;  %v924_v36 = vld [vmem:[%s3195_s8 + $0x8] sm:$0xff] (!%p613_p2) }
   0xd   : > { %616 = sbr.rel (%p613_p2) target bundleno = 3603 (0xe13), region = 108  ;;  %s3222_s23 = sld [smem:[#allocation2_spill]] (!%p613_p2)  ;;  %v2613_v37 = vpack.c.bf16 (!%p613_p2), %v924_v36, %v923_v35  ;;  %v925_v41 = vld [vmem:[%s3195_s8 + $0x10] sm:$0xff] (!%p613_p2)  ;;  %v926_v42 = vld [vmem:[%s3195_s8 + $0x18] sm:$0xff] (!%p613_p2)  ;;  %v1009_v44 = vld [vmem:[%s3197_s10] sm:$0xff] (!%p613_p2)  ;;  %vm1095_vm2 = vcmask (!%p613_p2), 130048  }
   0xe   : > { %s3223_s6 = sld [smem:[#allocation4_spill]] (!%p613_p2)  ;;  %s3224_s2 = sld [smem:[#allocation5_spill]] (!%p613_p2)  ;;  %v2617_v43 = vpack.c.bf16 (!%p613_p2), %v926_v42, %v925_v41  ;;  %v1010_v45 = vld [vmem:[%s3197_s10 + $0x8] sm:$0xff] (!%p613_p2)  ;;  %v1011_v61 = vld [vmem:[%s3197_s10 + $0x10] sm:$0xff] (!%p613_p2)  ;;  %v1012_v62 = vld [vmem:[%s3197_s10 + $0x18] sm:$0xff] (!%p613_p2)  ;;  %vm2091_vm4 = vcmask (!%p613_p2), 523264  }
   0xf   : > { %2614 = vmatprep.subr.bf16.mxu1 (!%p613_p2), %v2613_v37  ;;  %v2621_v46 = vpack.c.bf16 (!%p613_p2), %v1010_v45, %v1009_v44  ;;  %s3227_s27 = sld [smem:[#allocation7_spill]] (!%p613_p2)  ;;  %vm2997_vm3 = vmpackc.low (!%p613_p2), %vm1095_vm2, %vm1095_vm2 }
  0x10   : > { %2616 = vmatpush3.bf16.msra.mxu1 (!%p613_p2), %v2613_v37 }
  0x11   : > { %2618 = vmatprep.subr.bf16.mxu1 (!%p613_p2), %v2617_v43 }
  0x12   : > { %v686_v0 = vld [vmem:[%s3221_s4] sm:$0xff] (!%p613_p2)  ;;  %v687_v1 = vld [vmem:[%s3221_s4 + $0x8] sm:$0xff] (!%p613_p2)  ;;  %v688_v2 = vld [vmem:[%s3221_s4 + $0x10] sm:$0xff] (!%p613_p2) }
  0x13   : > { %v2593_v3 = vpack.c.bf16 (!%p613_p2), %v687_v1, %v686_v0  ;;  %v689_v4 = vld [vmem:[%s3221_s4 + $0x18] sm:$0xff] (!%p613_p2)  ;;  %v690_v6 = vld [vmem:[%s3221_s4 + $0x20] sm:$0xff] (!%p613_p2)  ;;  %v691_v7 = vld [vmem:[%s3221_s4 + $0x28] sm:$0xff] (!%p613_p2)  ;;  %v2625_v1 = vpack.c.bf16 (!%p613_p2), %v1012_v62, %v1011_v61 }
  0x14   : > { %v2597_v5 = vpack.c.bf16 %v689_v4, %v688_v2  ;;  %s3232_s28 = smov (!%p674_p3, %s2276_s28), 1  ;;  %v2601_v8 = vpack.c.bf16 %v691_v7, %v690_v6  ;;  %v2285_v11 = vld [vmem:[%s3223_s6] ss:$0 sm:$0xff]  ;;  %v782_v17 = vld [vmem:[%s3224_s2 + $0x8] sm:$0xff]  ;;  %2620 = vmatpush3.bf16.msra.mxu1 %v2617_v43  ;;  %s3226_s6 = sld [smem:[#allocation6_spill]] }
  0x15   : > { %2594 = vmatprep.subr.bf16.mxu0 %v2593_v3  ;;  %s3213_s29 = sshll.u32 %s3232_s28, 4  ;;  %v781_v14 = vld [vmem:[%s3224_s2] sm:$0xff]  ;;  %s3230_s24 = sshll.u32 %s3232_s28, 4 }
  0x16   : > { %2596 = vmatpush3.bf16.msra.mxu0 %v2593_v3  ;;  %s678_s1 = scalar_lea.vmem %s3222_s23, %s3213_s29  ;;  %v2289_v56 = vld [vmem:[%s3227_s27] ss:$0 sm:$0xff]  ;;  %s683_s26 = scalar_lea.vmem %s3209_s22, %s3230_s24 }
  0x17   : > { %2598 = vmatprep.subr.bf16.mxu0 %v2597_v5  ;;  %v684_v9 = vld [vmem:[%s678_s1] sm:$0xff]  ;;  %v685_v10 = vld [vmem:[%s678_s1 + $0x8] sm:$0xff]  ;;  %s3225_s1 = sld [smem:[#allocation8_spill]] }
  0x18   : > { %2452 = vmatprep.mubr.msk.f32.mxu0 %vm699_vm0, %v684_v9  ;;  %v2293_v2 = vld [vmem:[%s3196_s9] ss:$0 sm:$0xff] }
  0x19   : > { %v2290_v3 = vld [vmem:[%s3194_s7] ss:$0 sm:$0xff] }
  0x1a   : > { %2600 = vmatpush3.bf16.msra.mxu0 %v2597_v5  ;;  %v2288_v54 = vld [vmem:[%s3226_s6] ss:$0 sm:$0xff] }
  0x1b   : > { %2602 = vmatprep.subr.bf16.mxu0 %v2601_v8  ;;  %v2313_v9 = vld [vmem:[%s3195_s8 + $0x20] sm:$0xff] }
  0x1d   : > { %v831_v32 = vld [vmem:[%s3225_s1] sm:$0xff]  ;;  %v832_v33 = vld [vmem:[%s3225_s1 + $0x8] sm:$0xff]  ;;  %v833_v38 = vld [vmem:[%s3225_s1 + $0x10] sm:$0xff] }
  0x1e   : > { %2604 = vmatpush3.bf16.msra.mxu0 %v2601_v8  ;;  %v2605_v34 = vpack.c.bf16 %v832_v33, %v831_v32  ;;  %v834_v39 = vld [vmem:[%s3225_s1 + $0x18] sm:$0xff] }
  0x1f   : > { %v2609_v40 = vpack.c.bf16 %v834_v39, %v833_v38 }
  0x20   : > { %2606 = vmatprep.subr.bf16.mxu0 %v2605_v34 }
  0x21   : > { %2453 = vmatmul.mubr.msk.f32.vlgmr.msra.gmra.mrb[0].mxu0 %vm699_vm0, %v685_v10  ;;  %v2314_v10 = vld [vmem:[%s3195_s8 + $0x28] sm:$0xff] }
  0x22   : > { %2608 = vmatpush3.bf16.msra.mxu0 %v2605_v34  ;;  %v2318_v34 = vld [vmem:[%s3196_s9 + $0x1] ss:$0 sm:$0xff] }
  0x23   : > { %2610 = vmatprep.subr.bf16.mxu0 %v2609_v40 }
  0x26   : > { %2612 = vmatpush3.bf16.msra.mxu0 %v2609_v40 }
  0x27   : > { %2622 = vmatprep.subr.bf16.mxu0 %v2621_v46 }
  0xf4   : > { %v2454_v12 = vpop.f32.mrb[0].mxu0 }
  0xf5   : > { %v772_v13 = vpop.f32.mrb[1].mxu0  ;;  %v778_v15 = vadd.f32 %v2454_v12, %v2285_v11 }
  0xf6   : > { %v773_v16 = vadd.f32 %v2285_v11, %v772_v13 }
  0xf7   : > { %v2915_v19 = vadd.f32 %v782_v17, %v778_v15  ;;  %v2647_v15 = vpack.c.bf16 %v2314_v10, %v2313_v9 }
  0xf8   : > { %v2913_v18 = vadd.f32 %v781_v14, %v773_v16  ;;  %v2296_v16 = vld [vmem:[%s3198_s11] ss:$0 sm:$0xff] }
  0xf9   : > { %v791_v21 = vsel %vm787_vm1, %v2915_v19, 0.0 }
  0xfa   : > { %v788_v20 = vsel %vm787_vm1, %v2913_v18, 0.0 }
  0xfb   : > { %789 = vadd.xlane.f32.xlu0 %v788_v20 }
  0xff   : > { %792 = vadd.xlane.f32.xlu0 %v791_v21 }
 0x188   : > { %v790_v22 = vpop.xlane.xlu0 %789 }
 0x189   : > { %v795_v23 = vmul.f32 0.03125, %v790_v22  ;;  %v2315_v22 = vld [vmem:[%s3195_s8 + $0x30] sm:$0xff] }
 0x18b   : > { %v797_v24 = vsub.f32 %v2913_v18, %v795_v23  ;;  %v2316_v23 = vld [vmem:[%s3195_s8 + $0x38] sm:$0xff] }
 0x18c   : > { %v793_v25 = vpop.xlane.xlu0 %792 }
 0x18d   : > { %v796_v26 = vmul.f32 0.03125, %v793_v25  ;;  %v799_v27 = vmul.f32 %v797_v24, %v797_v24 }
 0x18f   : > { %v798_v28 = vsub.f32 %v2915_v19, %v796_v26  ;;  %v801_v29 = vsel %vm787_vm1, %v799_v27, 0.0  ;;  %v2651_v27 = vpack.c.bf16 %v2316_v23, %v2315_v22 }
 0x190   : > { %802 = vadd.xlane.f32.xlu1 %v801_v29 }
 0x191   : > { %v800_v30 = vmul.f32 %v798_v28, %v798_v28 }
 0x193   : > { %v804_v31 = vsel %vm787_vm1, %v800_v30, 0.0 }
 0x194   : > { %805 = vadd.xlane.f32.xlu1 %v804_v31 }
 0x21d   : > { %v803_v47 = vpop.xlane.xlu1 %802 }
 0x21e   : > { %v807_v48 = vmul.f32 0.03125, %v803_v47 }
 0x220   : > { %v809_v49 = vadd.f32 1e-05, %v807_v48 }
 0x221   : > { %v806_v50 = vpop.xlane.xlu1 %805 }
 0x222   : > { %2715 = vrsqrt.f32 %v809_v49  ;;  %v808_v51 = vmul.f32 0.03125, %v806_v50  ;;  %v2305_v50 = vld [vmem:[%s3225_s1 + $0x20] sm:$0xff] }
 0x224   : > { %v810_v52 = vadd.f32 1e-05, %v808_v51  ;;  %v2306_v51 = vld [vmem:[%s3225_s1 + $0x28] sm:$0xff] }
 0x226   : > { %2717 = vrsqrt.f32 %v810_v52  ;;  %v2639_v52 = vpack.c.bf16 %v2306_v51, %v2305_v50 }
 0x22c   : > { %v2716_v53 = vpop.eup %2715 }
 0x22d   : > { %v813_v55 = vmul.f32 %v2716_v53, %v797_v24 }
 0x22f   : > { %v821_v57 = vmul.f32 %v2288_v54, %v813_v55 }
 0x230   : > { %v2718_v58 = vpop.eup %2717 }
 0x231   : > { %v2961_v59 = vadd.f32 %v2289_v56, %v821_v57  ;;  %v814_v60 = vmul.f32 %v2718_v58, %v798_v28  ;;  %v2308_v57 = vld [vmem:[%s3225_s1 + $0x38] sm:$0xff] }
 0x233   : > { %v822_v63 = vmul.f32 %v2288_v54, %v814_v60  ;;  %2463 = vmatprep.mubr.msk.f32.mxu0 %vm787_vm1, %v2961_v59  ;;  %2474 = vmatprep.mubr.msk.f32.mxu1 %vm787_vm1, %v2961_v59 }
 0x235   : > { %v2973_v0 = vadd.f32 %v2289_v56, %v822_v63  ;;  %v2307_v56 = vld [vmem:[%s3225_s1 + $0x30] sm:$0xff]  ;;  %v2321_v63 = vld [vmem:[%s3197_s10 + $0x20] sm:$0xff] }
 0x236   : > { %v2643_v62 = vpack.c.bf16 %v2308_v57, %v2307_v56 }
 0x237   : > { %2464 = vmatmul.mubr.msk.f32.vlgmr.msra.gmra.mrb[2].mxu0 %vm787_vm1, %v2973_v0  ;;  %2475 = vmatmul.mubr.msk.f32.vlgmr.msra.gmra.mrb[0].mxu1 %vm787_vm1, %v2973_v0 }
 0x238   : > { %2624 = vmatpush3.bf16.msra.mxu0 %v2621_v46  ;;  %2485 = vmatprep.mubr.msk.f32.mxu0 %vm787_vm1, %v2961_v59 }
 0x239   : > { %2626 = vmatprep.subr.bf16.mxu0 %v2625_v1 }
 0x23c   : > { %2628 = vmatpush3.bf16.msra.mxu0 %v2625_v1  ;;  %v2322_v1 = vld [vmem:[%s3197_s10 + $0x28] sm:$0xff] }
 0x23f   : > { %2486 = vmatmul.mubr.msk.f32.vlgmr.msra.gmra.mrb[4].mxu0 %vm787_vm1, %v2973_v0 }
 0x30a   : > { %v2465_v4 = vpop.f32.mrb[2].mxu0  ;;  %v2476_v5 = vpop.f32.mrb[0].mxu1 }
 0x30b   : > { %v1006_v6 = vadd.f32 %v2476_v5, %v2293_v2  ;;  %v914_v7 = vpop.f32.mrb[3].mxu0  ;;  %v1000_v8 = vpop.f32.mrb[1].mxu1  ;;  %v920_v25 = vadd.f32 %v2465_v4, %v2290_v3  ;;  %v2324_v4 = vld [vmem:[%s3197_s10 + $0x38] sm:$0xff] }
 0x30c   : > { %v915_v11 = vadd.f32 %v2290_v3, %v914_v7  ;;  %v1001_v12 = vadd.f32 %v2293_v2, %v1000_v8  ;;  %v2655_v2 = vpack.c.bf16 %v2322_v1, %v2321_v63  ;;  %v2323_v3 = vld [vmem:[%s3197_s10 + $0x30] sm:$0xff]  ;;  %v2310_v8 = vld [vmem:[%s3194_s7 + $0x1] ss:$0 sm:$0xff] }
 0x30d   : > { %v2659_v5 = vpack.c.bf16 %v2324_v4, %v2323_v3  ;;  %v1966_v4 = vld [vmem:[%s3203_s16] sm:$0xff] }
 0x30e   : > { %v2629_v14 = vpack.c.bf16 %v1006_v6, %v1001_v12  ;;  %2492 = vmatprep.mubr.msk.f32.mxu1 %vm1095_vm2, %v915_v11 }
 0x310   : > { %2631 = vmatprep.subr.msk.bf16.mxu1 %vm2997_vm3, %v2629_v14 }
 0x311   : > { %2634 = vmatpush3.bf16.xpose.msk.msra.mxu1 %vm2997_vm3, %v2629_v14 }
 0x312   : > { %v2487_v17 = vpop.f32.mrb[4].mxu0  ;;  %2648 = vmatprep.subr.bf16.mxu1 %v2647_v15 }
 0x313   : > { %v1092_v20 = vadd.f32 %v2487_v17, %v2296_v16  ;;  %v1086_v21 = vpop.f32.mrb[5].mxu0 }
 0x314   : > { %v1087_v24 = vadd.f32 %v2296_v16, %v1086_v21 }
 0x316   : > { %v2635_v26 = vpack.c.bf16 %v1092_v20, %v1087_v24 }
 0x318   : > { %2636 = vmatprep.subr.bf16.mxu0 %v2635_v26  ;;  %2493 = vmatmul.mubr.msk.f32.vlgmr.msra.gmra.mrb[2].mxu1 %vm1095_vm2, %v920_v25 }
 0x319   : > { %2638 = vmatpush3.bf16.msra.mxu0 %v2635_v26  ;;  %2650 = vmatpush3.bf16.msra.mxu1 %v2647_v15 }
 0x31a   : > { %2521 = vmatprep.mubr.msk.f32.mxu1 %vm787_vm1, %v2961_v59  ;;  %2652 = vmatprep.subr.bf16.mxu1 %v2651_v27 }
 0x31b   : > { %2640 = vmatprep.subr.bf16.mxu0 %v2639_v52 }
 0x31d   : > { %2654 = vmatpush3.bf16.msra.mxu1 %v2651_v27 }
 0x320   : > { %2522 = vmatmul.mubr.msk.f32.vlgmr.msra.gmra.mrb[4].mxu1 %vm787_vm1, %v2973_v0 }
 0x3eb   : > { %v2494_v28 = vpop.f32.mrb[2].mxu1 }
 0x3ec   : > { %v1184_v29 = vmul.f32 0.25, %v2494_v28  ;;  %v1174_v30 = vpop.f32.mrb[3].mxu1 }
 0x3ed   : > { %v1183_v31 = vmul.f32 0.25, %v1174_v30 }
 0x3ee   : > { %v1188_v32 = vsel %vm1095_vm2, %v1184_v29, -inf }
 0x3ef   : > { %1189 = vmax.xlane.f32.xlu1 %v1188_v32  ;;  %v1185_v33 = vsel %vm1095_vm2, %v1183_v31, -inf }
 0x3f0   : > { %1186 = vmax.xlane.f32.xlu0 %v1185_v33 }
 0x3f3   : > { %v2523_v35 = vpop.f32.mrb[4].mxu1 }
 0x3f4   : > { %v1463_v36 = vadd.f32 %v2523_v35, %v2318_v34  ;;  %v1457_v37 = vpop.f32.mrb[5].mxu1  ;;  %v2335_v35 = vld [vmem:[%s3199_s12 + $0x10] sm:$0xff] }
 0x3f5   : > { %v1458_v38 = vadd.f32 %v2318_v34, %v1457_v37 }
 0x3f7   : > { %v2663_v39 = vpack.c.bf16 %v1463_v36, %v1458_v38  ;;  %v2336_v36 = vld [vmem:[%s3199_s12 + $0x18] sm:$0xff] }
 0x3f8   : > { %v2673_v37 = vpack.c.bf16 %v2336_v36, %v2335_v35  ;;  %v2082_v35 = vld [vmem:[%s3205_s18 + $0x30] sm:$0xff]  ;;  %v2083_v36 = vld [vmem:[%s3205_s18 + $0x38] sm:$0xff] }
 0x3f9   : > { %2665 = vmatprep.subr.msk.bf16.mxu1 %vm2997_vm3, %v2663_v39 }
 0x3fa   : > { %2668 = vmatpush3.bf16.xpose.msk.msra.mxu1 %vm2997_vm3, %v2663_v39 }
 0x3fb   : > { %2674 = vmatprep.subr.bf16.mxu1 %v2673_v37 }
 0x47c   : > { %v1190_v40 = vpop.xlane.xlu1 %1189 }
 0x47d   : > { %v1192_v41 = vsub.f32 %v1184_v29, %v1190_v40  ;;  %v1187_v42 = vpop.xlane.xlu0 %1186 }
 0x47e   : > { %v1191_v43 = vsub.f32 %v1183_v31, %v1187_v42 }
 0x47f   : > { %v1195_v44 = vmul.f32 1.442695, %v1192_v41 }
 0x480   : > { %v1193_v45 = vmul.f32 1.442695, %v1191_v43 }
 0x481   : > { %2719 = vpow2.f32 %v1195_v44  ;;  %v1288_v44 = vld [vmem:[%s3199_s12] sm:$0xff] }
 0x482   : > { %2721 = vpow2.f32 %v1193_v45  ;;  %v1289_v45 = vld [vmem:[%s3199_s12 + $0x8] sm:$0xff] }
 0x48b   : > { %v2720_v46 = vpop.eup %2719 }
 0x48c   : > { %v2722_v47 = vpop.eup %2721  ;;  %v1200_v48 = vsel %vm1095_vm2, %v2720_v46, 0.0 }
 0x48d   : > { %1201 = vadd.xlane.f32.xlu1 %v1200_v48  ;;  %v1197_v49 = vsel %vm1095_vm2, %v2722_v47, 0.0 }
 0x48e   : > { %1198 = vadd.xlane.f32.xlu0 %v1197_v49  ;;  %v2341_v49 = vld [vmem:[%s3200_s13] ss:$0 sm:$0xff] }
 0x51a   : > { %v1202_v53 = vpop.xlane.xlu1 %1201 }
 0x51b   : > { %2723 = vrcp.f32 %v1202_v53  ;;  %v1199_v54 = vpop.xlane.xlu0 %1198 }
 0x51c   : > { %2725 = vrcp.f32 %v1199_v54 }
 0x525   : > { %v2724_v55 = vpop.eup %2723 }
 0x526   : > { %v2726_v58 = vpop.eup %2725  ;;  %v1206_v61 = vmul.f32 %v2724_v55, %v2720_v46  ;;  %v2677_v46 = vpack.c.bf16 %v1289_v45, %v1288_v44 }
 0x527   : > { %v1205_v60 = vmul.f32 %v2726_v58, %v2722_v47 }
 0x529   : > { %2499 = vmatprep.mubr.msk.f32.mxu0 %vm1095_vm2, %v1205_v60 }
 0x52a   : > { %2500 = vmatmul.mubr.msk.f32.vlgmr.msra.gmra.mrb[6].mxu0 %vm1095_vm2, %v1206_v61 }
 0x52b   : > { %2642 = vmatpush3.bf16.msra.mxu0 %v2639_v52  ;;  %2510 = vmatprep.mubr.msk.f32.mxu0 %vm787_vm1, %v2961_v59 }
 0x52c   : > { %2644 = vmatprep.subr.bf16.mxu0 %v2643_v62 }
 0x52f   : > { %2646 = vmatpush3.bf16.msra.mxu0 %v2643_v62 }
 0x530   : > { %2656 = vmatprep.subr.bf16.mxu0 %v2655_v2 }
 0x532   : > { %2511 = vmatmul.mubr.msk.f32.vlgmr.msra.gmra.mrb[8].mxu0 %vm787_vm1, %v2973_v0 }
 0x533   : > { %2658 = vmatpush3.bf16.msra.mxu0 %v2655_v2  ;;  %2532 = vmatprep.mubr.msk.f32.mxu0 %vm787_vm1, %v2961_v59  ;;  %v2326_v59 = vld [vmem:[%s3198_s11 + $0x1] ss:$0 sm:$0xff] }
 0x534   : > { %2660 = vmatprep.subr.bf16.mxu0 %v2659_v5 }
 0x537   : > { %2662 = vmatpush3.bf16.msra.mxu0 %v2659_v5  ;;  %v1967_v5 = vld [vmem:[%s3203_s16 + $0x8] sm:$0xff] }
 0x53a   : > { %2533 = vmatmul.mubr.msk.f32.vlgmr.msra.gmra.mrb[10].mxu0 %vm787_vm1, %v2973_v0 }
 0x5fd   : > { %v3065_v6 = vpop.f32.mrb[6].mxu0 }
 0x5fe   : > { %v1279_v7 = vpop.f32.mrb[7].mxu0 }
 0x605   : > { %v2512_v9 = vpop.f32.mrb[8].mxu0 }
 0x606   : > { %v1369_v10 = vpop.f32.mrb[9].mxu0  ;;  %v1375_v12 = vadd.f32 %v2512_v9, %v2310_v8 }
 0x607   : > { %v1370_v11 = vadd.f32 %v2310_v8, %v1369_v10  ;;  %v1969_v8 = vld [vmem:[%s3203_s16 + $0x18] sm:$0xff] }
 0x609   : > { %2539 = vmatprep.mubr.msk.f32.mxu1 %vm1095_vm2, %v1370_v11 }
 0x60a   : > { %2540 = vmatmul.mubr.msk.f32.vlgmr.msra.gmra.mrb[6].mxu1 %vm1095_vm2, %v1375_v12 }
 0x60b   : > { %2676 = vmatpush3.bf16.msra.mxu1 %v2673_v37  ;;  %v2701_v37 = vpack.c.bf16 %v2083_v36, %v2082_v35 }
 0x60c   : > { %2678 = vmatprep.subr.bf16.mxu1 %v2677_v46 }
 0x60d   : > { %v2534_v0 = vpop.f32.mrb[10].mxu0 }
 0x60e   : > { %v1551_v13 = vadd.f32 %v2534_v0, %v2326_v59  ;;  %v1545_v14 = vpop.f32.mrb[11].mxu0 }
 0x60f   : > { %v1546_v15 = vadd.f32 %v2326_v59, %v1545_v14 }
 0x611   : > { %v2669_v16 = vpack.c.bf16 %v1551_v13, %v1546_v15  ;;  %v2342_v15 = vld [vmem:[%s3201_s14] ss:$0 sm:$0xff] }
 0x613   : > { %2670 = vmatprep.subr.bf16.mxu0 %v2669_v16 }
 0x614   : > { %2672 = vmatpush3.bf16.msra.mxu0 %v2669_v16 }
 0x6dd   : > { %v2541_v17 = vpop.f32.mrb[6].mxu1 }
 0x6de   : > { %v1642_v20 = vmul.f32 0.25, %v2541_v17  ;;  %v1632_v21 = vpop.f32.mrb[7].mxu1 }
 0x6df   : > { %v1641_v22 = vmul.f32 0.25, %v1632_v21  ;;  %v2343_v21 = vld [vmem:[%s3202_s15] ss:$0 sm:$0xff] }
 0x6e0   : > { %v1646_v23 = vsel %vm1095_vm2, %v1642_v20, -inf }
 0x6e1   : > { %1647 = vmax.xlane.f32.xlu1 %v1646_v23  ;;  %v1643_v24 = vsel %vm1095_vm2, %v1641_v22, -inf }
 0x6e2   : > { %1644 = vmax.xlane.f32.xlu0 %v1643_v24 }
 0x76e   : > { %v1648_v25 = vpop.xlane.xlu1 %1647 }
 0x76f   : > { %v1650_v26 = vsub.f32 %v1642_v20, %v1648_v25  ;;  %v1645_v27 = vpop.xlane.xlu0 %1644 }
 0x770   : > { %v1649_v28 = vsub.f32 %v1641_v22, %v1645_v27  ;;  %v2077_v27 = vld [vmem:[%s3205_s18 + $0x8] sm:$0xff] }
 0x771   : > { %v1653_v29 = vmul.f32 1.442695, %v1650_v26  ;;  %v2076_v26 = vld [vmem:[%s3205_s18] sm:$0xff] }
 0x772   : > { %v1651_v30 = vmul.f32 1.442695, %v1649_v28  ;;  %v2689_v28 = vpack.c.bf16 %v2077_v27, %v2076_v26  ;;  %v2351_v26 = vld [vmem:[%s3208_s21] ss:$0 sm:$0xff] }
 0x773   : > { %2727 = vpow2.f32 %v1653_v29  ;;  %v2078_v29 = vld [vmem:[%s3205_s18 + $0x10] sm:$0xff] }
 0x774   : > { %2729 = vpow2.f32 %v1651_v30  ;;  %v2079_v30 = vld [vmem:[%s3205_s18 + $0x18] sm:$0xff] }
 0x77d   : > { %v2728_v31 = vpop.eup %2727 }
 0x77e   : > { %v2730_v32 = vpop.eup %2729  ;;  %v1658_v33 = vsel %vm1095_vm2, %v2728_v31, 0.0 }
 0x77f   : > { %1659 = vadd.xlane.f32.xlu1 %v1658_v33  ;;  %v1655_v34 = vsel %vm1095_vm2, %v2730_v32, 0.0  ;;  %v2081_v33 = vld [vmem:[%s3205_s18 + $0x28] sm:$0xff] }
 0x780   : > { %1656 = vadd.xlane.f32.xlu0 %v1655_v34 }
 0x80c   : > { %v1660_v38 = vpop.xlane.xlu1 %1659 }
 0x80d   : > { %2731 = vrcp.f32 %v1660_v38  ;;  %v1657_v39 = vpop.xlane.xlu0 %1656  ;;  %v2344_v38 = vld [vmem:[%s3204_s17] ss:$0 sm:$0xff] }
 0x80e   : > { %2733 = vrcp.f32 %v1657_v39 }
 0x817   : > { %v2732_v40 = vpop.eup %2731 }
 0x818   : > { %v2734_v41 = vpop.eup %2733  ;;  %v1664_v43 = vmul.f32 %v2732_v40, %v2728_v31  ;;  %v2693_v31 = vpack.c.bf16 %v2079_v30, %v2078_v29 }
 0x819   : > { %v1663_v42 = vmul.f32 %v2734_v41, %v2730_v32  ;;  %v2080_v32 = vld [vmem:[%s3205_s18 + $0x20] sm:$0xff] }
 0x81a   : > { %v2697_v34 = vpack.c.bf16 %v2081_v33, %v2080_v32 }
 0x81b   : > { %2546 = vmatprep.mubr.msk.f32.mxu0 %vm1095_vm2, %v1663_v42 }
 0x81c   : > { %2547 = vmatmul.mubr.msk.f32.vlgmr.msra.gmra.mrb[12].mxu0 %vm1095_vm2, %v1664_v43 }
 0x8ef   : > { %v2548_v47 = vpop.f32.mrb[12].mxu0 }
 0x8f0   : > { %v1737_v48 = vpop.f32.mrb[13].mxu0 }
 0x8f1   : > { %2553 = vmatprep.mubr.msk.f32.mxu1 %vm1095_vm2, %v1737_v48 }
 0x8f2   : > { %2554 = vmatmul.mubr.msk.f32.vlgmr.msra.gmra.mrb[8].mxu1 %vm1095_vm2, %v2548_v47 }
 0x8f3   : > { %2680 = vmatpush3.bf16.msra.mxu1 %v2677_v46  ;;  %2560 = vmatprep.mubr.msk.f32.mxu1 %vm1095_vm2, %v1279_v7  ;;  %v1968_v7 = vld [vmem:[%s3203_s16 + $0x10] sm:$0xff] }
 0x8f4   : > { %v2685_v9 = vpack.c.bf16 %v1969_v8, %v1968_v7  ;;  %2690 = vmatprep.subr.bf16.mxu1 %v2689_v28 }
 0x8fa   : > { %2561 = vmatmul.mubr.msk.f32.vlgmr.msra.gmra.mrb[8].mxu1 %vm1095_vm2, %v3065_v6  ;;  %v2681_v6 = vpack.c.bf16 %v1967_v5, %v1966_v4 }
 0x8fb   : > { %2692 = vmatpush3.bf16.msra.mxu1 %v2689_v28 }
 0x8fc   : > { %2682 = vmatprep.subr.bf16.mxu0 %v2681_v6  ;;  %2694 = vmatprep.subr.bf16.mxu1 %v2693_v31 }
 0x8fd   : > { %2684 = vmatpush3.bf16.msra.mxu0 %v2681_v6 }
 0x8fe   : > { %2686 = vmatprep.subr.bf16.mxu0 %v2685_v9 }
 0x8ff   : > { %2696 = vmatpush3.bf16.msra.mxu1 %v2693_v31 }
 0x900   : > { %2698 = vmatprep.subr.bf16.mxu1 %v2697_v34 }
 0x901   : > { %2688 = vmatpush3.bf16.msra.mxu0 %v2685_v9 }
 0x903   : > { %2700 = vmatpush3.bf16.msra.mxu1 %v2697_v34 }
 0x904   : > { %2702 = vmatprep.subr.bf16.mxu1 %v2701_v37 }
 0x907   : > { %2704 = vmatpush3.bf16.msra.mxu1 %v2701_v37 }
 0x9cd   : > { %v2562_v50 = vpop.f32.mrb[8].mxu1 }
 0x9ce   : > { %v1919_v51 = vadd.f32 %v2562_v50, %v2341_v49  ;;  %v1902_v52 = vpop.f32.mrb[9].mxu1 }
 0x9cf   : > { %v1918_v53 = vadd.f32 %v2341_v49, %v1902_v52 }
 0x9d0   : > { %v3102_v54 = vadd.f32 %v1919_v51, %v2915_v19 }
 0x9d1   : > { %v3105_v55 = vadd.f32 %v1918_v53, %v2913_v18 }
 0x9d2   : > { %v1927_v56 = vsel %vm787_vm1, %v3102_v54, 0.0 }
 0x9d3   : > { %1928 = vadd.xlane.f32.xlu1 %v1927_v56  ;;  %v1924_v57 = vsel %vm787_vm1, %v3105_v55, 0.0 }
 0x9d4   : > { %1925 = vadd.xlane.f32.xlu0 %v1924_v57 }
 0xa60   : > { %v1929_v58 = vpop.xlane.xlu1 %1928 }
 0xa61   : > { %v1931_v60 = vmul.f32 0.03125, %v1929_v58  ;;  %v1926_v61 = vpop.xlane.xlu0 %1925 }
 0xa62   : > { %v1930_v62 = vmul.f32 0.03125, %v1926_v61 }
 0xa63   : > { %v1933_v63 = vsub.f32 %v3102_v54, %v1931_v60 }
 0xa64   : > { %v1932_v19 = vsub.f32 %v3105_v55, %v1930_v62 }
 0xa65   : > { %v1935_v1 = vmul.f32 %v1933_v63, %v1933_v63 }
 0xa66   : > { %v1934_v2 = vmul.f32 %v1932_v19, %v1932_v19 }
 0xa67   : > { %v1939_v18 = vsel %vm787_vm1, %v1935_v1, 0.0 }
 0xa68   : > { %1940 = vadd.xlane.f32.xlu1 %v1939_v18  ;;  %v1936_v3 = vsel %vm787_vm1, %v1934_v2, 0.0 }
 0xa69   : > { %1937 = vadd.xlane.f32.xlu0 %v1936_v3 }
 0xaf5   : > { %v1941_v10 = vpop.xlane.xlu1 %1940 }
 0xaf6   : > { %v1943_v11 = vmul.f32 0.03125, %v1941_v10  ;;  %v1938_v12 = vpop.xlane.xlu0 %1937 }
 0xaf7   : > { %v1942_v59 = vmul.f32 0.03125, %v1938_v12 }
 0xaf8   : > { %v1945_v0 = vadd.f32 1e-05, %v1943_v11 }
 0xaf9   : > { %v1944_v13 = vadd.f32 1e-05, %v1942_v59 }
 0xafa   : > { %2735 = vrsqrt.f32 %v1945_v0 }
 0xafb   : > { %2737 = vrsqrt.f32 %v1944_v13 }
 0xb04   : > { %v2736_v14 = vpop.eup %2735 }
 0xb05   : > { %v2738_v16 = vpop.eup %2737  ;;  %v1949_v17 = vmul.f32 %v2736_v14, %v1933_v63 }
 0xb06   : > { %v1948_v20 = vmul.f32 %v2738_v16, %v1932_v19  ;;  %v2347_v19 = vld [vmem:[%s3206_s19] ss:$0 sm:$0xff] }
 0xb07   : > { %v1957_v22 = vmul.f32 %v2342_v15, %v1949_v17 }
 0xb08   : > { %v1956_v23 = vmul.f32 %v2342_v15, %v1948_v20 }
 0xb09   : > { %v1965_v25 = vadd.f32 %v2343_v21, %v1957_v22 }
 0xb0a   : > { %v1964_v24 = vadd.f32 %v2343_v21, %v1956_v23  ;;  %v2350_v23 = vld [vmem:[%s3207_s20] ss:$0 sm:$0xff] }
 0xb0c   : > { %2571 = vmatprep.mubr.msk.f32.mxu0 %vm787_vm1, %v1964_v24 }
 0xb0d   : > { %2572 = vmatmul.mubr.msk.f32.vlgmr.msra.gmra.mrb[14].mxu0 %vm787_vm1, %v1965_v25 }
 0xbe0   : > { %v2573_v39 = vpop.f32.mrb[14].mxu0 }
 0xbe1   : > { %v2055_v40 = vadd.f32 %v2573_v39, %v2344_v38  ;;  %v2049_v41 = vpop.f32.mrb[15].mxu0 }
 0xbe2   : > { %v2050_v42 = vadd.f32 %v2344_v38, %v2049_v41 }
 0xbe3   : > { %v2059_v43 = vmul.f32 %v2055_v40, %v2055_v40 }
 0xbe4   : > { %v2058_v44 = vmul.f32 %v2050_v42, %v2050_v42 }
 0xbe5   : > { %v2061_v45 = vmul.f32 %v2059_v43, %v2055_v40 }
 0xbe6   : > { %v2060_v46 = vmul.f32 %v2058_v44, %v2050_v42 }
 0xbe7   : > { %v2063_v47 = vmul.f32 0.044715, %v2061_v45 }
 0xbe8   : > { %v2062_v48 = vmul.f32 0.044715, %v2060_v46 }
 0xbe9   : > { %v2065_v49 = vadd.f32 %v2063_v47, %v2055_v40 }
 0xbea   : > { %v2064_v50 = vadd.f32 %v2062_v48, %v2050_v42 }
 0xbeb   : > { %v2067_v51 = vmul.f32 0.7978846, %v2065_v49 }
 0xbec   : > { %v2066_v52 = vmul.f32 0.7978846, %v2064_v50 }
 0xbed   : > { %2739 = vtanh.f32 %v2067_v51 }
 0xbee   : > { %2741 = vtanh.f32 %v2066_v52 }
 0xbf7   : > { %v2740_v53 = vpop.eup %2739 }
 0xbf8   : > { %v2742_v56 = vpop.eup %2741  ;;  %v2071_v57 = vadd.f32 1.0, %v2740_v53 }
 0xbf9   : > { %v2070_v58 = vadd.f32 1.0, %v2742_v56 }
 0xbfa   : > { %v2073_v60 = vmul.f32 0.5, %v2071_v57 }
 0xbfb   : > { %v2072_v61 = vmul.f32 0.5, %v2070_v58 }
 0xbfc   : > { %v2075_v63 = vmul.f32 %v2073_v60, %v2055_v40 }
 0xbfd   : > { %v2074_v62 = vmul.f32 %v2072_v61, %v2050_v42 }
 0xbff   : > { %2590 = vmatprep.mubr.msk.f32.mxu1 %vm2091_vm4, %v2074_v62 }
 0xc00   : > { %2591 = vmatmul.mubr.msk.f32.vlgmr.msra.gmra.mrb[10].mxu1 %vm2091_vm4, %v2075_v63 }
 0xcd3   : > { %v2592_v1 = vpop.f32.mrb[10].mxu1 }
 0xcd4   : > { %v2170_v2 = vadd.f32 %v2592_v1, %v2347_v19  ;;  %v2164_v18 = vpop.f32.mrb[11].mxu1 }
 0xcd5   : > { %v2165_v3 = vadd.f32 %v2347_v19, %v2164_v18 }
 0xcd6   : > { %v2174_v4 = vadd.f32 %v2170_v2, %v3102_v54 }
 0xcd7   : > { %v2173_v5 = vadd.f32 %v2165_v3, %v3105_v55 }
 0xcd8   : > { %v2180_v6 = vsel %vm787_vm1, %v2174_v4, 0.0 }
 0xcd9   : > { %2181 = vadd.xlane.f32.xlu1 %v2180_v6  ;;  %v2177_v7 = vsel %vm787_vm1, %v2173_v5, 0.0 }
 0xcda   : > { %2178 = vadd.xlane.f32.xlu0 %v2177_v7 }
 0xd66   : > { %v2182_v8 = vpop.xlane.xlu1 %2181 }
 0xd67   : > { %v2184_v9 = vmul.f32 0.03125, %v2182_v8  ;;  %v2179_v10 = vpop.xlane.xlu0 %2178 }
 0xd68   : > { %v2183_v11 = vmul.f32 0.03125, %v2179_v10 }
 0xd69   : > { %v2186_v12 = vsub.f32 %v2174_v4, %v2184_v9 }
 0xd6a   : > { %v2185_v59 = vsub.f32 %v2173_v5, %v2183_v11 }
 0xd6b   : > { %v2188_v0 = vmul.f32 %v2186_v12, %v2186_v12 }
 0xd6c   : > { %v2187_v13 = vmul.f32 %v2185_v59, %v2185_v59 }
 0xd6d   : > { %v2192_v14 = vsel %vm787_vm1, %v2188_v0, 0.0 }
 0xd6e   : > { %2193 = vadd.xlane.f32.xlu1 %v2192_v14  ;;  %v2189_v54 = vsel %vm787_vm1, %v2187_v13, 0.0 }
 0xd6f   : > { %2190 = vadd.xlane.f32.xlu0 %v2189_v54 }
 0xdfb   : > { %v2194_v55 = vpop.xlane.xlu1 %2193 }
 0xdfc   : > { %v2196_v15 = vmul.f32 0.03125, %v2194_v55  ;;  %v2191_v16 = vpop.xlane.xlu0 %2190 }
 0xdfd   : > { %v2195_v17 = vmul.f32 0.03125, %v2191_v16 }
 0xdfe   : > { %v2198_v20 = vadd.f32 1e-05, %v2196_v15 }
 0xdff   : > { %v2197_v21 = vadd.f32 1e-05, %v2195_v17 }
 0xe00   : > { %2743 = vrsqrt.f32 %v2198_v20 }
 0xe01   : > { %2745 = vrsqrt.f32 %v2197_v21 }
 0xe0a   : > { %v2744_v22 = vpop.eup %2743 }
 0xe0b   : > { %v2746_v24 = vpop.eup %2745  ;;  %v2202_v25 = vmul.f32 %v2744_v22, %v2186_v12 }
 0xe0c   : > { %v2201_v27 = vmul.f32 %v2746_v24, %v2185_v59 }
 0xe0d   : > { %v2210_v28 = vmul.f32 %v2350_v23, %v2202_v25 }
 0xe0e   : > { %v2209_v29 = vmul.f32 %v2350_v23, %v2201_v27 }
 0xe0f   : > { %v2218_v30 = vadd.f32 %v2351_v26, %v2210_v28 }
 0xe10   : > { %v2217_v31 = vadd.f32 %v2351_v26, %v2209_v29 }
 0xe11   : > { %2220 = vst.msk [vmem:[%s683_s26 + $0x8] sm:$0xff] %vm787_vm1, %v2218_v30 }
 0xe12   : > { %2219 = vst.msk [vmem:[%s683_s26] sm:$0xff] %vm787_vm1, %v2217_v31 }
 0xe13 PF: > { %s32_s3 = sadd.s32 1, %s2753_s3  }
 0xe14   : > { %p29_p4 = scmp.ge.s32.totalorder %s32_s3, 4  }
 0xe16   :  { %31 = sbr.rel (!%p29_p4) target bundleno = 8 (0x8), region = 145 }

// kernel: forward.3
= control target key start
LH: loop header
LB: loop body
LE: loop exit
PB: predicated region body
PF: predicated region fallthrough
CT: control target
= control target key end

     0   :  { %s4701_s6 = smov 1   ;;  %s4702_s10 = smov 2   ;;  %s5355_s0 = inlined_call_operand.smem [shape: u32[38], index: -1, kind: input, shape index: {}] }
   0x1   :  { %s4752_s5 = sld [smem:[%s5355_s0]]   ;;  %s4703_s14 = smov 3  }
   0x2   :  { %s4757_s9 = sld [smem:[%s5355_s0 + %s4701_s6]]   ;;  %s4704_s18 = smov 4  }
   0x3   :  { %s4762_s13 = sld [smem:[%s5355_s0 + %s4702_s10]]   ;;  %s4705_s22 = smov 5  }
   0x4   :  { %s4767_s17 = sld [smem:[%s5355_s0 + %s4703_s14]]   ;;  %s4706_s26 = smov 6  }
   0x5   :  { %s4772_s21 = sld [smem:[%s5355_s0 + %s4704_s18]]   ;;  %s4707_s30 = smov 7  }
   0x6   :  { %s4777_s25 = sld [smem:[%s5355_s0 + %s4705_s22]]   ;;  %s4708_s4 = smov 8  }
   0x7   :  { %5379 = sst [smem:[#allocation5_spill]] %s4752_s5  ;;  %s4709_s10 = smov 9  }
   0x8   :  { %5380 = sst [smem:[#allocation6_spill]] %s4757_s9  ;;  %s4710_s15 = smov 10  }
   0x9   :  { %5381 = sst [smem:[#allocation7_spill]] %s4762_s13  ;;  %s4711_s20 = smov 11  }
   0xa   :  { %5382 = sst [smem:[#allocation8_spill]] %s4767_s17  ;;  %s4713_s1 = smov 13  }
   0xb   :  { %s4782_s29 = sld [smem:[%s5355_s0 + %s4706_s26]]   ;;  %s4712_s26 = smov 12  }
   0xc   :  { %s4787_s3 = sld [smem:[%s5355_s0 + %s4707_s30]]   ;;  %s4714_s7 = smov 14  }
   0xd   :  { %s4792_s8 = sld [smem:[%s5355_s0 + %s4708_s4]]   ;;  %s4716_s22 = smov 16  }
   0xe   :  { %s4797_s14 = sld [smem:[%s5355_s0 + %s4709_s10]]   ;;  %s4717_s28 = smov 17  }
   0xf   :  { %s4802_s19 = sld [smem:[%s5355_s0 + %s4710_s15]]   ;;  %s4715_s15 = smov 15  }
  0x10   :  { %s4807_s24 = sld [smem:[%s5355_s0 + %s4711_s20]]  }
  0x11   :  { %s4812_s30 = sld [smem:[%s5355_s0 + %s4712_s26]]  }
  0x12   :  { %5383 = sst [smem:[#allocation9_spill]] %s4787_s3 }
  0x13   :  { %5384 = sst [smem:[#allocation10_spill]] %s4792_s8 }
  0x14   :  { %5385 = sst [smem:[#allocation11_spill]] %s4797_s14 }
  0x15   :  { %5386 = sst [smem:[#allocation12_spill]] %s4802_s19 }
  0x16   :  { %s4817_s6 = sld [smem:[%s5355_s0 + %s4713_s1]]  }
  0x17   :  { %s4822_s12 = sld [smem:[%s5355_s0 + %s4714_s7]]   ;;  %s4718_s7 = smov 18  }
  0x18   :  { %s4827_s20 = sld [smem:[%s5355_s0 + %s4715_s15]]   ;;  %s4719_s15 = smov 19  }
  0x19   :  { %s4832_s27 = sld [smem:[%s5355_s0 + %s4716_s22]]   ;;  %s4720_s22 = smov 20  }
  0x1a   :  { %s4837_s4 = sld [smem:[%s5355_s0 + %s4717_s28]]   ;;  %s4721_s28 = smov 21  }
  0x1b   :  { %s4842_s9 = sld [smem:[%s5355_s0 + %s4718_s7]]   ;;  %s4722_s7 = smov 22  }
  0x1c   :  { %5387 = sst [smem:[#allocation13_spill]] %s4817_s6 }
  0x1d   :  { %5388 = sst [smem:[#allocation14_spill]] %s4822_s12 }
  0x1e   :  { %5389 = sst [smem:[#allocation15_spill]] %s4827_s20 }
  0x1f   :  { %5390 = sst [smem:[#allocation16_spill]] %s4832_s27 }
  0x20   :  { %5391 = sst [smem:[#allocation17_spill]] %s4837_s4 }
  0x21   :  { %5392 = sst [smem:[#allocation18_spill]] %s4842_s9 }
  0x22   :  { %s4847_s20 = sld [smem:[%s5355_s0 + %s4719_s15]]   ;;  %s4723_s15 = smov 23  }
  0x23   :  { %s4852_s27 = sld [smem:[%s5355_s0 + %s4720_s22]]   ;;  %s4724_s22 = smov 24  }
  0x24   :  { %s4857_s4 = sld [smem:[%s5355_s0 + %s4721_s28]]   ;;  %s4725_s28 = smov 25  }
  0x25   :  { %s4862_s9 = sld [smem:[%s5355_s0 + %s4722_s7]]   ;;  %s4726_s7 = smov 26  }
  0x26   :  { %s4867_s13 = sld [smem:[%s5355_s0 + %s4723_s15]]   ;;  %s4727_s15 = smov 27  }
  0x29   :  { %5393 = sst [smem:[#allocation19_spill]] %s4852_s27 }
  0x2a   :  { %5394 = sst [smem:[#allocation20_spill]] %s4857_s4 }
  0x2b   :  { %5395 = sst [smem:[#allocation21_spill]] %s4862_s9 }
  0x2c   :  { %5396 = sst [smem:[#allocation22_spill]] %s4867_s13 }
  0x2d   :  { %s4872_s27 = sld [smem:[%s5355_s0 + %s4724_s22]]   ;;  %s4728_s22 = smov 28  }
  0x2e   :  { %s4877_s4 = sld [smem:[%s5355_s0 + %s4725_s28]]   ;;  %s4729_s28 = smov 29  }
  0x2f   :  { %s4882_s9 = sld [smem:[%s5355_s0 + %s4726_s7]]   ;;  %s4730_s7 = smov 30  }
  0x30   :  { %s4887_s13 = sld [smem:[%s5355_s0 + %s4727_s15]]   ;;  %s4731_s15 = smov 31  }
  0x33   :  { %5397 = sst [smem:[#allocation23_spill]] %s4872_s27 }
  0x34   :  { %5398 = sst [smem:[#allocation24_spill]] %s4877_s4 }
  0x35   :  { %5399 = sst [smem:[#allocation25_spill]] %s4882_s9 }
  0x36   :  { %5400 = sst [smem:[#allocation26_spill]] %s4887_s13 }
  0x37   :  { %s4892_s27 = sld [smem:[%s5355_s0 + %s4728_s22]]   ;;  %s4732_s22 = smov 32  }
  0x38   :  { %s4897_s4 = sld [smem:[%s5355_s0 + %s4729_s28]]   ;;  %s4733_s28 = smov 33  }
  0x39   :  { %s4902_s9 = sld [smem:[%s5355_s0 + %s4730_s7]]   ;;  %s4734_s7 = smov 34  }
  0x3a   :  { %s4907_s13 = sld [smem:[%s5355_s0 + %s4731_s15]]   ;;  %s4735_s15 = smov 35  }
  0x3d   :  { %5401 = sst [smem:[#allocation27_spill]] %s4892_s27 }
  0x3e   :  { %5402 = sst [smem:[#allocation28_spill]] %s4897_s4 }
  0x3f   :  { %5403 = sst [smem:[#allocation29_spill]] %s4902_s9 }
  0x40   :  { %5404 = sst [smem:[#allocation30_spill]] %s4907_s13 }
  0x41   :  { %s4912_s27 = sld [smem:[%s5355_s0 + %s4732_s22]]   ;;  %s4736_s22 = smov 36  }
  0x42   :  { %s4917_s4 = sld [smem:[%s5355_s0 + %s4733_s28]]   ;;  %s4737_s28 = smov 37  }
  0x43   :  { %s4922_s9 = sld [smem:[%s5355_s0 + %s4734_s7]]  }
  0x44   :  { %s4927_s13 = sld [smem:[%s5355_s0 + %s4735_s15]]  }
  0x47   :  { %5405 = sst [smem:[#allocation31_spill]] %s4912_s27 }
  0x48   :  { %5406 = sst [smem:[#allocation32_spill]] %s4917_s4 }
  0x49   :  { %5407 = sst [smem:[#allocation33_spill]] %s4922_s9 }
  0x4a   :  { %s4932_s27 = sld [smem:[%s5355_s0 + %s4736_s22]]  }
  0x4b   :  { %s4937_s4 = sld [smem:[%s5355_s0 + %s4737_s28]]  }
  0x51   :  { %5408 = sst [smem:[#allocation34_spill]] %s4937_s4 }
  0x52   :  { %81 = vsyncpa [#allocation3], 0 }
  0x53   :  { %83 = vsyncpa [#allocation3 + $0x1], 0  ;;  %s4939_s7 = smov 0   ;;  %s4941_s10 = smov 0  }
  0x54   :  { %s4943_s11 = smov 0   ;;  %s4945_s15 = smov 0  }
  0x55 LB: > { %s5409_s19 = sld [smem:[#allocation12_spill]]  ;;  %s5410_s17 = sld [smem:[#allocation8_spill]]  ;;  %s4691_s10 = sphi %s4941_s10, %s5445_s10   ;;  %s4687_s7 = sphi %s4939_s7, %s5444_s7   ;;  %s4699_s15 = sphi %s4945_s15, %s5447_s15   ;;  %s4695_s11 = sphi %s4943_s11, %s5446_s11  }
  0x56   : > { %s5411_s14 = sld [smem:[#allocation11_spill]]  ;;  %s5412_s8 = sld [smem:[#allocation10_spill]] }
  0x57   : > { %s5413_s6 = sld [smem:[#allocation13_spill]]  ;;  %s5414_s3 = sld [smem:[#allocation9_spill]] }
  0x58   : > { %s4960_s0 = sadd.s32 4294967295, %s4699_s15   ;;  %s3877_s16 = sadd.s32 4294967294, %s4699_s15  }
  0x59   : > { %s4964_s18 = sadd.s32 1, %s4699_s15   ;;  %s846_s22 = sadd.s32 1, %s4695_s11 }
  0x5a   : > { %s843_s23 = ssub.s32 %s4699_s15, %s4964_s18  ;;  %p856_p0 = scmp.ne.s32.totalorder %s4695_s11, %s4691_s10 }
  0x5b   : > { %p844_p1 = scmp.eq.s32.totalorder %s843_s23, 0  ;;  %p857_p2 = scmp.eq.s32.totalorder %s4960_s0, 1 }
  0x5c   : > { %p862_p3 = scmp.ne.s32.totalorder %s4691_s10, %s4687_s7  ;;  %p863_p4 = scmp.eq.s32.totalorder %s3877_s16, 1 }
  0x5d   : > { %s4975_s26 = scalar_select %p844_p1, %s4695_s11, %s846_s22  }
  0x5e   : > { %p4977_p5 = por %p857_p2, %p856_p0  ;;  %p4981_p6 = por %p863_p4, %p862_p3 }
  0x5f   : > { %p3880_p7 = scmp.ge.s32.totalorder %s4699_s15, 1  ;;  %p1051_p8 = scmp.lt.s32.totalorder %s4699_s15, 3 }
  0x61   : > { %p1052_p9 = pnand %p3880_p7, %p1051_p8 }
  0x62   : > { %p1157_p10 = scmp.lt.s32.totalorder (!%p1052_p9), %s4960_s0, 1  ;;  %v1185_v0 = vld [vmem:[%s5410_s17] sm:$0xff] (!%p1052_p9)  ;;  %v1186_v1 = vld [vmem:[%s5410_s17 + $0x8] sm:$0xff] (!%p1052_p9)  ;;  %v1187_v2 = vld [vmem:[%s5410_s17 + $0x10] sm:$0xff] (!%p1052_p9)  ;;  %s5417_s5 = sld [smem:[#allocation5_spill]] (!%p1052_p9)  ;;  %v4738_v3 = vmov (!%p1052_p9), 0   ;;  %v1177_v16 = vlaneseq (!%p1052_p9) }
  0x63   : > { %1055 = sbr.rel (%p1052_p9) target bundleno = 6584 (0x19b8), region = 160  ;;  %4605 = vset.pattern.permute.xlu0 (!%p1052_p9), %v4738_v3  ;;  %v4739_v4 = vmov (!%p1052_p9), 0.0|0.0   ;;  %v4383_v5 = vpack.c.bf16 (!%p1052_p9), %v1186_v1, %v1185_v0  ;;  %v1188_v6 = vld [vmem:[%s5410_s17 + $0x18] sm:$0xff] (!%p1052_p9)  ;;  %4606 = vset.pattern.permute.xlu1 (!%p1052_p9), %v4738_v3  ;;  %v1189_v8 = vld [vmem:[%s5410_s17 + $0x20] sm:$0xff] (!%p1052_p9)  ;;  %v1190_v9 = vld [vmem:[%s5410_s17 + $0x28] sm:$0xff] (!%p1052_p9)  ;;  %vm4740_vm0 = vmmov (!%p1052_p9), 0  }
  0x64   : > { %4382 = vmatprep.subr.bf16.mxu0 (!%p1052_p9), %v4739_v4  ;;  %4394 = vmatprep.subr.bf16.mxu1 (!%p1052_p9), %v4739_v4  ;;  %v4386_v7 = vpack.c.bf16 (!%p1052_p9), %v1188_v6, %v1187_v2  ;;  %v4389_v11 = vpack.c.bf16 (!%p1052_p9), %v1190_v9, %v1189_v8  ;;  %v1191_v12 = vld [vmem:[%s5410_s17 + $0x30] sm:$0xff] (!%p1052_p9)  ;;  %v1192_v13 = vld [vmem:[%s5410_s17 + $0x38] sm:$0xff] (!%p1052_p9)  ;;  %v4741_v14 = vmov (!%p1052_p9), 0.0   ;;  %v5014_v17 = vand.u32 (!%p1052_p9), 127, %v1177_v16  ;;  %v1193_v20 = vld [vmem:[%s4772_s21] sm:$0xff] (!%p1052_p9)  ;;  %s5418_s12 = sld [smem:[#allocation14_spill]] (!%p1052_p9) }
  0x65   : > { %4384 = vmatpush3.bf16.msra.mxu0 (!%p1052_p9), %v4383_v5  ;;  %4130 = vmatprep.mubr.msk.f32.mxu0 (!%p1052_p9), %vm4740_vm0, %v4741_v14  ;;  %v4392_v15 = vpack.c.bf16 (!%p1052_p9), %v1192_v13, %v1191_v12  ;;  %vm1194_vm1 = vcmask (!%p1052_p9), 523264   ;;  %vm1276_vm3 = vcmask (!%p1052_p9), 261120   ;;  %v1305_v30 = vld [vmem:[%s5414_s3] sm:$0xff] (!%p1052_p9)  ;;  %v1306_v31 = vld [vmem:[%s5414_s3 + $0x8] sm:$0xff] (!%p1052_p9)  ;;  %v1307_v36 = vld [vmem:[%s5414_s3 + $0x10] sm:$0xff] (!%p1052_p9)  ;;  %vm1551_vm4 = vcmask (!%p1052_p9), 130048  }
  0x66   : > { %4385 = vmatprep.subr.bf16.mxu0 (!%p1052_p9), %v4739_v4  ;;  %4141 = vmatprep.mubr.msk.f32.mxu1 (!%p1052_p9), %vm4740_vm0, %v4741_v14  ;;  %v1470_v32 = vld [vmem:[%s4807_s24] sm:$0xff] (!%p1052_p9)  ;;  %v4395_v33 = vpack.c.bf16 (!%p1052_p9), %v1306_v31, %v1305_v30  ;;  %v1471_v34 = vld [vmem:[%s4807_s24 + $0x8] sm:$0xff] (!%p1052_p9)  ;;  %v1308_v37 = vld [vmem:[%s5414_s3 + $0x18] sm:$0xff] (!%p1052_p9)  ;;  %vm1630_vm6 = vcmask (!%p1052_p9), 64512   ;;  %s5419_s23 = sld [smem:[#allocation7_spill]] (!%p1052_p9)  ;;  %s5442_s9 = sld [smem:[#allocation33_spill]] (!%p1052_p9) }
  0x67   : > { %v4407_v35 = vpack.c.bf16 (!%p1052_p9), %v1471_v34, %v1470_v32  ;;  %v1472_v38 = vld [vmem:[%s4807_s24 + $0x10] sm:$0xff] (!%p1052_p9)  ;;  %v4398_v39 = vpack.c.bf16 (!%p1052_p9), %v1308_v37, %v1307_v36  ;;  %v1473_v40 = vld [vmem:[%s4807_s24 + $0x18] sm:$0xff] (!%p1052_p9)  ;;  %v3888_v46 = vld [vmem:[%s4777_s25] ss:$0 sm:$0xff] (!%p1052_p9)  ;;  %s5443_s4 = sld [smem:[#allocation34_spill]] (!%p1052_p9)  ;;  %vm3675_vm10 = vcmask (!%p1052_p9), 7168  }
  0x68   : > { %4396 = vmatpush3.bf16.msra.mxu1 (!%p1052_p9), %v4395_v33  ;;  %v4410_v41 = vpack.c.bf16 (!%p1052_p9), %v1473_v40, %v1472_v38  ;;  %v1389_v47 = vld [vmem:[%s5411_s14] sm:$0xff] (!%p1052_p9)  ;;  %v1390_v49 = vld [vmem:[%s5411_s14 + $0x8] sm:$0xff] (!%p1052_p9)  ;;  %v1391_v56 = vld [vmem:[%s5411_s14 + $0x10] sm:$0xff] (!%p1052_p9)  ;;  %vm3683_vm11 = vcmask (!%p1052_p9), 0   ;;  %s4743_s17 = smov (!%p1052_p9), [#allocation2]  }
  0x69   : > { %4387 = vmatpush3.bf16.msra.mxu0 (!%p1052_p9), %v4386_v7  ;;  %4397 = vmatprep.subr.bf16.mxu1 (!%p1052_p9), %v4739_v4  ;;  %v3899_v50 = vld [vmem:[%s5414_s3 + $0x20] sm:$0xff] (!%p1052_p9)  ;;  %v3900_v51 = vld [vmem:[%s5414_s3 + $0x28] sm:$0xff] (!%p1052_p9)  ;;  %v4401_v54 = vpack.c.bf16 (!%p1052_p9), %v1390_v49, %v1389_v47  ;;  %v1392_v58 = vld [vmem:[%s5411_s14 + $0x18] sm:$0xff] (!%p1052_p9) }
  0x6a   : > { %s4994_s2 = scalar_select %p1157_p10, %s4960_s0, 1  ;;  %4388 = vmatprep.subr.bf16.mxu0 %v4739_v4  ;;  %v3889_v52 = vld [vmem:[%s4782_s29] ss:$0 sm:$0xff]  ;;  %v4413_v55 = vpack.c.bf16 %v3900_v51, %v3899_v50  ;;  %v3901_v59 = vld [vmem:[%s5414_s3 + $0x30] sm:$0xff]  ;;  %v3902_v60 = vld [vmem:[%s5414_s3 + $0x38] sm:$0xff]  ;;  %v4404_v61 = vpack.c.bf16 %v1392_v58, %v1391_v56 }
  0x6b   : > { %v4416_v62 = vpack.c.bf16 %v3902_v60, %v3901_v59  ;;  %v3913_v63 = vld [vmem:[%s4807_s24 + $0x20] sm:$0xff]  ;;  %v3914_v0 = vld [vmem:[%s4807_s24 + $0x28] sm:$0xff]  ;;  %v3915_v2 = vld [vmem:[%s4807_s24 + $0x30] sm:$0xff] }
  0x6c   : > { %s5365_s16 = sshll.u32 %s4994_s2, 3  ;;  %4399 = vmatpush3.bf16.msra.mxu1 %v4398_v39  ;;  %v4425_v1 = vpack.c.bf16 %v3914_v0, %v3913_v63  ;;  %v3916_v3 = vld [vmem:[%s4807_s24 + $0x38] sm:$0xff]  ;;  %v3890_v13 = vld [vmem:[%s5412_s8] ss:$0 sm:$0xff]  ;;  %v3907_v40 = vld [vmem:[%s5411_s14 + $0x28] sm:$0xff] }
  0x6d   : > { %s1160_s22 = scalar_lea.vmem %s5417_s5, %s5365_s16  ;;  %4390 = vmatpush3.bf16.msra.mxu0 %v4389_v11  ;;  %4400 = vmatprep.subr.bf16.mxu1 %v4739_v4  ;;  %v4428_v5 = vpack.c.bf16 %v3916_v3, %v3915_v2  ;;  %v3906_v39 = vld [vmem:[%s5411_s14 + $0x20] sm:$0xff]  ;;  %v3923_v3 = vld [vmem:[%s5413_s6 + $0x10] sm:$0xff]  ;;  %s3989_s16 = sshll.u32 %s4994_s2, 4  ;;  %vm5169_vm7 = vmpackc.low %vm1551_vm4, %vm1551_vm4 }
  0x6e   : > { %v1176_v10 = vld [vmem:[%s1160_s22] sm:$0xff]  ;;  %4391 = vmatprep.subr.bf16.mxu0 %v4739_v4  ;;  %s5420_s22 = sld [smem:[#allocation17_spill]]  ;;  %s1169_s3 = scalar_lea.vmem %s5419_s23, %s3989_s16 }
  0x6f   : > { %1180 = vperm.xlu0 %4605, %v1176_v10   ;;  %v3892_v10 = vld [vmem:[%s5409_s19] ss:$0 sm:$0xff]  ;;  %v3911_v49 = vld [vmem:[%s5409_s19 + $0x1] ss:$0 sm:$0xff]  ;;  %s5421_s5 = sld [smem:[#allocation15_spill]]  ;;  %s5424_s16 = sld [smem:[#allocation18_spill]] }
  0x70   : > { %v3904_v51 = vld [vmem:[%s5412_s8 + $0x1] ss:$0 sm:$0xff]  ;;  %s5429_s23 = sld [smem:[#allocation22_spill]]  ;;  %s5434_s8 = sld [smem:[#allocation28_spill]] }
  0x71   : > { %4393 = vmatpush3.bf16.msra.mxu0 %v4392_v15  ;;  %s4641_s19 = sshll.u32 %s4743_s17, 4  ;;  %s4642_s19 = int_to_ptr.vmem [resolvable:$false] %s4641_s19 }
  0x72   : > { %4406 = vmatprep.subr.bf16.mxu0 %v4739_v4 }
  0xee   : > { %v1181_v18 = vpop.permute.xlu0 %1180 }
  0xef   : > { %vm1182_vm2 = vcmp.eq.s32.totalorder %v5014_v17, %v1181_v18 }
  0xf0   : > { %v3886_v19 = vsel %vm1182_vm2, 1.0, %v4741_v14 }
  0xf1   : > { %4131 = vmatmul.mubr.msk.f32.vlgmr.msra.gmra.mrb[0].mxu0 %vm1194_vm1, %v3886_v19 }
  0xf2   : > { %4163 = vmatprep.mubr.msk.f32.mxu0 %vm4740_vm0, %v4741_v14  ;;  %4408 = vmatpush3.bf16.msra.mxu0 %v4407_v35 }
  0xf3   : > { %4409 = vmatprep.subr.bf16.mxu0 %v4739_v4 }
  0xf6   : > { %4411 = vmatpush3.bf16.msra.mxu0 %v4410_v41 }
  0xf7   : > { %4412 = vmatprep.subr.bf16.mxu0 %v4739_v4 }
 0x1c4   : > { %v1264_v21 = vpop.f32.mrb[0].mxu0 }
 0x1c5   : > { %v5022_v22 = vadd.f32 %v1264_v21, %v1193_v20  ;;  %v4132_v23 = vpop.f32.mrb[1].mxu0  ;;  %v3894_v20 = vld [vmem:[%s4812_s30] ss:$0 sm:$0xff] }
 0x1c7   : > { %v1277_v24 = vsel %vm1276_vm3, %v5022_v22, 0.0 }
 0x1c8   : > { %1278 = vadd.xlane.f32.xlu0 %v1277_v24 }
 0x255   : > { %v1279_v25 = vpop.xlane.xlu0 %1278 }
 0x256   : > { %v1281_v26 = vmul.f32 0.03125, %v1279_v25 }
 0x258   : > { %v1282_v27 = vsub.f32 %v5022_v22, %v1281_v26  ;;  %v1271_v26 = vshrl.u32 %v1177_v16, 7 }
 0x25a   : > { %v1283_v28 = vmul.f32 %v1282_v27, %v1282_v27  ;;  %vm1272_vm5 = vcmp.ge.s32.totalorder %v1271_v26, %v5014_v17 }
 0x25c   : > { %v1284_v29 = vsel %vm1276_vm3, %v1283_v28, 0.0  ;;  %v4742_v28 = vmov -1e+09  }
 0x25d   : > { %1285 = vadd.xlane.f32.xlu1 %v1284_v29  ;;  %v1273_v29 = vsel %vm1272_vm5, 0.0, %v4742_v28 }
 0x2ea   : > { %v1286_v42 = vpop.xlane.xlu1 %1285 }
 0x2eb   : > { %v1287_v43 = vmul.f32 0.03125, %v1286_v42  ;;  %v4419_v42 = vpack.c.bf16 %v3907_v40, %v3906_v39  ;;  %v2315_v39 = vld [vmem:[%s5420_s22] sm:$0xff]  ;;  %v2316_v40 = vld [vmem:[%s5420_s22 + $0x8] sm:$0xff] }
 0x2ed   : > { %v1288_v44 = vadd.f32 1e-05, %v1287_v43 }
 0x2ef   : > { %4607 = vrsqrt.f32 %v1288_v44  ;;  %v3908_v44 = vld [vmem:[%s5411_s14 + $0x30] sm:$0xff] }
 0x2f9   : > { %v4608_v45 = vpop.eup %4607 }
 0x2fa   : > { %v1290_v48 = vmul.f32 %v4608_v45, %v1282_v27  ;;  %v3909_v45 = vld [vmem:[%s5411_s14 + $0x38] sm:$0xff] }
 0x2fc   : > { %v1297_v53 = vmul.f32 %v3888_v46, %v1290_v48  ;;  %v4422_v46 = vpack.c.bf16 %v3909_v45, %v3908_v44 }
 0x2fe   : > { %v5047_v57 = vadd.f32 %v3889_v52, %v1297_v53 }
 0x300   : > { %4142 = vmatmul.mubr.msk.f32.vlgmr.msra.gmra.mrb[0].mxu1 %vm1276_vm3, %v5047_v57  ;;  %4164 = vmatmul.mubr.msk.f32.vlgmr.msra.gmra.mrb[2].mxu0 %vm1276_vm3, %v5047_v57 }
 0x301   : > { %4402 = vmatpush3.bf16.msra.mxu1 %v4401_v54  ;;  %4414 = vmatpush3.bf16.msra.mxu0 %v4413_v55  ;;  %v3918_v54 = vld [vmem:[%s4812_s30 + $0x1] ss:$0 sm:$0xff] }
 0x302   : > { %4403 = vmatprep.subr.bf16.mxu1 %v4739_v4  ;;  %4415 = vmatprep.subr.bf16.mxu0 %v4739_v4 }
 0x303   : > { %4152 = vmatprep.mubr.msk.f32.mxu1 %vm4740_vm0, %v4741_v14  ;;  %4184 = vmatprep.mubr.msk.f32.mxu0 %vm4740_vm0, %v4741_v14 }
 0x305   : > { %4405 = vmatpush3.bf16.msra.mxu1 %v4404_v61  ;;  %4417 = vmatpush3.bf16.msra.mxu0 %v4416_v62 }
 0x306   : > { %4424 = vmatprep.subr.bf16.mxu0 %v4739_v4  ;;  %4166 = vmatprep.subr.mxu1 %v4741_v14 }
 0x308   : > { %4153 = vmatmul.mubr.msk.f32.vlgmr.msra.gmra.mrb[2].mxu1 %vm1276_vm3, %v5047_v57  ;;  %4185 = vmatmul.mubr.msk.f32.vlgmr.msra.gmra.mrb[4].mxu0 %vm1276_vm3, %v5047_v57 }
 0x309   : > { %4426 = vmatpush3.bf16.msra.mxu0 %v4425_v1  ;;  %4206 = vmatprep.mubr.msk.f32.mxu0 %vm4740_vm0, %v4741_v14 }
 0x30a   : > { %4427 = vmatprep.subr.bf16.mxu0 %v4739_v4  ;;  %4168 = vmatprep.mubr.msk.f32.mxu1 %vm4740_vm0, %v4741_v14 }
 0x30d   : > { %4429 = vmatpush3.bf16.msra.mxu0 %v4428_v5  ;;  %v3924_v5 = vld [vmem:[%s5413_s6 + $0x18] sm:$0xff] }
 0x30e   : > { %4430 = vmatprep.subr.bf16.mxu0 %v4739_v4 }
 0x310   : > { %4207 = vmatmul.mubr.msk.f32.vlgmr.msra.gmra.mrb[6].mxu0 %vm1276_vm3, %v5047_v57 }
 0x311   : > { %4223 = vmatprep.mubr.msk.f32.mxu0 %vm4740_vm0, %v4741_v14 }
 0x3d3   : > { %v1385_v6 = vpop.f32.mrb[0].mxu1  ;;  %v1547_v7 = vpop.f32.mrb[2].mxu0 }
 0x3d4   : > { %v4143_v8 = vpop.f32.mrb[1].mxu1  ;;  %v4165_v9 = vpop.f32.mrb[3].mxu0  ;;  %v1386_v21 = vadd.f32 %v3890_v13, %v1385_v6  ;;  %v1548_v23 = vadd.f32 %v3894_v20, %v1547_v7  ;;  %v4431_v6 = vpack.c.bf16 %v3924_v5, %v3923_v3  ;;  %v3944_v5 = vld [vmem:[%s5420_s22 + $0x30] sm:$0xff] }
 0x3d5   : > { %v1715_v8 = vld [vmem:[%s5413_s6] sm:$0xff]  ;;  %v1716_v9 = vld [vmem:[%s5413_s6 + $0x8] sm:$0xff]  ;;  %s5422_s6 = sld [smem:[#allocation16_spill]] }
 0x3d6   : > { %4432 = vmatpush3.bf16.msra.mxu0 %v4431_v6  ;;  %v3945_v6 = vld [vmem:[%s5420_s22 + $0x38] sm:$0xff] }
 0x3d7   : > { %4436 = vmatprep.subr.bf16.mxu0 %v4739_v4 }
 0x3db   : > { %v1466_v11 = vpop.f32.mrb[2].mxu1  ;;  %v1796_v12 = vpop.f32.mrb[4].mxu0 }
 0x3dc   : > { %v1467_v15 = vadd.f32 %v3892_v10, %v1466_v11  ;;  %v4154_v18 = vpop.f32.mrb[3].mxu1  ;;  %v4186_v19 = vpop.f32.mrb[5].mxu0  ;;  %v1797_v55 = vadd.f32 %v3904_v51, %v1796_v12  ;;  %v4434_v11 = vpack.c.bf16 %v1716_v9, %v1715_v8  ;;  %v3929_v51 = vld [vmem:[%s5422_s6] ss:$0 sm:$0xff]  ;;  %s5428_s6 = sld [smem:[#allocation21_spill]] }
 0x3de   : > { %4167 = vmatpush3.xpose.msk.msra.mxu1 %vm1551_vm4, %v1467_v15 }
 0x3df   : > { %4171 = vmatprep.subr.mxu1 %v4741_v14 }
 0x3e1   : > { %4169 = vmatmul.mubr.msk.f32.vlgmr.msra.gmra.mrb[4].mxu1 %vm1551_vm4, %v1386_v21  ;;  %v3927_v21 = vld [vmem:[%s5418_s12] ss:$0 sm:$0xff]  ;;  %s5441_s12 = sshll.u32 %s4994_s2, 3 }
 0x3e2   : > { %4172 = vmatpush3.msra.mxu1 %v1548_v23  ;;  %4173 = vmatprep.mubr.msk.f32.mxu1 %vm4740_vm0, %v4741_v14 }
 0x3e3   : > { %v1962_v24 = vpop.f32.mrb[6].mxu0  ;;  %4418 = vmatprep.subr.bf16.mxu1 %v4739_v4 }
 0x3e4   : > { %v4208_v25 = vpop.f32.mrb[7].mxu0  ;;  %v1963_v56 = vadd.f32 %v3918_v54, %v1962_v24 }
 0x4b4   : > { %v1624_v27 = vpop.f32.mrb[4].mxu1 }
 0x4b5   : > { %v1628_v30 = vmul.f32 0.25, %v1624_v27  ;;  %v4170_v31 = vpop.f32.mrb[5].mxu1 }
 0x4b7   : > { %v1629_v32 = vadd.f32 %v1628_v30, %v1273_v29 }
 0x4b9   : > { %v1631_v33 = vsel %vm1630_vm6, %v1629_v32, -inf }
 0x4ba   : > { %1632 = vmax.xlane.f32.xlu1 %v1631_v33  ;;  %v2399_v33 = vld [vmem:[%s4847_s20] sm:$0xff] }
 0x547   : > { %v1633_v34 = vpop.xlane.xlu1 %1632 }
 0x548   : > { %v1634_v35 = vsub.f32 %v1629_v32, %v1633_v34  ;;  %v2400_v34 = vld [vmem:[%s4847_s20 + $0x8] sm:$0xff] }
 0x54a   : > { %v1635_v36 = vmul.f32 1.442695, %v1634_v35  ;;  %v4442_v35 = vpack.c.bf16 %v2400_v34, %v2399_v33 }
 0x54c   : > { %4609 = vpow2.f32 %v1635_v36  ;;  %v2402_v36 = vld [vmem:[%s4847_s20 + $0x18] sm:$0xff] }
 0x556   : > { %v4610_v16 = vpop.eup %4609 }
 0x557   : > { %v1637_v37 = vsel %vm1630_vm6, %v4610_v16, 0.0 }
 0x558   : > { %1638 = vadd.xlane.f32.xlu1 %v1637_v37  ;;  %v5145_v37 = vld [vmem:[%s1169_s3] sm:$0xff] }
 0x5e5   : > { %v1639_v38 = vpop.xlane.xlu1 %1638 }
 0x5e6   : > { %4611 = vrcp.f32 %v1639_v38  ;;  %v5148_v38 = vld [vmem:[%s1169_s3 + $0x8] sm:$0xff]  ;;  %s5423_s3 = sld [smem:[#allocation19_spill]] }
 0x5ec   : > { %v3932_v54 = vld [vmem:[%s5423_s3] ss:$0 sm:$0xff] }
 0x5f0   : > { %v4612_v41 = vpop.eup %4611 }
 0x5f1   : > { %v1641_v43 = vmul.f32 %v4612_v41, %v4610_v16  ;;  %v4437_v41 = vpack.c.bf16 %v2316_v40, %v2315_v39  ;;  %v3951_v40 = vld [vmem:[%s4847_s20 + $0x30] sm:$0xff] }
 0x5f3   : > { %4174 = vmatmul.mubr.msk.f32.vlgmr.msra.gmra.mrb[6].mxu1 %vm1630_vm6, %v1641_v43  ;;  %v2318_v43 = vld [vmem:[%s5420_s22 + $0x18] sm:$0xff] }
 0x5f4   : > { %4420 = vmatpush3.bf16.msra.mxu1 %v4419_v42  ;;  %4195 = vmatprep.mubr.msk.f32.mxu1 %vm4740_vm0, %v4741_v14  ;;  %v2317_v42 = vld [vmem:[%s5420_s22 + $0x10] sm:$0xff] }
 0x5f5   : > { %4421 = vmatprep.subr.bf16.mxu1 %v4739_v4  ;;  %v4440_v44 = vpack.c.bf16 %v2318_v43, %v2317_v42 }
 0x5f8   : > { %4423 = vmatpush3.bf16.msra.mxu1 %v4422_v46 }
 0x5f9   : > { %4209 = vmatprep.subr.mxu1 %v4741_v14 }
 0x5fb   : > { %4196 = vmatmul.mubr.msk.f32.vlgmr.msra.gmra.mrb[8].mxu1 %vm1276_vm3, %v5047_v57 }
 0x5fc   : > { %4211 = vmatprep.mubr.msk.f32.mxu1 %vm4740_vm0, %v4741_v14 }
 0x6c6   : > { %v1711_v47 = vpop.f32.mrb[6].mxu1 }
 0x6c7   : > { %v4175_v48 = vpop.f32.mrb[7].mxu1 }
 0x6ce   : > { %v1879_v50 = vpop.f32.mrb[8].mxu1 }
 0x6cf   : > { %v1880_v52 = vadd.f32 %v3911_v49, %v1879_v50  ;;  %v4197_v53 = vpop.f32.mrb[9].mxu1  ;;  %v3928_v49 = vld [vmem:[%s5421_s5] ss:$0 sm:$0xff]  ;;  %s5427_s5 = sld [smem:[#allocation20_spill]] }
 0x6d1   : > { %4210 = vmatpush3.xpose.msk.msra.mxu1 %vm1551_vm4, %v1880_v52 }
 0x6d2   : > { %4214 = vmatprep.subr.mxu1 %v4741_v14 }
 0x6d4   : > { %4212 = vmatmul.mubr.msk.f32.vlgmr.msra.gmra.mrb[10].mxu1 %vm1551_vm4, %v1797_v55 }
 0x6d5   : > { %4215 = vmatpush3.msra.mxu1 %v1963_v56  ;;  %4216 = vmatprep.mubr.msk.f32.mxu1 %vm4740_vm0, %v4741_v14  ;;  %v2491_v8 = vld [vmem:[%s5427_s5] sm:$0xff]  ;;  %v2492_v9 = vld [vmem:[%s5427_s5 + $0x8] sm:$0xff] }
 0x6d6   : > { %4433 = vmatprep.subr.bf16.mxu1 %v4739_v4 }
 0x7a7   : > { %v2038_v57 = vpop.f32.mrb[10].mxu1 }
 0x7a8   : > { %v2042_v58 = vmul.f32 0.25, %v2038_v57  ;;  %v4213_v59 = vpop.f32.mrb[11].mxu1 }
 0x7aa   : > { %v2043_v60 = vadd.f32 %v2042_v58, %v1273_v29 }
 0x7ac   : > { %v2044_v61 = vsel %vm1630_vm6, %v2043_v60, -inf }
 0x7ad   : > { %2045 = vmax.xlane.f32.xlu1 %v2044_v61  ;;  %v3942_v61 = vld [vmem:[%s5420_s22 + $0x20] sm:$0xff] }
 0x83a   : > { %v2046_v62 = vpop.xlane.xlu1 %2045 }
 0x83b   : > { %v2047_v63 = vsub.f32 %v2043_v60, %v2046_v62  ;;  %v3943_v62 = vld [vmem:[%s5420_s22 + $0x28] sm:$0xff] }
 0x83d   : > { %v2048_v0 = vmul.f32 1.442695, %v2047_v63  ;;  %v3930_v63 = vld [vmem:[%s5424_s16] ss:$0 sm:$0xff] }
 0x83f   : > { %4613 = vpow2.f32 %v2048_v0 }
 0x849   : > { %v4614_v1 = vpop.eup %4613 }
 0x84a   : > { %v2050_v2 = vsel %vm1630_vm6, %v4614_v1, 0.0 }
 0x84b   : > { %2051 = vadd.xlane.f32.xlu1 %v2050_v2 }
 0x8d8   : > { %v2052_v7 = vpop.xlane.xlu1 %2051 }
 0x8d9   : > { %4615 = vrcp.f32 %v2052_v7  ;;  %v4469_v7 = vpack.c.bf16 %v3945_v6, %v3944_v5  ;;  %v3962_v6 = vld [vmem:[%s5428_s6 + $0x1] ss:$0 sm:$0xff] }
 0x8e3   : > { %v4616_v10 = vpop.eup %4615 }
 0x8e4   : > { %v2054_v12 = vmul.f32 %v4616_v10, %v4614_v1  ;;  %v4466_v1 = vpack.c.bf16 %v3943_v62, %v3942_v61  ;;  %v2493_v10 = vld [vmem:[%s5427_s5 + $0x10] sm:$0xff] }
 0x8e6   : > { %4217 = vmatmul.mubr.msk.f32.vlgmr.msra.gmra.mrb[12].mxu1 %vm1630_vm6, %v2054_v12  ;;  %v2494_v12 = vld [vmem:[%s5427_s5 + $0x18] sm:$0xff] }
 0x8e7   : > { %4435 = vmatpush3.bf16.msra.mxu1 %v4434_v11  ;;  %4230 = vmatprep.mubr.msk.f32.mxu1 %vm4740_vm0, %v4741_v14  ;;  %v4450_v11 = vpack.c.bf16 %v2492_v9, %v2491_v8 }
 0x8e8   : > { %4443 = vmatprep.subr.bf16.mxu1 %v4442_v35 }
 0x8ea   : > { %4231 = vmatmul.mubr.msk.f32.vlgmr.msra.gmra.mrb[14].mxu1 %vm1551_vm4, %v1711_v47 }
 0x8eb   : > { %4445 = vmatpush3.bf16.msra.mxu1 %v4442_v35  ;;  %4252 = vmatprep.mubr.msk.f32.mxu1 %vm1276_vm3, %v5145_v37 }
 0x9b9   : > { %v2124_v13 = vpop.f32.mrb[12].mxu1 }
 0x9ba   : > { %v4218_v15 = vpop.f32.mrb[13].mxu1  ;;  %4224 = vmatmul.mubr.msk.f32.vlgmr.msra.gmra.mrb[8].mxu0 %vm1551_vm4, %v2124_v13  ;;  %v4454_v13 = vpack.c.bf16 %v2494_v12, %v2493_v10  ;;  %v3970_v12 = vld [vmem:[%s5429_s23 + $0x18] sm:$0xff] }
 0x9bb   : > { %4241 = vmatprep.mubr.msk.f32.mxu0 %vm4740_vm0, %v4741_v14  ;;  %4438 = vmatpush3.bf16.msra.mxu0 %v4437_v41  ;;  %v3952_v41 = vld [vmem:[%s4847_s20 + $0x38] sm:$0xff] }
 0x9bc   : > { %4439 = vmatprep.subr.bf16.mxu0 %v4739_v4 }
 0x9bd   : > { %v2273_v18 = vpop.f32.mrb[14].mxu1 }
 0x9be   : > { %v4232_v19 = vpop.f32.mrb[15].mxu1 }
 0x9bf   : > { %4441 = vmatpush3.bf16.msra.mxu0 %v4440_v44  ;;  %v4475_v44 = vpack.c.bf16 %v3952_v41, %v3951_v40 }
 0x9c0   : > { %4451 = vmatprep.subr.bf16.mxu0 %v4450_v11 }
 0xa8d   : > { %v2200_v20 = vpop.f32.mrb[8].mxu0 }
 0xa8e   : > { %v2274_v23 = vadd.f32 %v2273_v18, %v2200_v20  ;;  %v4225_v24 = vpop.f32.mrb[9].mxu0 }
 0xa90   : > { %v2284_v25 = vadd.f32 %v3927_v21, %v2274_v23 }
 0xa92   : > { %v5133_v26 = vadd.f32 %v2284_v25, %v5022_v22  ;;  %v2401_v22 = vld [vmem:[%s4847_s20 + $0x10] sm:$0xff] }
 0xa93   : > { %v4446_v16 = vpack.c.bf16 %v2402_v36, %v2401_v22  ;;  %v3949_v22 = vld [vmem:[%s4847_s20 + $0x20] sm:$0xff]  ;;  %v3950_v36 = vld [vmem:[%s4847_s20 + $0x28] sm:$0xff] }
 0xa94   : > { %v2288_v27 = vsel %vm1276_vm3, %v5133_v26, 0.0 }
 0xa95   : > { %2289 = vadd.xlane.f32.xlu1 %v2288_v27  ;;  %4447 = vmatprep.subr.bf16.mxu1 %v4446_v16 }
 0xa96   : > { %4449 = vmatpush3.bf16.msra.mxu1 %v4446_v16  ;;  %v4471_v16 = vpack.c.bf16 %v3950_v36, %v3949_v22 }
 0xa97   : > { %4458 = vmatprep.subr.bf16.mxu1 %v4739_v4 }
 0xa99   : > { %4253 = vmatmul.mubr.msk.f32.vlgmr.msra.gmra.mrb[16].mxu1 %vm1276_vm3, %v5148_v38 }
 0xa9a   : > { %4270 = vmatprep.mubr.msk.f32.mxu1 %vm4740_vm0, %v4741_v14 }
 0xb22   : > { %v2290_v28 = vpop.xlane.xlu1 %2289 }
 0xb23   : > { %v2291_v29 = vmul.f32 0.03125, %v2290_v28 }
 0xb25   : > { %v2292_v30 = vsub.f32 %v5133_v26, %v2291_v29 }
 0xb27   : > { %v2293_v31 = vmul.f32 %v2292_v30, %v2292_v30 }
 0xb29   : > { %v2294_v32 = vsel %vm1276_vm3, %v2293_v31, 0.0  ;;  %v3935_v31 = vld [vmem:[%s5428_s6] ss:$0 sm:$0xff]  ;;  %s5433_s6 = sld [smem:[#allocation25_spill]] }
 0xb2a   : > { %2295 = vadd.xlane.f32.xlu1 %v2294_v32 }
 0xb6c   : > { %v4254_v55 = vpop.f32.mrb[16].mxu1 }
 0xb6d   : > { %v2488_v56 = vadd.f32 %v4254_v55, %v3932_v54  ;;  %v2482_v57 = vpop.f32.mrb[17].mxu1  ;;  %v3958_v55 = vld [vmem:[%s5427_s5 + $0x28] sm:$0xff] }
 0xb6e   : > { %v2483_v58 = vadd.f32 %v3932_v54, %v2482_v57  ;;  %v3957_v54 = vld [vmem:[%s5427_s5 + $0x20] sm:$0xff] }
 0xb6f   : > { %v4479_v57 = vpack.c.bf16 %v3958_v55, %v3957_v54  ;;  %v3446_v54 = vld [vmem:[%s5434_s8] sm:$0xff]  ;;  %v3447_v55 = vld [vmem:[%s5434_s8 + $0x8] sm:$0xff] }
 0xb70   : > { %v4459_v60 = vpack.c.bf16 %v2488_v56, %v2483_v58  ;;  %v3959_v56 = vld [vmem:[%s5427_s5 + $0x30] sm:$0xff]  ;;  %v3960_v58 = vld [vmem:[%s5427_s5 + $0x38] sm:$0xff]  ;;  %s5431_s5 = sld [smem:[#allocation26_spill]] }
 0xb72   : > { %4461 = vmatpush3.bf16.xpose.msk.msra.mxu1 %vm5169_vm7, %v4459_v60  ;;  %v4483_v60 = vpack.c.bf16 %v3960_v58, %v3959_v56  ;;  %v4507_v56 = vpack.c.bf16 %v3447_v55, %v3446_v54  ;;  %v3449_v58 = vld [vmem:[%s5434_s8 + $0x18] sm:$0xff] }
 0xb73   : > { %4465 = vmatprep.subr.bf16.mxu1 %v4739_v4 }
 0xb76   : > { %v3353_v41 = vld [vmem:[%s5431_s5] sm:$0xff] }
 0xbb7   : > { %v2296_v45 = vpop.xlane.xlu1 %2295 }
 0xbb8   : > { %v2297_v46 = vmul.f32 0.03125, %v2296_v45 }
 0xbba   : > { %v2298_v47 = vadd.f32 1e-05, %v2297_v46 }
 0xbbc   : > { %4617 = vrsqrt.f32 %v2298_v47  ;;  %v3954_v47 = vld [vmem:[%s5423_s3 + $0x1] ss:$0 sm:$0xff]  ;;  %s5430_s3 = sld [smem:[#allocation23_spill]] }
 0xbc6   : > { %v4618_v48 = vpop.eup %4617 }
 0xbc7   : > { %v2300_v50 = vmul.f32 %v4618_v48, %v2292_v30 }
 0xbc9   : > { %v2307_v52 = vmul.f32 %v3928_v49, %v2300_v50 }
 0xbcb   : > { %v2314_v53 = vadd.f32 %v3929_v51, %v2307_v52  ;;  %v3947_v52 = vld [vmem:[%s5424_s16 + $0x1] ss:$0 sm:$0xff] }
 0xbcd   : > { %4242 = vmatmul.mubr.msk.f32.vlgmr.msra.gmra.mrb[10].mxu0 %vm1276_vm3, %v2314_v53 }
 0xbce   : > { %4263 = vmatprep.mubr.msk.f32.mxu0 %vm1276_vm3, %v5145_v37  ;;  %4453 = vmatpush3.bf16.msra.mxu0 %v4450_v11  ;;  %v3969_v11 = vld [vmem:[%s5429_s23 + $0x10] sm:$0xff] }
 0xbcf   : > { %4455 = vmatprep.subr.bf16.mxu0 %v4454_v13 }
 0xbd2   : > { %4457 = vmatpush3.bf16.msra.mxu0 %v4454_v13  ;;  %v4495_v13 = vpack.c.bf16 %v3970_v12, %v3969_v11 }
 0xbd3   : > { %4462 = vmatprep.subr.bf16.mxu0 %v4739_v4 }
 0xbd5   : > { %4264 = vmatmul.mubr.msk.f32.vlgmr.msra.gmra.mrb[12].mxu0 %vm1276_vm3, %v5148_v38 }
 0xbd6   : > { %4277 = vmatprep.mubr.msk.f32.mxu0 %vm4740_vm0, %v4741_v14 }
 0xca0   : > { %v2395_v0 = vpop.f32.mrb[10].mxu0 }
 0xca1   : > { %v2396_v2 = vadd.f32 %v3930_v63, %v2395_v0  ;;  %v4243_v3 = vpop.f32.mrb[11].mxu0 }
 0xca3   : > { %4271 = vmatmul.mubr.msk.f32.vlgmr.msra.gmra.mrb[18].mxu1 %vm1551_vm4, %v2396_v2 }
 0xca4   : > { %4467 = vmatpush3.bf16.msra.mxu1 %v4466_v1  ;;  %4288 = vmatprep.mubr.msk.f32.mxu1 %vm4740_vm0, %v4741_v14 }
 0xca5   : > { %4468 = vmatprep.subr.bf16.mxu1 %v4739_v4 }
 0xca8   : > { %4470 = vmatpush3.bf16.msra.mxu1 %v4469_v7  ;;  %v4265_v30 = vpop.f32.mrb[12].mxu0 }
 0xca9   : > { %v2568_v32 = vpop.f32.mrb[13].mxu0  ;;  %v2574_v33 = vadd.f32 %v4265_v30, %v3935_v31  ;;  %4480 = vmatprep.subr.bf16.mxu1 %v4479_v57  ;;  %v3973_v30 = vld [vmem:[%s5430_s3] ss:$0 sm:$0xff]  ;;  %s5432_s3 = sld [smem:[#allocation24_spill]] }
 0xcaa   : > { %v2569_v34 = vadd.f32 %v3935_v31, %v2568_v32 }
 0xcab   : > { %4289 = vmatmul.mubr.msk.f32.vlgmr.msra.gmra.mrb[20].mxu1 %vm1276_vm3, %v2314_v53 }
 0xcac   : > { %4310 = vmatprep.mubr.msk.f32.mxu1 %vm1276_vm3, %v5145_v37  ;;  %v4463_v35 = vpack.c.bf16 %v2574_v33, %v2569_v34  ;;  %4482 = vmatpush3.bf16.msra.mxu1 %v4479_v57  ;;  %v3448_v57 = vld [vmem:[%s5434_s8 + $0x10] sm:$0xff] }
 0xcad   : > { %4484 = vmatprep.subr.bf16.mxu1 %v4483_v60 }
 0xcae   : > { %4464 = vmatpush3.bf16.msra.mxu0 %v4463_v35 }
 0xcaf   : > { %4472 = vmatprep.subr.bf16.mxu0 %v4471_v16 }
 0xcb0   : > { %4486 = vmatpush3.bf16.msra.mxu1 %v4483_v60  ;;  %v4510_v60 = vpack.c.bf16 %v3449_v58, %v3448_v57 }
 0xcb1   : > { %4491 = vmatprep.subr.bf16.mxu1 %v4739_v4 }
 0xcb3   : > { %4311 = vmatmul.mubr.msk.f32.vlgmr.msra.gmra.mrb[22].mxu1 %vm1276_vm3, %v5148_v38 }
 0xcb4   : > { %4324 = vmatprep.mubr.msk.f32.mxu1 %vm4740_vm0, %v4741_v14 }
 0xd76   : > { %v2652_v15 = vpop.f32.mrb[18].mxu1 }
 0xd77   : > { %v2656_v18 = vmul.f32 0.25, %v2652_v15  ;;  %v4272_v19 = vpop.f32.mrb[19].mxu1 }
 0xd78   : > { %v2742_v19 = vld [vmem:[%s5429_s23 + $0x8] sm:$0xff] }
 0xd79   : > { %v2657_v20 = vsel %vm1551_vm4, %v2656_v18, -inf }
 0xd7a   : > { %2658 = vmax.xlane.f32.xlu1 %v2657_v20 }
 0xd7e   : > { %v2822_v21 = vpop.f32.mrb[20].mxu1 }
 0xd7f   : > { %v4290_v23 = vpop.f32.mrb[21].mxu1  ;;  %v2823_v53 = vadd.f32 %v3947_v52, %v2822_v21 }
 0xe07   : > { %v2659_v24 = vpop.xlane.xlu1 %2658 }
 0xe08   : > { %v2660_v25 = vsub.f32 %v2656_v18, %v2659_v24  ;;  %v2741_v18 = vld [vmem:[%s5429_s23] sm:$0xff] }
 0xe09   : > { %v4498_v21 = vpack.c.bf16 %v2742_v19, %v2741_v18 }
 0xe0a   : > { %v2661_v27 = vmul.f32 1.442695, %v2660_v25 }
 0xe0c   : > { %4619 = vpow2.f32 %v2661_v27 }
 0xe16   : > { %v4620_v28 = vpop.eup %4619 }
 0xe17   : > { %v2663_v29 = vsel %vm1551_vm4, %v4620_v28, 0.0 }
 0xe18   : > { %2664 = vadd.xlane.f32.xlu1 %v2663_v29 }
 0xea5   : > { %v2665_v39 = vpop.xlane.xlu1 %2664 }
 0xea6   : > { %4621 = vrcp.f32 %v2665_v39 }
 0xeb0   : > { %v4622_v42 = vpop.eup %4621 }
 0xeb1   : > { %v2667_v43 = vmul.f32 %v4622_v42, %v4620_v28  ;;  %v3354_v42 = vld [vmem:[%s5431_s5 + $0x8] sm:$0xff] }
 0xeb3   : > { %4278 = vmatmul.mubr.msk.f32.vlgmr.msra.gmra.mrb[14].mxu0 %vm1551_vm4, %v2667_v43  ;;  %v4501_v43 = vpack.c.bf16 %v3354_v42, %v3353_v41 }
 0xeb4   : > { %4474 = vmatpush3.bf16.msra.mxu0 %v4471_v16  ;;  %4299 = vmatprep.mubr.msk.f32.mxu0 %vm1276_vm3, %v5145_v37 }
 0xeb5   : > { %4476 = vmatprep.subr.bf16.mxu0 %v4475_v44 }
 0xeb8   : > { %4478 = vmatpush3.bf16.msra.mxu0 %v4475_v44  ;;  %v3356_v44 = vld [vmem:[%s5431_s5 + $0x18] sm:$0xff] }
 0xeb9   : > { %4487 = vmatprep.subr.bf16.mxu0 %v4739_v4 }
 0xebb   : > { %4300 = vmatmul.mubr.msk.f32.vlgmr.msra.gmra.mrb[16].mxu0 %vm1276_vm3, %v5148_v38  ;;  %v4312_v38 = vpop.f32.mrb[22].mxu1 }
 0xebc   : > { %4317 = vmatprep.mubr.msk.f32.mxu0 %vm4740_vm0, %v4741_v14  ;;  %v2993_v7 = vpop.f32.mrb[23].mxu1  ;;  %v2999_v8 = vadd.f32 %v4312_v38, %v3962_v6 }
 0xebd   : > { %v2994_v9 = vadd.f32 %v3962_v6, %v2993_v7 }
 0xebf   : > { %v4492_v10 = vpack.c.bf16 %v2999_v8, %v2994_v9 }
 0xec1   : > { %4493 = vmatpush3.bf16.msra.mxu1 %v4492_v10 }
 0xec2   : > { %4497 = vmatprep.subr.bf16.mxu1 %v4739_v4 }
 0xf86   : > { %v5212_v45 = vpop.f32.mrb[14].mxu0 }
 0xf87   : > { %v4279_v46 = vpop.f32.mrb[15].mxu0 }
 0xf8e   : > { %v4301_v37 = vpop.f32.mrb[16].mxu0 }
 0xf8f   : > { %v2911_v48 = vadd.f32 %v4301_v37, %v3954_v47  ;;  %v2905_v49 = vpop.f32.mrb[17].mxu0 }
 0xf90   : > { %v2906_v50 = vadd.f32 %v3954_v47, %v2905_v49  ;;  %v3974_v49 = vld [vmem:[%s5432_s3] ss:$0 sm:$0xff]  ;;  %s5437_s3 = sld [smem:[#allocation32_spill]] }
 0xf92   : > { %v4488_v51 = vpack.c.bf16 %v2911_v48, %v2906_v50 }
 0xf94   : > { %4490 = vmatpush3.bf16.xpose.msk.msra.mxu0 %vm5169_vm7, %v4488_v51  ;;  %v3975_v51 = vld [vmem:[%s5433_s6] ss:$0 sm:$0xff]  ;;  %s5436_s6 = sld [smem:[#allocation29_spill]] }
 0xf95   : > { %4494 = vmatprep.subr.bf16.mxu0 %v4739_v4 }
 0xf9a   : > { %v3978_v18 = vld [vmem:[%s5436_s6] ss:$0 sm:$0xff]  ;;  %s5439_s6 = sld [smem:[#allocation30_spill]] }
 0xf9b   : > { %4318 = vmatmul.mubr.msk.f32.vlgmr.msra.gmra.mrb[18].mxu0 %vm1551_vm4, %v2823_v53 }
 0xf9c   : > { %4331 = vmatprep.mubr.msk.f32.mxu0 %vm4740_vm0, %v4741_v14  ;;  %4496 = vmatpush3.bf16.msra.mxu0 %v4495_v13 }
 0xf9d   : > { %4500 = vmatprep.subr.bf16.mxu0 %v4739_v4 }
 0xfa0   : > { %v3980_v42 = vld [vmem:[%s5439_s6] ss:$0 sm:$0xff] }
0x106e   : > { %v3077_v59 = vpop.f32.mrb[18].mxu0 }
0x106f   : > { %v3081_v61 = vmul.f32 0.25, %v3077_v59  ;;  %v4319_v62 = vpop.f32.mrb[19].mxu0  ;;  %v3450_v59 = vld [vmem:[%s5434_s8 + $0x20] sm:$0xff] }
0x1071   : > { %v3082_v63 = vsel %vm1551_vm4, %v3081_v61, -inf }
0x1072   : > { %3083 = vmax.xlane.f32.xlu0 %v3082_v63  ;;  %v3452_v63 = vld [vmem:[%s5434_s8 + $0x30] sm:$0xff] }
0x10ff   : > { %v3084_v0 = vpop.xlane.xlu0 %3083 }
0x1100   : > { %v3085_v1 = vsub.f32 %v3081_v61, %v3084_v0  ;;  %v3451_v61 = vld [vmem:[%s5434_s8 + $0x28] sm:$0xff]  ;;  %v3453_v0 = vld [vmem:[%s5434_s8 + $0x38] sm:$0xff]  ;;  %s5440_s8 = sld [smem:[#allocation31_spill]] }
0x1101   : > { %v4513_v62 = vpack.c.bf16 %v3451_v61, %v3450_v59 }
0x1102   : > { %v3086_v2 = vmul.f32 1.442695, %v3085_v1  ;;  %v4516_v1 = vpack.c.bf16 %v3453_v0, %v3452_v63 }
0x1104   : > { %4623 = vpow2.f32 %v3086_v2 }
0x110e   : > { %v4624_v3 = vpop.eup %4623 }
0x110f   : > { %v3088_v5 = vsel %vm1551_vm4, %v4624_v3, 0.0 }
0x1110   : > { %3089 = vadd.xlane.f32.xlu1 %v3088_v5 }
0x119d   : > { %v3090_v15 = vpop.xlane.xlu1 %3089 }
0x119e   : > { %4625 = vrcp.f32 %v3090_v15 }
0x11a8   : > { %v4626_v20 = vpop.eup %4625 }
0x11a9   : > { %v3092_v23 = vmul.f32 %v4626_v20, %v4624_v3 }
0x11ab   : > { %4325 = vmatmul.mubr.msk.f32.vlgmr.msra.gmra.mrb[24].mxu1 %vm1551_vm4, %v3092_v23 }
0x11ac   : > { %4499 = vmatpush3.bf16.msra.mxu1 %v4498_v21  ;;  %4338 = vmatprep.mubr.msk.f32.mxu1 %vm4740_vm0, %v4741_v14 }
0x11ad   : > { %4506 = vmatprep.subr.bf16.mxu1 %v4739_v4 }
0x11af   : > { %4339 = vmatmul.mubr.msk.f32.vlgmr.msra.gmra.mrb[26].mxu1 %vm1551_vm4, %v5212_v45 }
0x11b0   : > { %4368 = vmatprep.mubr.msk.f32.mxu1 %vm4740_vm0, %v4741_v14  ;;  %4508 = vmatpush3.bf16.msra.mxu1 %v4507_v56 }
0x11b1   : > { %4509 = vmatprep.subr.bf16.mxu1 %v4739_v4 }
0x11b4   : > { %4511 = vmatpush3.bf16.msra.mxu1 %v4510_v60 }
0x11b5   : > { %4512 = vmatprep.subr.bf16.mxu1 %v4739_v4 }
0x11b8   : > { %4514 = vmatpush3.bf16.msra.mxu1 %v4513_v62 }
0x11b9   : > { %4515 = vmatprep.subr.bf16.mxu1 %v4739_v4 }
0x11bc   : > { %4517 = vmatpush3.bf16.msra.mxu1 %v4516_v1 }
0x127e   : > { %v3162_v24 = vpop.f32.mrb[24].mxu1 }
0x127f   : > { %v4326_v25 = vpop.f32.mrb[25].mxu1  ;;  %4332 = vmatmul.mubr.msk.f32.vlgmr.msra.gmra.mrb[20].mxu0 %vm1551_vm4, %v3162_v24 }
0x1280   : > { %4349 = vmatprep.mubr.msk.f32.mxu0 %vm4740_vm0, %v4741_v14  ;;  %4502 = vmatpush3.bf16.msra.mxu0 %v4501_v43 }
0x1281   : > { %4503 = vmatprep.subr.bf16.mxu0 %v4739_v4 }
0x1282   : > { %v3311_v27 = vpop.f32.mrb[26].mxu1 }
0x1283   : > { %v4340_v28 = vpop.f32.mrb[27].mxu1 }
0x1352   : > { %v3238_v29 = vpop.f32.mrb[20].mxu0 }
0x1353   : > { %v3312_v31 = vadd.f32 %v3311_v27, %v3238_v29  ;;  %v4333_v32 = vpop.f32.mrb[21].mxu0 }
0x1354   : > { %v3565_v32 = vld [vmem:[%s5437_s3 + $0x8] sm:$0xff] }
0x1355   : > { %v3322_v33 = vadd.f32 %v3973_v30, %v3312_v31  ;;  %v3564_v31 = vld [vmem:[%s5437_s3] sm:$0xff] }
0x1357   : > { %v5253_v34 = vadd.f32 %v3322_v33, %v5133_v26  ;;  %v3355_v26 = vld [vmem:[%s5431_s5 + $0x10] sm:$0xff]  ;;  %s5435_s5 = sld [smem:[#allocation27_spill]]  ;;  %v4519_v33 = vpack.c.bf16 %v3565_v32, %v3564_v31 }
0x1358   : > { %v4504_v45 = vpack.c.bf16 %v3356_v44, %v3355_v26  ;;  %v3981_v26 = vld [vmem:[%s5440_s8] ss:$0 sm:$0xff]  ;;  %s1175_s8 = scalar_lea.vmem %s5443_s4, %s4994_s2  ;;  %s4643_s4 = scalar_lea.vmem %s4642_s19, 256 }
0x1359   : > { %v3326_v35 = vsel %vm1276_vm3, %v5253_v34, 0.0 }
0x135a   : > { %3327 = vadd.xlane.f32.xlu0 %v3326_v35  ;;  %4505 = vmatpush3.bf16.msra.mxu0 %v4504_v45  ;;  %v3567_v35 = vld [vmem:[%s5437_s3 + $0x18] sm:$0xff]  ;;  %v3982_v45 = vld [vmem:[%s5442_s9] ss:$0 sm:$0xff] }
0x135b   : > { %4518 = vmatprep.subr.bf16.mxu0 %v4739_v4 }
0x135d   : > { %v3976_v2 = vld [vmem:[%s5435_s5] ss:$0 sm:$0xff]  ;;  %s5438_s5 = sld [smem:[#allocation6_spill]] }
0x1363   : > { %s1164_s14 = scalar_lea.vmem %s5438_s5, %s5441_s12  ;;  %s3986_s12 = sshll.u32 %s4960_s0, 7 }
0x1364   : > { %s5317_s5 = scalar_lea.hbm %s4927_s13, %s3986_s12 }
0x13e7   : > { %v3328_v22 = vpop.xlane.xlu0 %3327 }
0x13e8   : > { %v3329_v36 = vmul.f32 0.03125, %v3328_v22 }
0x13ea   : > { %v3330_v16 = vsub.f32 %v5253_v34, %v3329_v36  ;;  %v3649_v36 = vld [vmem:[%s1164_s14] sm:$0xff] }
0x13eb   : > { %vm3670_vm9 = vcmp.ne.s32.totalorder %v3649_v36, 4294967196 }
0x13ec   : > { %v3331_v39 = vmul.f32 %v3330_v16, %v3330_v16  ;;  %v3984_v57 = vsel %vm3670_vm9, 1.0, %v4741_v14 }
0x13ed   : > { %v3685_v58 = vsel %vm3675_vm10, %v3984_v57, 0.0 }
0x13ee   : > { %v3332_v40 = vsel %vm1276_vm3, %v3331_v39, 0.0 }
0x13ef   : > { %3333 = vadd.xlane.f32.xlu1 %v3332_v40 }
0x147c   : > { %v3334_v46 = vpop.xlane.xlu1 %3333 }
0x147d   : > { %v3335_v47 = vmul.f32 0.03125, %v3334_v46 }
0x147f   : > { %v3336_v37 = vadd.f32 1e-05, %v3335_v47 }
0x1481   : > { %4627 = vrsqrt.f32 %v3336_v37 }
0x148b   : > { %v4628_v48 = vpop.eup %4627 }
0x148c   : > { %v3338_v50 = vmul.f32 %v4628_v48, %v3330_v16 }
0x148e   : > { %v3345_v52 = vmul.f32 %v3974_v49, %v3338_v50 }
0x1490   : > { %v3352_v53 = vadd.f32 %v3975_v51, %v3345_v52 }
0x1492   : > { %4350 = vmatmul.mubr.msk.f32.vlgmr.msra.gmra.mrb[22].mxu0 %vm1276_vm3, %v3352_v53 }
0x1493   : > { %4379 = vmatprep.mubr.msk.f32.mxu0 %vm4740_vm0, %v4741_v14  ;;  %4520 = vmatpush3.bf16.msra.mxu0 %v4519_v33 }
0x1494   : > { %4521 = vmatprep.subr.bf16.mxu0 %v4739_v4 }
0x1565   : > { %v3433_v3 = vpop.f32.mrb[22].mxu0 }
0x1566   : > { %v3434_v5 = vadd.f32 %v3976_v2, %v3433_v3  ;;  %v4351_v38 = vpop.f32.mrb[23].mxu0 }
0x1568   : > { %v3437_v6 = vmul.f32 %v3434_v5, %v3434_v5 }
0x156a   : > { %v3438_v7 = vmul.f32 %v3437_v6, %v3434_v5 }
0x156c   : > { %v3439_v8 = vmul.f32 0.044715, %v3438_v7 }
0x156e   : > { %v3440_v9 = vadd.f32 %v3439_v8, %v3434_v5 }
0x1570   : > { %v3441_v10 = vmul.f32 0.7978846, %v3440_v9 }
0x1572   : > { %4629 = vtanh.f32 %v3441_v10 }
0x157c   : > { %v4630_v11 = vpop.eup %4629 }
0x157d   : > { %v3443_v12 = vadd.f32 1.0, %v4630_v11 }
0x157f   : > { %v3444_v13 = vmul.f32 0.5, %v3443_v12 }
0x1581   : > { %v3445_v15 = vmul.f32 %v3444_v13, %v3434_v5 }
0x1583   : > { %4369 = vmatmul.mubr.msk.f32.vlgmr.msra.gmra.mrb[28].mxu1 %vm1194_vm1, %v3445_v15 }
0x1656   : > { %v3530_v19 = vpop.f32.mrb[28].mxu1 }
0x1657   : > { %v3531_v20 = vadd.f32 %v3978_v18, %v3530_v19  ;;  %v4370_v21 = vpop.f32.mrb[29].mxu1 }
0x1659   : > { %v3534_v23 = vadd.f32 %v3531_v20, %v5253_v34  ;;  %v3566_v34 = vld [vmem:[%s5437_s3 + $0x10] sm:$0xff]  ;;  %s1144_s3 = sand.u32 1, %s4691_s10  }
0x165a   : > { %v4522_v22 = vpack.c.bf16 %v3567_v35, %v3566_v34  ;;  %s5301_s16 = sshll.u32 %s1144_s3, 3  ;;  %s3694_s6 = scalar_lea.sflag [#allocation3], %s1144_s3 }
0x165b   : > { %v3537_v24 = vsel %vm1276_vm3, %v3534_v23, 0.0  ;;  %s1146_s14 = scalar_lea.vmem [#allocation2], %s5301_s16 }
0x165c   : > { %3538 = vadd.xlane.f32.xlu0 %v3537_v24  ;;  %4523 = vmatpush3.bf16.msra.mxu0 %v4522_v22  ;;  %s3713_s16 = sshll.u32 %s1146_s14, 4  ;;  %s3714_s16 = int_to_ptr.vmem [resolvable:$true] %s3713_s16 }
0x165d   : > { %s4637_s9 = scalar_lea.vmem %s3714_s16, 128  ;;  %p4644_p0 = scmp.lt.s32.totalorder %s3714_s16, %s4642_s19 }
0x165e   : > { %p4638_p11 = scmp.ne.s32.totalorder %s3714_s16, %s4637_s9  ;;  %p4645_p1 = scmp.lt.s32.totalorder %s4643_s4, %s4637_s9 }
0x1660   : > { %p4639_p12 = pnand %p4638_p11, %p4977_p5  ;;  %p4646_p2 = por %p4645_p1, %p4644_p0 }
0x1662   : > { %p4640_p13 = pneg %p4639_p12 }
0x1664   : > { %p4647_p3 = pnand %p4646_p2, %p4640_p13 }
0x16e9   : > { %v3539_v25 = vpop.xlane.xlu0 %3538 }
0x16ea   : > { %v3540_v27 = vmul.f32 0.03125, %v3539_v25 }
0x16ec   : > { %v3541_v28 = vsub.f32 %v3534_v23, %v3540_v27 }
0x16ee   : > { %v3542_v29 = vmul.f32 %v3541_v28, %v3541_v28 }
0x16f0   : > { %v3543_v30 = vsel %vm1276_vm3, %v3542_v29, 0.0 }
0x16f1   : > { %3544 = vadd.xlane.f32.xlu1 %v3543_v30 }
0x1702   : > { %3663 = vperm.xlu1 %4606, %v3649_v36  }
0x177e   : > { %v3545_v16 = vpop.xlane.xlu1 %3544 }
0x177f   : > { %v3546_v39 = vmul.f32 0.03125, %v3545_v16 }
0x1781   : > { %v3547_v40 = vadd.f32 1e-05, %v3546_v39 }
0x1782   : > { %v3664_v52 = vpop.permute.xlu1 %3663 }
0x1783   : > { %4631 = vrsqrt.f32 %v3547_v40  ;;  %vm3665_vm8 = vcmp.eq.s32.totalorder %v5014_v17, %v3664_v52  ;;  %v3686_v17 = vrot.slane %v3685_v58, 4 }
0x1785   : > { %v3687_v60 = vadd.f32 %v3686_v17, %v3685_v58 }
0x1787   : > { %v3688_v59 = vrot.slane %v3687_v60, 2 }
0x1789   : > { %v3689_v61 = vadd.f32 %v3688_v59, %v3687_v60 }
0x178b   : > { %v3690_v62 = vrot.slane %v3689_v61, 1 }
0x178d   : > { %v4632_v41 = vpop.eup %4631  ;;  %v3691_v63 = vadd.f32 %v3690_v62, %v3689_v61 }
0x178e   : > { %v3549_v43 = vmul.f32 %v4632_v41, %v3541_v28 }
0x178f   : > { %3692 = vst.msk [vmem:[%s1175_s8] sm:$0x1] %vm3683_vm11, %v3691_v63 }
0x1790   : > { %v3556_v4 = vmul.f32 %v3980_v42, %v3549_v43 }
0x1792   : > { %v3563_v44 = vadd.f32 %v3981_v26, %v3556_v4 }
0x1794   : > { %4380 = vmatmul.mubr.msk.f32.vlgmr.msra.gmra.mrb[24].mxu0 %vm1276_vm3, %v3563_v44 }
0x1867   : > { %v3644_v46 = vpop.f32.mrb[24].mxu0 }
0x1868   : > { %v3645_v47 = vadd.f32 %v3982_v45, %v3644_v46  ;;  %v4381_v37 = vpop.f32.mrb[25].mxu0 }
0x186a   : > { %v3650_v48 = vsel %vm1194_vm1, %v3645_v47, -inf  ;;  %3648 = vst.msk [vmem:[%s1146_s14] sm:$0xff] %vm1194_vm1, %v3645_v47  ;;  %v3666_v55 = vsel %vm3665_vm8, %v3645_v47, -1e+30 }
0x186b   : > { %3651 = vmax.xlane.f32.xlu0 %v3650_v48  ;;  %v3667_v56 = vsel %vm1194_vm1, %v3666_v55, -inf }
0x18f8   : > { %v3652_v49 = vpop.xlane.xlu0 %3651 }
0x18f9   : > { %v3653_v50 = vsub.f32 %v3645_v47, %v3652_v49 }
0x18fb   : > { %v3654_v51 = vmul.f32 1.442695, %v3653_v50 }
0x18fd   : > { %4633 = vpow2.f32 %v3654_v51 }
0x1907   : > { %v4634_v53 = vpop.eup %4633 }
0x1908   : > { %v3656_v54 = vsel %vm1194_vm1, %v4634_v53, 0.0 }
0x1909   : > { %3657 = vadd.xlane.f32.xlu0 %v3656_v54 }
0x190d   : > { %3668 = vmax.xlane.f32.xlu0 %v3667_v56 }
0x190e   : > { %4650 = shalt.err (!%p4647_p3)
}
0x190f   : > { %s4651_s0 = scalar_lea.hbm %s5317_s5, 128  ;;  %s4655_s17 = scalar_lea.hbm %s4927_s13, 256 }
0x1910   : > { %p4652_p4 = scmp.ne.s32.totalorder %s5317_s5, %s4651_s0  ;;  %p4656_p9 = scmp.lt.u32.totalorder %s5317_s5, %s4927_s13 }
0x1911   : > { %p4657_p10 = scmp.lt.u32.totalorder %s4655_s17, %s4651_s0  ;;  %p4659_p12 = scmp.lt.u32.totalorder %s4651_s0, %s5317_s5 }
0x1912   : > { %p4653_p7 = pnand %p4652_p4, %p4977_p5 }
0x1913   : > { %p4658_p11 = por %p4657_p10, %p4656_p9 }
0x1914   : > { %p4654_p8 = pneg %p4653_p7 }
0x1915   : > { %p4660_p0 = por %p4659_p12, %p4658_p11 }
0x1917   : > { %p4661_p13 = pnand %p4660_p0, %p4654_p8 }
0x1919   : > { %4664 = shalt.err (!%p4661_p13)
}
0x191a   : > { %4524 = dma.vmem_to_hbm [thread:$0]  (%p4977_p5), %s3714_s16, 128, %s5317_s5, %s3694_s6  }
0x191b   : > { %s1172_s9 = scalar_lea.vmem %s4932_s27, %s4994_s2 }
0x1996   : > { %v3658_v14 = vpop.xlane.xlu0 %3657 }
0x1997   : > { %4635 = vlog2.f32 %v3658_v14 }
0x199a   : > { %v3669_v3 = vpop.xlane.xlu0 %3668 }
0x19a1   : > { %v4636_v0 = vpop.eup %4635 }
0x19a2   : > { %v3660_v1 = vmul.f32 0.6931472, %v4636_v0 }
0x19a4   : > { %v3661_v2 = vadd.f32 %v3660_v1, %v3652_v49 }
0x19a6   : > { %v3673_v5 = vsub.f32 %v3661_v2, %v3669_v3 }
0x19a8   : > { %v3674_v38 = vmul.f32 %v3984_v57, %v3673_v5 }
0x19aa   : > { %v3676_v6 = vsel %vm3675_vm10, %v3674_v38, 0.0 }
0x19ab   : > { %v3677_v7 = vrot.slane %v3676_v6, 4 }
0x19ad   : > { %v3678_v8 = vadd.f32 %v3677_v7, %v3676_v6 }
0x19af   : > { %v3679_v9 = vrot.slane %v3678_v8, 2 }
0x19b1   : > { %v3680_v10 = vadd.f32 %v3679_v9, %v3678_v8 }
0x19b3   : > { %v3681_v11 = vrot.slane %v3680_v10, 1 }
0x19b5   : > { %v3682_v12 = vadd.f32 %v3681_v11, %v3680_v10 }
0x19b7   : > { %3684 = vst.msk [vmem:[%s1172_s9] sm:$0x1] %vm3683_vm11, %v3682_v12 }
0x19b8 PF: > { %p4530_p5 = scmp.ge.s32.totalorder %s4699_s15, 2  ;;  %s3731_s19 = sand.u32 1, %s4687_s7  }
0x19b9   : > { %s3732_s4 = scalar_lea.sflag [#allocation3], %s3731_s19 }
0x19ba   : > { %p4527_p1 = pnand %p4530_p5, %p4981_p6 }
0x19bc   : > { %4682 = dma.done.wait (!%p4527_p1), %s3732_s4, 128  }
0x19bd   : > { %4684 = vsyncadd (!%p4527_p1), %s3732_s4, 4294967168  ;;  %p86_p2 = scmp.ge.s32.totalorder %s4964_s18, 4   ;;  %s5444_s7 = smov %s4691_s10 }
0x19be   : > { %s5445_s10 = smov %s4695_s11  ;;  %s5446_s11 = smov %s4975_s26 }
0x19bf   : > { %s5447_s15 = smov %s4964_s18  ;;  %88 = sbr.rel (!%p86_p2) target bundleno = 85 (0x55), region = 276 }
0x19c6   :  { %3749 = vsyncpa [#allocation3], 1 }
0x19c7   :  { %3751 = vsyncpa [#allocation3 + $0x1], 1 }

</bundles_post_ra>
